<compile_context>
chip_gen: v6e
topology: v6e:2x2x1
jax: 0.10.0
libtpu: 0.0.40
codegen_flags: <defaults>
</compile_context>

<pallas_src>
import functools

import jax
import jax.numpy as jnp
from jax.experimental import pallas as pl
from jax.experimental.pallas import tpu as pltpu


BN_EPS = 0.8          # nn.BatchNorm1d(N, 0.8) -> eps = 0.8
LEAKY_SLOPE = 0.2

D1, D2, D3, D4 = 128, 256, 512, 1024


def _prod(xs):
    p = 1
    for x in xs:
        p *= int(x)
    return p


def _round_up(x, m):
    return (x + m - 1) // m * m


def _vec_layout(p_pad):
    """Static offsets of the packed (1, TOTAL) per-feature-vector array.

    All entry sizes are multiples of 128, so every static slice below is
    lane-aligned.
    """
    offsets = {}
    off = 0
    for name, dim in (("b1", D1), ("g2", D2), ("be2", D2),
                      ("g3", D3), ("be3", D3), ("g4", D4), ("be4", D4),
                      ("s3", D3), ("s4", D4), ("s5", p_pad), ("b5", p_pad)):
        offsets[name] = (off, dim)
        off += dim
    return offsets, off  # (layout, total)


def _leaky_relu(x):
    return jnp.where(x > 0, x, LEAKY_SLOPE * x)


def generator_kernel(layout, z_ref, w1_ref, w2_ref, w3_ref, w4_ref, w5_ref,
                     vec_ref, out_ref):
    def vec(name):
        off, dim = layout[name]
        return vec_ref[:, off:off + dim]          # static, lane-aligned, (1, dim)

    def deq(w_ref):
        # int8 -> f32 -> bf16: two-step convert (portable Mosaic lowering);
        # int8 values are integers <= 127, exactly representable in bf16.
        return w_ref[...].astype(jnp.float32).astype(jnp.bfloat16)

    def bn_leaky(acc, gamma, beta, scale=None):
        # Training-mode BatchNorm1d (batch mean, biased variance) folded into
        # a single scale/shift, followed by LeakyReLU(0.2).  One-pass variance
        # (E[x^2] - mu^2, clamped).  When `scale` is given, `acc` is the raw
        # dot with the *unscaled* int8 weights; the per-column scale is folded
        # exactly into the (1, dim) vectors (eps handled correctly):
        #   x = acc*s; mu_x = s*mu; var_x = s^2*var
        #   inv = gamma*s*rsqrt(s^2*var + eps);  y = acc*inv + (beta - mu*inv)
        mu = jnp.mean(acc, axis=0, keepdims=True)
        ex2 = jnp.mean(jnp.square(acc), axis=0, keepdims=True)
        var = jnp.maximum(ex2 - jnp.square(mu), 0.0)
        if scale is None:
            inv = gamma * jax.lax.rsqrt(var + BN_EPS)
        else:
            inv = gamma * scale * jax.lax.rsqrt(jnp.square(scale) * var + BN_EPS)
        y = acc * inv + (beta - mu * inv)
        return _leaky_relu(y)

    # Block 1: Linear(latent, 128) + LeakyReLU                     (bf16 weight)
    z = z_ref[...].astype(jnp.bfloat16)
    h = jnp.dot(z, w1_ref[...], preferred_element_type=jnp.float32) + vec("b1")
    h = _leaky_relu(h)

    # Block 2: Linear(128, 256) [bias absorbed by BN] + BN + LeakyReLU (bf16)
    acc = jnp.dot(h.astype(jnp.bfloat16), w2_ref[...],
                  preferred_element_type=jnp.float32)
    h = bn_leaky(acc, vec("g2"), vec("be2"))

    # Block 3: Linear(256, 512) + BN + LeakyReLU                   (int8 weight)
    acc = jnp.dot(h.astype(jnp.bfloat16), deq(w3_ref),
                  preferred_element_type=jnp.float32)
    h = bn_leaky(acc, vec("g3"), vec("be3"), vec("s3"))

    # Block 4: Linear(512, 1024) + BN + LeakyReLU                  (int8 weight)
    acc = jnp.dot(h.astype(jnp.bfloat16), deq(w4_ref),
                  preferred_element_type=jnp.float32)
    h = bn_leaky(acc, vec("g4"), vec("be4"), vec("s4"))

    # Block 5: Linear(1024, P_pad) + Tanh (int8 weight; explicit dequant scale,
    # padded columns have q=0, s=1, b=0 -> tanh(0)=0, sliced off in wrapper).
    acc = jnp.dot(h.astype(jnp.bfloat16), deq(w5_ref),
                  preferred_element_type=jnp.float32)
    out_ref[...] = jnp.tanh(acc * vec("s5") + vec("b5"))


@functools.partial(jax.jit, static_argnames=("img_shape",))
def generator_forward(z, params, img_shape):
    B, L = z.shape
    P = _prod(img_shape)
    P_pad = _round_up(P, 128)

    layout, total = _vec_layout(P_pad)

    flat_inputs = (
        z,
        params["w1"], params["w2"],
        params["w3q"], params["w4q"], params["w5q"],
        params["vec"],
    )

    # Advisory cost estimate: ~2*B*sum(din*dout) flops; bytes dominated by the
    # (now mostly int8) weights.
    flops = 2 * B * (L * D1 + D1 * D2 + D2 * D3 + D3 * D4 + D4 * P_pad)
    bytes_accessed = (
        2 * (L * D1 + D1 * D2)                   # bf16 w1, w2
        + (D2 * D3 + D3 * D4 + D4 * P_pad)       # int8 w3, w4, w5
        + 4 * total                              # packed per-feature vectors
        + 4 * B * L + 4 * B * P_pad              # z in, out
    )
    transcendentals = B * P_pad + (D2 + D3 + D4)  # tanh + rsqrt

    vmem_spec = pl.BlockSpec(memory_space=pltpu.MemorySpace.VMEM)
    flat = pl.pallas_call(
        functools.partial(generator_kernel, layout),
        out_shape=jax.ShapeDtypeStruct((B, P_pad), jnp.float32),
        in_specs=[vmem_spec] * len(flat_inputs),
        out_specs=vmem_spec,
        # Real footprint ~1 MB staged operands + a few MB of dequant temps;
        # 16 MiB leaves margin while staying well under v7x's 32/64 MiB budget.
        compiler_params=pltpu.CompilerParams(vmem_limit_bytes=16 << 20),
        cost_estimate=pl.CostEstimate(
            flops=flops,
            transcendentals=transcendentals,
            bytes_accessed=bytes_accessed,
        ),
    )(*flat_inputs)

    # Drop lane padding, then same as PyTorch: img.view(B, *img_shape).
    return flat[:, :P].reshape((B,) + tuple(img_shape))


def _quantize_per_col(w):
    """Symmetric per-output-column int8 quantization. Returns (q, scale)."""
    amax = jnp.max(jnp.abs(w), axis=0, keepdims=True)
    scale = jnp.where(amax > 0, amax / 127.0, 1.0).astype(jnp.float32)
    q = jnp.round(w / scale).astype(jnp.int8)
    return q, scale


def init_params(key, latent_dim, img_shape):
    """Deterministic synthetic parameters (shapes mirror the PyTorch module)."""
    P = _prod(img_shape)
    P_pad = _round_up(P, 128)
    dims = [latent_dim, D1, D2, D3, D4, P]

    keys = jax.random.split(key, 16)
    k = iter(keys)

    def linear(kw, kb, din, dout):
        w = jax.random.normal(kw, (din, dout), jnp.float32) * 0.05
        b = jax.random.normal(kb, (1, dout), jnp.float32) * 0.01
        return w, b

    w1, b1 = linear(next(k), next(k), dims[0], dims[1])
    w2, _b2 = linear(next(k), next(k), dims[1], dims[2])   # bias absorbed by BN
    w3, _b3 = linear(next(k), next(k), dims[2], dims[3])   # bias absorbed by BN
    w4, _b4 = linear(next(k), next(k), dims[3], dims[4])   # bias absorbed by BN
    w5, b5 = linear(next(k), next(k), dims[4], dims[5])

    # Pad the output projection to a lane-dense width (zero cols -> tanh(0)=0,
    # sliced off in the wrapper).
    if P_pad != P:
        w5 = jnp.pad(w5, ((0, 0), (0, P_pad - P)))
        b5 = jnp.pad(b5, ((0, 0), (0, P_pad - P)))

    # BatchNorm affine params (gamma ~1, beta ~0 like PyTorch default, plus a
    # tiny deterministic perturbation so they are not trivially identity).
    bn = {}
    for name, dim in (("2", dims[2]), ("3", dims[3]), ("4", dims[4])):
        bn["g" + name] = jnp.ones((1, dim), jnp.float32) + 0.01 * jax.random.normal(
            next(k), (1, dim), jnp.float32)
        bn["be" + name] = 0.01 * jax.random.normal(next(k), (1, dim), jnp.float32)

    # Quantize the dominant weights to int8 with per-column scales.
    w3q, s3 = _quantize_per_col(w3)
    w4q, s4 = _quantize_per_col(w4)
    w5q, s5 = _quantize_per_col(w5)

    # Pack all small per-feature vectors into one contiguous (1, TOTAL) array.
    layout, total = _vec_layout(P_pad)
    pieces = {"b1": b1, "g2": bn["g2"], "be2": bn["be2"],
              "g3": bn["g3"], "be3": bn["be3"],
              "g4": bn["g4"], "be4": bn["be4"],
              "s3": s3, "s4": s4, "s5": s5, "b5": b5}
    vec = jnp.zeros((1, total), jnp.float32)
    for name, (off, dim) in layout.items():
        vec = vec.at[:, off:off + dim].set(pieces[name])

    return {
        "w1": w1.astype(jnp.bfloat16),
        "w2": w2.astype(jnp.bfloat16),
        "w3q": w3q,
        "w4q": w4q,
        "w5q": w5q,
        "vec": vec,
    }


def reference_forward(z, params, img_shape):
    """Pure-JAX f32 reference using the same effective (dequantized) weights."""
    P = _prod(img_shape)
    P_pad = _round_up(P, 128)
    layout, _ = _vec_layout(P_pad)
    vec = params["vec"]

    def v(name):
        off, dim = layout[name]
        return vec[:, off:off + dim]

    w1 = params["w1"].astype(jnp.float32)
    w2 = params["w2"].astype(jnp.float32)
    w3 = params["w3q"].astype(jnp.float32) * v("s3")
    w4 = params["w4q"].astype(jnp.float32) * v("s4")
    w5 = params["w5q"].astype(jnp.float32) * v("s5")

    def bn_leaky(x, g, b):
        mu = jnp.mean(x, axis=0, keepdims=True)
        var = jnp.mean(jnp.square(x - mu), axis=0, keepdims=True)
        y = (x - mu) * (g * jax.lax.rsqrt(var + BN_EPS)) + b
        return _leaky_relu(y)

    h = _leaky_relu(z @ w1 + v("b1"))
    h = bn_leaky(h @ w2, v("g2"), v("be2"))
    h = bn_leaky(h @ w3, v("g3"), v("be3"))
    h = bn_leaky(h @ w4, v("g4"), v("be4"))
    h = jnp.tanh(h @ w5 + v("b5"))
    return h[:, :P].reshape((z.shape[0],) + tuple(img_shape))


if __name__ == "__main__":
    latent_dim = 32
    img_shape = (1, 16, 16)   # C, H, W  -> prod = 256
    batch = 16                # multiple of 16: full bf16 sublane tiles

    key = jax.random.PRNGKey(0)
    k_params, k_z = jax.random.split(key)

    params = init_params(k_params, latent_dim, img_shape)
    z = jax.random.normal(k_z, (batch, latent_dim), jnp.float32)

    out = generator_forward(z, params, img_shape)
    out = jax.block_until_ready(out)

    assert out.shape == (batch,) + img_shape, out.shape
    assert bool(jnp.all(jnp.isfinite(out)))
    assert bool(jnp.all(jnp.abs(out) <= 1.0))  # tanh range

    # Validate against an f32 reference with the same effective weights
    # (kernel differs only by bf16 activation casts inside the matmuls).
    ref = reference_forward(z, params, img_shape)
    max_err = float(jnp.max(jnp.abs(out - ref)))
    assert max_err < 0.05, f"max |kernel - ref| = {max_err}"

    print("KERNEL_OK")
</pallas_src>

<mosaic_0001>
module attributes {stable_mosaic.version = 11 : i64} {
  func.func @generator_kernel(%arg0: memref<16x32xf32, #tpu.memory_space<vmem>>, %arg1: memref<32x128xbf16, #tpu.memory_space<vmem>>, %arg2: memref<128x256xbf16, #tpu.memory_space<vmem>>, %arg3: memref<256x512xi8, #tpu.memory_space<vmem>>, %arg4: memref<512x1024xi8, #tpu.memory_space<vmem>>, %arg5: memref<1024x256xi8, #tpu.memory_space<vmem>>, %arg6: memref<1x5760xf32, #tpu.memory_space<vmem>>, %arg7: memref<16x256xf32, #tpu.memory_space<vmem>>) attributes {dimension_semantics = [], scalar_prefetch = 0 : i64, scratch_operands = 0 : i64, tpu.core_type = #tpu.core_type<tc>} {
    %c0 = arith.constant 0 : index
    %c0_0 = arith.constant 0 : index
    %0 = vector.load %arg0[%c0, %c0_0] : memref<16x32xf32, #tpu.memory_space<vmem>>, vector<16x32xf32>
    %1 = arith.truncf %0 : vector<16x32xf32> to vector<16x32xbf16>
    %c0_1 = arith.constant 0 : index
    %c0_2 = arith.constant 0 : index
    %2 = vector.load %arg1[%c0_1, %c0_2] : memref<32x128xbf16, #tpu.memory_space<vmem>>, vector<32x128xbf16>
    %cst = arith.constant dense<0.000000e+00> : vector<16x128xf32>
    %3 = tpu.matmul %1, %2, %cst {dimension_numbers = #tpu.dot_dimension_numbers<[1], [0], [0], [1], [0, 0, 1, 1], [], []>} : vector<16x32xbf16>, vector<32x128xbf16>, vector<16x128xf32> -> vector<16x128xf32>
    %c0_3 = arith.constant 0 : index
    %c0_4 = arith.constant 0 : index
    %4 = vector.load %arg6[%c0_3, %c0_4] : memref<1x5760xf32, #tpu.memory_space<vmem>>, vector<1x128xf32>
    %5 = vector.broadcast %4 : vector<1x128xf32> to vector<16x128xf32>
    %6 = arith.addf %3, %5 : vector<16x128xf32>
    %cst_5 = arith.constant 0.000000e+00 : f32
    %7 = vector.broadcast %cst_5 : f32 to vector<16x128xf32>
    %8 = arith.cmpf ogt, %6, %7 : vector<16x128xf32>
    %cst_6 = arith.constant 2.000000e-01 : f32
    %9 = vector.broadcast %cst_6 : f32 to vector<16x128xf32>
    %10 = arith.mulf %9, %6 : vector<16x128xf32>
    %11 = arith.select %8, %6, %10 : vector<16x128xi1>, vector<16x128xf32>
    %12 = arith.truncf %11 : vector<16x128xf32> to vector<16x128xbf16>
    %c0_7 = arith.constant 0 : index
    %c0_8 = arith.constant 0 : index
    %13 = vector.load %arg2[%c0_7, %c0_8] : memref<128x256xbf16, #tpu.memory_space<vmem>>, vector<128x256xbf16>
    %cst_9 = arith.constant dense<0.000000e+00> : vector<16x256xf32>
    %14 = tpu.matmul %12, %13, %cst_9 {dimension_numbers = #tpu.dot_dimension_numbers<[1], [0], [0], [1], [0, 0, 1, 1], [], []>} : vector<16x128xbf16>, vector<128x256xbf16>, vector<16x256xf32> -> vector<16x256xf32>
    %c0_10 = arith.constant 0 : index
    %c128 = arith.constant 128 : index
    %15 = vector.load %arg6[%c0_10, %c128] : memref<1x5760xf32, #tpu.memory_space<vmem>>, vector<1x256xf32>
    %c0_11 = arith.constant 0 : index
    %c384 = arith.constant 384 : index
    %16 = vector.load %arg6[%c0_11, %c384] : memref<1x5760xf32, #tpu.memory_space<vmem>>, vector<1x256xf32>
    %cst_12 = arith.constant dense<0.000000e+00> : vector<256xf32>
    %17 = vector.multi_reduction <add>, %14, %cst_12 [0] : vector<16x256xf32> to vector<256xf32>
    %18 = vector.shape_cast %17 : vector<256xf32> to vector<1x256xf32>
    %cst_13 = arith.constant 1.600000e+01 : f32
    %19 = vector.broadcast %cst_13 : f32 to vector<1x256xf32>
    %20 = arith.divf %18, %19 : vector<1x256xf32>
    %21 = arith.mulf %14, %14 : vector<16x256xf32>
    %cst_14 = arith.constant dense<0.000000e+00> : vector<256xf32>
    %22 = vector.multi_reduction <add>, %21, %cst_14 [0] : vector<16x256xf32> to vector<256xf32>
    %23 = vector.shape_cast %22 : vector<256xf32> to vector<1x256xf32>
    %cst_15 = arith.constant 1.600000e+01 : f32
    %24 = vector.broadcast %cst_15 : f32 to vector<1x256xf32>
    %25 = arith.divf %23, %24 : vector<1x256xf32>
    %26 = arith.mulf %20, %20 : vector<1x256xf32>
    %27 = arith.subf %25, %26 : vector<1x256xf32>
    %cst_16 = arith.constant 0.000000e+00 : f32
    %28 = vector.broadcast %cst_16 : f32 to vector<1x256xf32>
    %29 = arith.maximumf %27, %28 : vector<1x256xf32>
    %cst_17 = arith.constant 8.000000e-01 : f32
    %30 = vector.broadcast %cst_17 : f32 to vector<1x256xf32>
    %31 = arith.addf %29, %30 : vector<1x256xf32>
    %32 = math.rsqrt %31 : vector<1x256xf32>
    %33 = arith.mulf %15, %32 : vector<1x256xf32>
    %34 = vector.broadcast %33 : vector<1x256xf32> to vector<16x256xf32>
    %35 = arith.mulf %14, %34 : vector<16x256xf32>
    %36 = arith.mulf %20, %33 : vector<1x256xf32>
    %37 = arith.subf %16, %36 : vector<1x256xf32>
    %38 = vector.broadcast %37 : vector<1x256xf32> to vector<16x256xf32>
    %39 = arith.addf %35, %38 : vector<16x256xf32>
    %cst_18 = arith.constant 0.000000e+00 : f32
    %40 = vector.broadcast %cst_18 : f32 to vector<16x256xf32>
    %41 = arith.cmpf ogt, %39, %40 : vector<16x256xf32>
    %cst_19 = arith.constant 2.000000e-01 : f32
    %42 = vector.broadcast %cst_19 : f32 to vector<16x256xf32>
    %43 = arith.mulf %42, %39 : vector<16x256xf32>
    %44 = arith.select %41, %39, %43 : vector<16x256xi1>, vector<16x256xf32>
    %45 = arith.truncf %44 : vector<16x256xf32> to vector<16x256xbf16>
    %c0_20 = arith.constant 0 : index
    %c0_21 = arith.constant 0 : index
    %46 = vector.load %arg3[%c0_20, %c0_21] : memref<256x512xi8, #tpu.memory_space<vmem>>, vector<256x512xi8>
    %47 = arith.sitofp %46 : vector<256x512xi8> to vector<256x512xf32>
    %48 = arith.truncf %47 : vector<256x512xf32> to vector<256x512xbf16>
    %cst_22 = arith.constant dense<0.000000e+00> : vector<16x512xf32>
    %49 = tpu.matmul %45, %48, %cst_22 {dimension_numbers = #tpu.dot_dimension_numbers<[1], [0], [0], [1], [0, 0, 1, 1], [], []>} : vector<16x256xbf16>, vector<256x512xbf16>, vector<16x512xf32> -> vector<16x512xf32>
    %c0_23 = arith.constant 0 : index
    %c640 = arith.constant 640 : index
    %50 = vector.load %arg6[%c0_23, %c640] : memref<1x5760xf32, #tpu.memory_space<vmem>>, vector<1x512xf32>
    %c0_24 = arith.constant 0 : index
    %c1152 = arith.constant 1152 : index
    %51 = vector.load %arg6[%c0_24, %c1152] : memref<1x5760xf32, #tpu.memory_space<vmem>>, vector<1x512xf32>
    %c0_25 = arith.constant 0 : index
    %c3712 = arith.constant 3712 : index
    %52 = vector.load %arg6[%c0_25, %c3712] : memref<1x5760xf32, #tpu.memory_space<vmem>>, vector<1x512xf32>
    %cst_26 = arith.constant dense<0.000000e+00> : vector<512xf32>
    %53 = vector.multi_reduction <add>, %49, %cst_26 [0] : vector<16x512xf32> to vector<512xf32>
    %54 = vector.shape_cast %53 : vector<512xf32> to vector<1x512xf32>
    %cst_27 = arith.constant 1.600000e+01 : f32
    %55 = vector.broadcast %cst_27 : f32 to vector<1x512xf32>
    %56 = arith.divf %54, %55 : vector<1x512xf32>
    %57 = arith.mulf %49, %49 : vector<16x512xf32>
    %cst_28 = arith.constant dense<0.000000e+00> : vector<512xf32>
    %58 = vector.multi_reduction <add>, %57, %cst_28 [0] : vector<16x512xf32> to vector<512xf32>
    %59 = vector.shape_cast %58 : vector<512xf32> to vector<1x512xf32>
    %cst_29 = arith.constant 1.600000e+01 : f32
    %60 = vector.broadcast %cst_29 : f32 to vector<1x512xf32>
    %61 = arith.divf %59, %60 : vector<1x512xf32>
    %62 = arith.mulf %56, %56 : vector<1x512xf32>
    %63 = arith.subf %61, %62 : vector<1x512xf32>
    %cst_30 = arith.constant 0.000000e+00 : f32
    %64 = vector.broadcast %cst_30 : f32 to vector<1x512xf32>
    %65 = arith.maximumf %63, %64 : vector<1x512xf32>
    %66 = arith.mulf %50, %52 : vector<1x512xf32>
    %67 = arith.mulf %52, %52 : vector<1x512xf32>
    %68 = arith.mulf %67, %65 : vector<1x512xf32>
    %cst_31 = arith.constant 8.000000e-01 : f32
    %69 = vector.broadcast %cst_31 : f32 to vector<1x512xf32>
    %70 = arith.addf %68, %69 : vector<1x512xf32>
    %71 = math.rsqrt %70 : vector<1x512xf32>
    %72 = arith.mulf %66, %71 : vector<1x512xf32>
    %73 = vector.broadcast %72 : vector<1x512xf32> to vector<16x512xf32>
    %74 = arith.mulf %49, %73 : vector<16x512xf32>
    %75 = arith.mulf %56, %72 : vector<1x512xf32>
    %76 = arith.subf %51, %75 : vector<1x512xf32>
    %77 = vector.broadcast %76 : vector<1x512xf32> to vector<16x512xf32>
    %78 = arith.addf %74, %77 : vector<16x512xf32>
    %cst_32 = arith.constant 0.000000e+00 : f32
    %79 = vector.broadcast %cst_32 : f32 to vector<16x512xf32>
    %80 = arith.cmpf ogt, %78, %79 : vector<16x512xf32>
    %cst_33 = arith.constant 2.000000e-01 : f32
    %81 = vector.broadcast %cst_33 : f32 to vector<16x512xf32>
    %82 = arith.mulf %81, %78 : vector<16x512xf32>
    %83 = arith.select %80, %78, %82 : vector<16x512xi1>, vector<16x512xf32>
    %84 = arith.truncf %83 : vector<16x512xf32> to vector<16x512xbf16>
    %c0_34 = arith.constant 0 : index
    %c0_35 = arith.constant 0 : index
    %85 = vector.load %arg4[%c0_34, %c0_35] : memref<512x1024xi8, #tpu.memory_space<vmem>>, vector<512x1024xi8>
    %86 = arith.sitofp %85 : vector<512x1024xi8> to vector<512x1024xf32>
    %87 = arith.truncf %86 : vector<512x1024xf32> to vector<512x1024xbf16>
    %cst_36 = arith.constant dense<0.000000e+00> : vector<16x1024xf32>
    %88 = tpu.matmul %84, %87, %cst_36 {dimension_numbers = #tpu.dot_dimension_numbers<[1], [0], [0], [1], [0, 0, 1, 1], [], []>} : vector<16x512xbf16>, vector<512x1024xbf16>, vector<16x1024xf32> -> vector<16x1024xf32>
    %c0_37 = arith.constant 0 : index
    %c1664 = arith.constant 1664 : index
    %89 = vector.load %arg6[%c0_37, %c1664] : memref<1x5760xf32, #tpu.memory_space<vmem>>, vector<1x1024xf32>
    %c0_38 = arith.constant 0 : index
    %c2688 = arith.constant 2688 : index
    %90 = vector.load %arg6[%c0_38, %c2688] : memref<1x5760xf32, #tpu.memory_space<vmem>>, vector<1x1024xf32>
    %c0_39 = arith.constant 0 : index
    %c4224 = arith.constant 4224 : index
    %91 = vector.load %arg6[%c0_39, %c4224] : memref<1x5760xf32, #tpu.memory_space<vmem>>, vector<1x1024xf32>
    %cst_40 = arith.constant dense<0.000000e+00> : vector<1024xf32>
    %92 = vector.multi_reduction <add>, %88, %cst_40 [0] : vector<16x1024xf32> to vector<1024xf32>
    %93 = vector.shape_cast %92 : vector<1024xf32> to vector<1x1024xf32>
    %cst_41 = arith.constant 1.600000e+01 : f32
    %94 = vector.broadcast %cst_41 : f32 to vector<1x1024xf32>
    %95 = arith.divf %93, %94 : vector<1x1024xf32>
    %96 = arith.mulf %88, %88 : vector<16x1024xf32>
    %cst_42 = arith.constant dense<0.000000e+00> : vector<1024xf32>
    %97 = vector.multi_reduction <add>, %96, %cst_42 [0] : vector<16x1024xf32> to vector<1024xf32>
    %98 = vector.shape_cast %97 : vector<1024xf32> to vector<1x1024xf32>
    %cst_43 = arith.constant 1.600000e+01 : f32
    %99 = vector.broadcast %cst_43 : f32 to vector<1x1024xf32>
    %100 = arith.divf %98, %99 : vector<1x1024xf32>
    %101 = arith.mulf %95, %95 : vector<1x1024xf32>
    %102 = arith.subf %100, %101 : vector<1x1024xf32>
    %cst_44 = arith.constant 0.000000e+00 : f32
    %103 = vector.broadcast %cst_44 : f32 to vector<1x1024xf32>
    %104 = arith.maximumf %102, %103 : vector<1x1024xf32>
    %105 = arith.mulf %89, %91 : vector<1x1024xf32>
    %106 = arith.mulf %91, %91 : vector<1x1024xf32>
    %107 = arith.mulf %106, %104 : vector<1x1024xf32>
    %cst_45 = arith.constant 8.000000e-01 : f32
    %108 = vector.broadcast %cst_45 : f32 to vector<1x1024xf32>
    %109 = arith.addf %107, %108 : vector<1x1024xf32>
    %110 = math.rsqrt %109 : vector<1x1024xf32>
    %111 = arith.mulf %105, %110 : vector<1x1024xf32>
    %112 = vector.broadcast %111 : vector<1x1024xf32> to vector<16x1024xf32>
    %113 = arith.mulf %88, %112 : vector<16x1024xf32>
    %114 = arith.mulf %95, %111 : vector<1x1024xf32>
    %115 = arith.subf %90, %114 : vector<1x1024xf32>
    %116 = vector.broadcast %115 : vector<1x1024xf32> to vector<16x1024xf32>
    %117 = arith.addf %113, %116 : vector<16x1024xf32>
    %cst_46 = arith.constant 0.000000e+00 : f32
    %118 = vector.broadcast %cst_46 : f32 to vector<16x1024xf32>
    %119 = arith.cmpf ogt, %117, %118 : vector<16x1024xf32>
    %cst_47 = arith.constant 2.000000e-01 : f32
    %120 = vector.broadcast %cst_47 : f32 to vector<16x1024xf32>
    %121 = arith.mulf %120, %117 : vector<16x1024xf32>
    %122 = arith.select %119, %117, %121 : vector<16x1024xi1>, vector<16x1024xf32>
    %123 = arith.truncf %122 : vector<16x1024xf32> to vector<16x1024xbf16>
    %c0_48 = arith.constant 0 : index
    %c0_49 = arith.constant 0 : index
    %124 = vector.load %arg5[%c0_48, %c0_49] : memref<1024x256xi8, #tpu.memory_space<vmem>>, vector<1024x256xi8>
    %125 = arith.sitofp %124 : vector<1024x256xi8> to vector<1024x256xf32>
    %126 = arith.truncf %125 : vector<1024x256xf32> to vector<1024x256xbf16>
    %cst_50 = arith.constant dense<0.000000e+00> : vector<16x256xf32>
    %127 = tpu.matmul %123, %126, %cst_50 {dimension_numbers = #tpu.dot_dimension_numbers<[1], [0], [0], [1], [0, 0, 1, 1], [], []>} : vector<16x1024xbf16>, vector<1024x256xbf16>, vector<16x256xf32> -> vector<16x256xf32>
    %c0_51 = arith.constant 0 : index
    %c5248 = arith.constant 5248 : index
    %128 = vector.load %arg6[%c0_51, %c5248] : memref<1x5760xf32, #tpu.memory_space<vmem>>, vector<1x256xf32>
    %129 = vector.broadcast %128 : vector<1x256xf32> to vector<16x256xf32>
    %130 = arith.mulf %127, %129 : vector<16x256xf32>
    %c0_52 = arith.constant 0 : index
    %c5504 = arith.constant 5504 : index
    %131 = vector.load %arg6[%c0_52, %c5504] : memref<1x5760xf32, #tpu.memory_space<vmem>>, vector<1x256xf32>
    %132 = vector.broadcast %131 : vector<1x256xf32> to vector<16x256xf32>
    %133 = arith.addf %130, %132 : vector<16x256xf32>
    %134 = math.tanh %133 : vector<16x256xf32>
    %c0_53 = arith.constant 0 : index
    %c0_54 = arith.constant 0 : index
    %135 = vector.load %arg7[%c0_53, %c0_54] : memref<16x256xf32, #tpu.memory_space<vmem>>, vector<16x256xf32>
    tpu.vector_store %arg7[%c0_53, %c0_54], %134 {strides = array<i32>} : memref<16x256xf32, #tpu.memory_space<vmem>>, vector<16x256xf32>,
    return
  }
}

</mosaic_0001>

<bundles_post_ra>
// kernel: generator_forward.1
= control target key start
LH: loop header
LB: loop body
LE: loop exit
PB: predicated region body
PF: predicated region fallthrough
CT: control target
= control target key end

     0   :  { %12 = vsyncpa [#allocation3], 0  ;;  %s3239_s0 = inlined_call_operand.hbm [shape: f32[16,32], index: 0, kind: input, shape index: {}]   ;;  %s3240_s1 = inlined_call_operand.hbm [shape: bf16[32,128], index: 1, kind: input, shape index: {}]   ;;  %s3241_s2 = inlined_call_operand.hbm [shape: bf16[128,256], index: 2, kind: input, shape index: {}]   ;;  %s3242_s3 = inlined_call_operand.hbm [shape: s8[256,512], index: 3, kind: input, shape index: {}]   ;;  %s3243_s4 = inlined_call_operand.hbm [shape: s8[512,1024], index: 4, kind: input, shape index: {}]   ;;  %s3244_s5 = inlined_call_operand.hbm [shape: s8[1024,256], index: 5, kind: input, shape index: {}]   ;;  %s3245_s6 = inlined_call_operand.hbm [shape: f32[1,5760], index: 6, kind: input, shape index: {}]   ;;  %s3246_s7 = inlined_call_operand.vmem [shape: f32[16,256], index: 7, kind: output, shape index: {}]  }
   0x1   :  { %13 = vsyncpa [#allocation5], 0 }
   0x2   :  { %14 = vsyncpa [#allocation8], 0 }
   0x3   :  { %15 = vsyncpa [#allocation11], 0  ;;  %s2747_s24 = smov [#allocation4]  }
   0x4   :  { %s33_s25 = sshll.u32 %s2747_s24, 4  ;;  %s34_s25 = int_to_ptr.vmem [resolvable:$true] %s33_s25 }
   0x5   :  { %s2607_s26 = scalar_lea.vmem %s34_s25, 256  ;;  %p2612_p1 = scmp.lt.s32.totalorder %s34_s25, %s34_s25 }
   0x6   :  { %p2608_p0 = scmp.ne.s32.totalorder %s34_s25, %s2607_s26  ;;  %p2613_p2 = scmp.lt.s32.totalorder %s2607_s26, %s2607_s26 }
   0x8   :  { %p2614_p3 = por %p2613_p2, %p2612_p1 }
   0xa   :  { %p2615_p4 = pnand %p2614_p3, %p2608_p0 }
   0xc   :  { %2618 = shalt.err (!%p2615_p4)
}
   0xd   :  { %s2748_s27 = smov 64   ;;  %s2749_s28 = smov 4  }
   0xe   :  { %39 = dma.hbm_to_vmem [thread:$0]  %s3240_s1, 256, %s34_s25, [#allocation5], %s2748_s27, %s2748_s27, %s2749_s28  }
   0xf   :  { %s2750_s8 = smov [#allocation7]  }
  0x10   :  { %s57_s9 = sshll.u32 %s2750_s8, 4  ;;  %s58_s9 = int_to_ptr.vmem [resolvable:$true] %s57_s9 }
  0x11   :  { %s2627_s10 = scalar_lea.vmem %s58_s9, 4096  ;;  %p2632_p6 = scmp.lt.s32.totalorder %s58_s9, %s58_s9 }
  0x12   :  { %p2628_p5 = scmp.ne.s32.totalorder %s58_s9, %s2627_s10  ;;  %p2633_p7 = scmp.lt.s32.totalorder %s2627_s10, %s2627_s10 }
  0x14   :  { %p2634_p8 = por %p2633_p7, %p2632_p6 }
  0x16   :  { %p2635_p9 = pnand %p2634_p8, %p2628_p5 }
  0x18   :  { %2638 = shalt.err (!%p2635_p9)
}
  0x19   :  { %s2751_s11 = smov 512   ;;  %s2752_s12 = smov 32  }
  0x1a   :  { %63 = dma.hbm_to_vmem [thread:$0]  %s3242_s3, 4096, %s58_s9, [#allocation8], %s2751_s11, %s2751_s11, %s2752_s12  }
  0x1b   :  { %s2753_s15 = smov [#allocation10]  }
  0x1c   :  { %s81_s16 = sshll.u32 %s2753_s15, 4  ;;  %s82_s16 = int_to_ptr.vmem [resolvable:$true] %s81_s16 }
  0x1d   :  { %s2647_s1 = scalar_lea.vmem %s82_s16, 8192  ;;  %p2652_p11 = scmp.lt.s32.totalorder %s82_s16, %s82_s16 }
  0x1e   :  { %p2648_p10 = scmp.ne.s32.totalorder %s82_s16, %s2647_s1  ;;  %p2653_p12 = scmp.lt.s32.totalorder %s2647_s1, %s2647_s1 }
  0x20   :  { %p2654_p13 = por %p2653_p12, %p2652_p11 }
  0x22   :  { %p2655_p0 = pnand %p2654_p13, %p2648_p10 }
  0x24   :  { %2658 = shalt.err (!%p2655_p0)
}
  0x25   :  { %s2754_s17 = smov 256   ;;  %s2755_s18 = smov 16  }
  0x26   :  { %87 = dma.hbm_to_vmem [thread:$0]  %s3244_s5, 8192, %s82_s16, [#allocation11], %s2754_s17, %s2754_s17, %s2755_s18  }
  0x27   :  { %s2756_s21 = smov [#allocation2]  }
  0x28   :  { %s21_s22 = sshll.u32 %s2756_s21, 4  ;;  %s22_s22 = int_to_ptr.vmem [resolvable:$true] %s21_s22 }
  0x29   :  { %s2667_s3 = scalar_lea.vmem %s22_s22, 256  ;;  %p2672_p2 = scmp.lt.s32.totalorder %s22_s22, %s22_s22 }
  0x2a   :  { %p2668_p1 = scmp.ne.s32.totalorder %s22_s22, %s2667_s3  ;;  %p2673_p3 = scmp.lt.s32.totalorder %s2667_s3, %s2667_s3 }
  0x2c   :  { %p2674_p4 = por %p2673_p3, %p2672_p2 }
  0x2e   :  { %p2675_p5 = pnand %p2674_p4, %p2668_p1 }
  0x30   :  { %2678 = shalt.err (!%p2675_p5)
}
  0x31   :  { %s2757_s23 = smov 128   ;;  %s2758_s24 = smov 8  }
  0x32   :  { %27 = dma.hbm_to_vmem [thread:$0]  %s3239_s0, 256, %s22_s22, [#allocation3], %s2757_s23, %s2757_s23, %s2758_s24  }
  0x33   :  { %s2759_s28 = smov [#allocation6]   ;;  %s2760_s30 = smov [#allocation9]  }
  0x34   :  { %s45_s29 = sshll.u32 %s2759_s28, 4  ;;  %s69_s5 = sshll.u32 %s2760_s30, 4  ;;  %s46_s29 = int_to_ptr.vmem [resolvable:$true] %s45_s29  ;;  %s70_s5 = int_to_ptr.vmem [resolvable:$true] %s69_s5 }
  0x35   :  { %s2687_s8 = scalar_lea.vmem %s46_s29, 2048  ;;  %p2692_p7 = scmp.lt.s32.totalorder %s46_s29, %s46_s29 }
  0x36   :  { %p2688_p6 = scmp.ne.s32.totalorder %s46_s29, %s2687_s8  ;;  %p2693_p8 = scmp.lt.s32.totalorder %s2687_s8, %s2687_s8 }
  0x38   :  { %p2694_p9 = por %p2693_p8, %p2692_p7 }
  0x3a   :  { %p2695_p10 = pnand %p2694_p9, %p2688_p6 }
  0x3c   :  { %2698 = shalt.err (!%p2695_p10)
}
  0x3d   :  { %51 = dma.hbm_to_vmem [thread:$0]  %s3241_s2, 2048, %s46_s29, [#allocation5], %s2757_s23, %s2757_s23, %s2758_s24  }
  0x3e   :  { %s2707_s11 = scalar_lea.vmem %s70_s5, 16384  ;;  %p2712_p12 = scmp.lt.s32.totalorder %s70_s5, %s70_s5 }
  0x3f   :  { %p2708_p11 = scmp.ne.s32.totalorder %s70_s5, %s2707_s11  ;;  %p2713_p13 = scmp.lt.s32.totalorder %s2707_s11, %s2707_s11 }
  0x41   :  { %p2714_p0 = por %p2713_p13, %p2712_p12 }
  0x43   :  { %p2715_p1 = pnand %p2714_p0, %p2708_p11 }
  0x45   :  { %2718 = shalt.err (!%p2715_p1)
}
  0x46   :  { %s2761_s0 = smov 1024   ;;  %s2762_s14 = smov [#allocation12]  }
  0x47   :  { %75 = dma.hbm_to_vmem [thread:$0]  %s3243_s4, 16384, %s70_s5, [#allocation8], %s2761_s0, %s2761_s0, %s2748_s27  }
  0x48   :  { %s94_s15 = sshll.u32 %s2762_s14, 4  ;;  %s95_s15 = int_to_ptr.vmem [resolvable:$true] %s94_s15 }
  0x49   :  { %s2727_s16 = scalar_lea.vmem %s95_s15, 720  ;;  %s2731_s1 = scalar_lea.vmem %s95_s15, 736 }
  0x4a   :  { %p2728_p2 = scmp.ne.s32.totalorder %s95_s15, %s2727_s16  ;;  %p2732_p3 = scmp.lt.s32.totalorder %s95_s15, %s95_s15 }
  0x4b   :  { %p2733_p4 = scmp.lt.s32.totalorder %s2731_s1, %s2727_s16 }
  0x4d   :  { %p2734_p5 = por %p2733_p4, %p2732_p3 }
  0x4f   :  { %p2735_p6 = pnand %p2734_p5, %p2728_p2 }
  0x51   :  { %2738 = shalt.err (!%p2735_p6)
}
  0x52   :  { %97 = dma.hbm_to_vmem [thread:$0]  %s3245_s6, 720, %s95_s15, [#allocation11]  }
  0x53   :  { %2739 = dma.done.wait [#allocation3], 256  }
  0x54   :  { %2740 = vsyncadd [#allocation3], 4294967040 }
  0x55   :  { %2741 = dma.done.wait [#allocation5], 2304  }
  0x56   :  { %2742 = vsyncadd [#allocation5], 4294964992 }
  0x57   :  { %2743 = dma.done.wait [#allocation8], 20480  }
  0x58   :  { %2744 = vsyncadd [#allocation8], 4294946816 }
  0x59   :  { %2745 = dma.done.wait [#allocation11], 8912  }
  0x5a   :  { %2746 = vsyncadd [#allocation11], 4294958384  ;;  %v2763_v0 = vmov 0.0   ;;  %vm2764_vm0 = vmmov 0   ;;  %v2557_v1 = vld [vmem:[#allocation4 + $0x8] sm:$0xff]   ;;  %v2558_v2 = vld [vmem:[#allocation4] sm:$0xff]  }
  0x5b   :  { %2529 = vmatprep.subr.bf16.mxu0 %v2763_v0  ;;  %2533 = vmatprep.mubr.msk.bf16.mxu0 %vm2764_vm0, %v2763_v0  ;;  %v120_v3 = vld [vmem:[#allocation2] sm:$0xff]  ;;  %v121_v4 = vld [vmem:[#allocation2 + $0x8] sm:$0xff]  ;;  %v2559_v5 = vld [vmem:[#allocation6 + $0x74] ss:$8 sps:$4 sm:$0xff]   ;;  %vm146_vm1 = vcmask 261120   ;;  %v2765_v22 = vmov 0  }
  0x5c   :  { %2530 = vmatpush3.bf16.msra.mxu0 %v2557_v1  ;;  %v2561_v6 = vld [vmem:[#allocation6 + $0x70] ss:$8 sps:$4 sm:$0xff]   ;;  %v2562_v7 = vld [vmem:[#allocation6 + $0x64] ss:$8 sps:$4 sm:$0xff]   ;;  %v122_v8 = vpack.c.bf16 %v121_v4, %v120_v3  ;;  %294 = vmatprep.subr.bf16.mxu1 %v2559_v5  ;;  %v2564_v9 = vld [vmem:[#allocation6 + $0x60] ss:$8 sps:$4 sm:$0xff]  }
  0x5d   :  { %2531 = vmatprep.subr.bf16.mxu0 %v2763_v0  ;;  %295 = vmatpush1.bf16.msra.mxu1 %v2561_v6  ;;  %v2565_v10 = vld [vmem:[#allocation6 + $0x54] ss:$8 sps:$4 sm:$0xff]   ;;  %v2567_v11 = vld [vmem:[#allocation6 + $0x50] ss:$8 sps:$4 sm:$0xff]   ;;  %v2568_v12 = vld [vmem:[#allocation6 + $0x44] ss:$8 sps:$4 sm:$0xff]  }
  0x5e   :  { %296 = vmatprep.subr.bf16.mxu1 %v2562_v7  ;;  %v2570_v13 = vld [vmem:[#allocation6 + $0x40] ss:$8 sps:$4 sm:$0xff]   ;;  %v2571_v14 = vld [vmem:[#allocation6 + $0x34] ss:$8 sps:$4 sm:$0xff]   ;;  %v2573_v15 = vld [vmem:[#allocation6 + $0x30] ss:$8 sps:$4 sm:$0xff]   ;;  %326 = vmatprep.mubr.bf16.mxu1 %v2765_v22 }
  0x5f   :  { %v2574_v16 = vld [vmem:[#allocation6 + $0x24] ss:$8 sps:$4 sm:$0xff]   ;;  %v2576_v17 = vld [vmem:[#allocation6 + $0x20] ss:$8 sps:$4 sm:$0xff]   ;;  %v2577_v18 = vld [vmem:[#allocation6 + $0x14] ss:$8 sps:$4 sm:$0xff]  }
  0x60   :  { %2532 = vmatpush3.bf16.msra.mxu0 %v2558_v2  ;;  %v2579_v19 = vld [vmem:[#allocation6 + $0x10] ss:$8 sps:$4 sm:$0xff]   ;;  %v2580_v20 = vld [vmem:[#allocation6 + $0x4] ss:$8 sps:$4 sm:$0xff]   ;;  %v2582_v21 = vld [vmem:[#allocation6] ss:$8 sps:$4 sm:$0xff]  }
  0x61   :  { %297 = vmatpush1.bf16.msra.mxu1 %v2564_v9  ;;  %v2506_v23 = vld [vmem:[#allocation12] ss:$0 sm:$0xff]  ;;  %v483_v35 = vld [vmem:[#allocation7 + $0x68] sm:$0xff]  ;;  %v485_v36 = vld [vmem:[#allocation7 + $0x78] sm:$0xff] }
  0x62   :  { %298 = vmatprep.subr.bf16.mxu1 %v2565_v10  ;;  %v531_v37 = vunpack.c.h.s8.bf16 %v483_v35  ;;  %v533_v38 = vunpack.c.h.s8.bf16 %v485_v36  ;;  %v482_v39 = vld [vmem:[#allocation7 + $0x60] sm:$0xff]  ;;  %v484_v40 = vld [vmem:[#allocation7 + $0x70] sm:$0xff]  ;;  %v527_v43 = vunpack.c.l.s8.bf16 %v483_v35  ;;  %v529_v44 = vunpack.c.l.s8.bf16 %v485_v36  ;;  %v479_v47 = vld [vmem:[#allocation7 + $0x48] sm:$0xff] }
  0x63   :  { %2534 = vmatmul.mubr.msk.bf16.vlgmr.msra.gmra.mxu0 %vm146_vm1, %v122_v8  ;;  %v530_v41 = vunpack.c.h.s8.bf16 %v482_v39  ;;  %v532_v42 = vunpack.c.h.s8.bf16 %v484_v40  ;;  %v526_v45 = vunpack.c.l.s8.bf16 %v482_v39  ;;  %v528_v46 = vunpack.c.l.s8.bf16 %v484_v40  ;;  %v481_v48 = vld [vmem:[#allocation7 + $0x58] sm:$0xff]  ;;  %v478_v51 = vld [vmem:[#allocation7 + $0x40] sm:$0xff]  ;;  %v480_v52 = vld [vmem:[#allocation7 + $0x50] sm:$0xff] }
  0x64   :  { %566 = vmatprep.subr.bf16.mxu0 %v531_v37  ;;  %v523_v49 = vunpack.c.h.s8.bf16 %v479_v47  ;;  %v525_v50 = vunpack.c.h.s8.bf16 %v481_v48  ;;  %v522_v53 = vunpack.c.h.s8.bf16 %v478_v51  ;;  %v524_v54 = vunpack.c.h.s8.bf16 %v480_v52  ;;  %v475_v59 = vld [vmem:[#allocation7 + $0x28] sm:$0xff]  ;;  %v477_v60 = vld [vmem:[#allocation7 + $0x38] sm:$0xff]  ;;  %v474_v63 = vld [vmem:[#allocation7 + $0x20] sm:$0xff] }
  0x65   :  { %299 = vmatpush1.bf16.msra.mxu1 %v2567_v11  ;;  %567 = vmatpush1.bf16.msra.mxu0 %v530_v41  ;;  %v519_v55 = vunpack.c.l.s8.bf16 %v479_v47  ;;  %v521_v56 = vunpack.c.l.s8.bf16 %v481_v48  ;;  %v518_v57 = vunpack.c.l.s8.bf16 %v478_v51  ;;  %v520_v58 = vunpack.c.l.s8.bf16 %v480_v52  ;;  %v476_v0 = vld [vmem:[#allocation7 + $0x30] sm:$0xff]  ;;  %v471_v7 = vld [vmem:[#allocation7 + $0x8] sm:$0xff]  ;;  %v473_v8 = vld [vmem:[#allocation7 + $0x18] sm:$0xff] }
  0x66   :  { %300 = vmatprep.subr.bf16.mxu1 %v2568_v12  ;;  %568 = vmatprep.subr.bf16.mxu0 %v527_v43  ;;  %v515_v61 = vunpack.c.h.s8.bf16 %v475_v59  ;;  %v517_v62 = vunpack.c.h.s8.bf16 %v477_v60  ;;  %v514_v1 = vunpack.c.h.s8.bf16 %v474_v63  ;;  %v516_v2 = vunpack.c.h.s8.bf16 %v476_v0  ;;  %v470_v11 = vld [vmem:[#allocation7] sm:$0xff]  ;;  %v472_v12 = vld [vmem:[#allocation7 + $0x10] sm:$0xff]  ;;  %v491_v43 = vld [vmem:[#allocation7 + $0xa8] sm:$0xff] }
  0x67   :  { %v511_v3 = vunpack.c.l.s8.bf16 %v475_v59  ;;  %v513_v4 = vunpack.c.l.s8.bf16 %v477_v60  ;;  %v510_v5 = vunpack.c.l.s8.bf16 %v474_v63  ;;  %v512_v6 = vunpack.c.l.s8.bf16 %v476_v0  ;;  %v494_v35 = vld [vmem:[#allocation7 + $0xc0] sm:$0xff]  ;;  %v496_v36 = vld [vmem:[#allocation7 + $0xd0] sm:$0xff] }
  0x68   :  { %v507_v9 = vunpack.c.h.s8.bf16 %v471_v7  ;;  %v509_v10 = vunpack.c.h.s8.bf16 %v473_v8  ;;  %v554_v37 = vunpack.c.h.s8.bf16 %v494_v35  ;;  %v550_v41 = vunpack.c.l.s8.bf16 %v494_v35  ;;  %v490_v47 = vld [vmem:[#allocation7 + $0xa0] sm:$0xff]  ;;  %v492_v48 = vld [vmem:[#allocation7 + $0xb0] sm:$0xff] }
  0x69   :  { %301 = vmatpush1.bf16.msra.mxu1 %v2570_v13  ;;  %569 = vmatpush1.bf16.msra.mxu0 %v526_v45  ;;  %v506_v13 = vunpack.c.h.s8.bf16 %v470_v11  ;;  %v547_v45 = vunpack.c.h.s8.bf16 %v491_v43  ;;  %v543_v51 = vunpack.c.l.s8.bf16 %v491_v43  ;;  %v486_v59 = vld [vmem:[#allocation7 + $0x80] sm:$0xff]  ;;  %v488_v60 = vld [vmem:[#allocation7 + $0x90] sm:$0xff] }
  0x6a   :  { %302 = vmatprep.subr.bf16.mxu1 %v2571_v14  ;;  %570 = vmatprep.subr.bf16.mxu0 %v523_v49  ;;  %v508_v14 = vunpack.c.h.s8.bf16 %v472_v12  ;;  %v546_v49 = vunpack.c.h.s8.bf16 %v490_v47 }
  0x6d   :  { %303 = vmatpush1.bf16.msra.mxu1 %v2573_v15  ;;  %571 = vmatpush1.bf16.msra.mxu0 %v522_v53  ;;  %v503_v15 = vunpack.c.l.s8.bf16 %v471_v7  ;;  %v542_v53 = vunpack.c.l.s8.bf16 %v490_v47 }
  0x6e   :  { %304 = vmatprep.subr.bf16.mxu1 %v2574_v16  ;;  %572 = vmatprep.subr.bf16.mxu0 %v519_v55  ;;  %v505_v16 = vunpack.c.l.s8.bf16 %v473_v8  ;;  %v487_v55 = vld [vmem:[#allocation7 + $0x88] sm:$0xff] }
  0x6f   :  { %v535_v63 = vunpack.c.l.s8.bf16 %v487_v55 }
  0x71   :  { %305 = vmatpush1.bf16.msra.mxu1 %v2576_v17  ;;  %573 = vmatpush1.bf16.msra.mxu0 %v518_v57  ;;  %v502_v17 = vunpack.c.l.s8.bf16 %v470_v11  ;;  %v539_v57 = vunpack.c.h.s8.bf16 %v487_v55 }
  0x72   :  { %306 = vmatprep.subr.bf16.mxu1 %v2577_v18  ;;  %574 = vmatprep.subr.bf16.mxu0 %v515_v61  ;;  %v504_v18 = vunpack.c.l.s8.bf16 %v472_v12  ;;  %v538_v61 = vunpack.c.h.s8.bf16 %v486_v59 }
  0x75   :  { %307 = vmatpush1.bf16.msra.mxu1 %v2579_v19  ;;  %575 = vmatpush1.bf16.msra.mxu0 %v514_v1  ;;  %v499_v19 = vld [vmem:[#allocation7 + $0xe8] sm:$0xff]  ;;  %v534_v1 = vunpack.c.l.s8.bf16 %v486_v59 }
  0x76   :  { %308 = vmatprep.subr.bf16.mxu1 %v2580_v20  ;;  %576 = vmatprep.subr.bf16.mxu0 %v511_v3  ;;  %v501_v20 = vld [vmem:[#allocation7 + $0xf8] sm:$0xff] }
  0x77   :  { %v565_v22 = vunpack.c.h.s8.bf16 %v501_v20 }
  0x79   :  { %309 = vmatpush1.bf16.msra.mxu1 %v2582_v21  ;;  %577 = vmatpush1.bf16.msra.mxu0 %v510_v5  ;;  %v563_v21 = vunpack.c.h.s8.bf16 %v499_v19 }
  0x7a   :  { %609 = vmatprep.subr.bf16.mxu1 %v533_v38  ;;  %578 = vmatprep.subr.bf16.mxu0 %v507_v9  ;;  %v556_v38 = vunpack.c.h.s8.bf16 %v496_v36 }
  0x7d   :  { %579 = vmatpush1.bf16.msra.mxu0 %v506_v13 }
  0x7e   :  { %580 = vmatprep.subr.bf16.mxu0 %v503_v15 }
  0x81   :  { %581 = vmatpush1.bf16.msra.mxu0 %v502_v17 }
  0x82   :  { %582 = vmatprep.subr.bf16.mxu0 %v563_v21 }
 0x123   :  { %v184_v24 = vpop.f32.mrf.mxu0 }
 0x124   :  { %v185_v25 = vadd.f32 %v2506_v23, %v184_v24  ;;  %v500_v24 = vld [vmem:[#allocation7 + $0xf0] sm:$0xff] }
 0x125   :  { %v2535_v26 = vpop.f32.mrf.mxu0 }
 0x126   :  { %v193_v28 = vmul.f32 0.2, %v185_v25  ;;  %vm191_vm2 = vcmp.gt.f32.partialorder %v185_v25, 0.0  ;;  %v564_v26 = vunpack.c.h.s8.bf16 %v500_v24 }
 0x127   :  { %v187_v27 = vpop.f32.mrf.mxu0 }
 0x128   :  { %v188_v29 = vadd.f32 %v2506_v23, %v187_v27  ;;  %v195_v32 = vsel %vm191_vm2, %v185_v25, %v193_v28  ;;  %v498_v23 = vld [vmem:[#allocation7 + $0xe0] sm:$0xff]  ;;  %v559_v27 = vunpack.c.l.s8.bf16 %v499_v19  ;;  %v561_v28 = vunpack.c.l.s8.bf16 %v501_v20 }
 0x129   :  { %v2536_v30 = vpop.f32.mrf.mxu0  ;;  %v562_v25 = vunpack.c.h.s8.bf16 %v498_v23 }
 0x12a   :  { %vm192_vm3 = vcmp.gt.f32.partialorder %v188_v29, 0.0  ;;  %v194_v31 = vmul.f32 0.2, %v188_v29  ;;  %v560_v30 = vunpack.c.l.s8.bf16 %v500_v24 }
 0x12b   :  { %583 = vmatpush2.bf16.msra.mxu0 %v562_v25 }
 0x12c   :  { %v196_v33 = vsel %vm192_vm3, %v188_v29, %v194_v31  ;;  %v558_v29 = vunpack.c.l.s8.bf16 %v498_v23  ;;  %584 = vmatprep.subr.bf16.mxu0 %v559_v27  ;;  %v495_v31 = vld [vmem:[#allocation7 + $0xc8] sm:$0xff] }
 0x12d   :  { %v197_v34 = vpack.c.bf16 %v196_v33, %v195_v32  ;;  %v497_v32 = vld [vmem:[#allocation7 + $0xd8] sm:$0xff]  ;;  %v555_v33 = vunpack.c.h.s8.bf16 %v495_v31  ;;  %v551_v39 = vunpack.c.l.s8.bf16 %v495_v31 }
 0x12e   :  { %v553_v40 = vunpack.c.l.s8.bf16 %v497_v32 }
 0x12f   :  { %327 = vmatmul.mubr.bf16.vlgmr.msra.gmra.mxu1 %v197_v34  ;;  %585 = vmatpush2.bf16.msra.mxu0 %v558_v29  ;;  %v557_v34 = vunpack.c.h.s8.bf16 %v497_v32 }
 0x130   :  { %610 = vmatpush1.bf16.msra.mxu1 %v532_v42  ;;  %586 = vmatprep.subr.bf16.mxu0 %v555_v33  ;;  %v552_v42 = vunpack.c.l.s8.bf16 %v496_v36 }
 0x131   :  { %611 = vmatprep.subr.bf16.mxu1 %v529_v44  ;;  %v493_v44 = vld [vmem:[#allocation7 + $0xb8] sm:$0xff] }
 0x132   :  { %v545_v52 = vunpack.c.l.s8.bf16 %v493_v44 }
 0x133   :  { %587 = vmatpush2.bf16.msra.mxu0 %v554_v37 }
 0x134   :  { %612 = vmatpush1.bf16.msra.mxu1 %v528_v46  ;;  %588 = vmatprep.subr.bf16.mxu0 %v551_v39  ;;  %v549_v46 = vunpack.c.h.s8.bf16 %v493_v44 }
 0x135   :  { %613 = vmatprep.subr.bf16.mxu1 %v525_v50  ;;  %v548_v50 = vunpack.c.h.s8.bf16 %v492_v48 }
 0x137   :  { %589 = vmatpush2.bf16.msra.mxu0 %v550_v41 }
 0x138   :  { %614 = vmatpush1.bf16.msra.mxu1 %v524_v54  ;;  %590 = vmatprep.subr.bf16.mxu0 %v547_v45  ;;  %v544_v54 = vunpack.c.l.s8.bf16 %v492_v48 }
 0x139   :  { %615 = vmatprep.subr.bf16.mxu1 %v521_v56  ;;  %v489_v56 = vld [vmem:[#allocation7 + $0x98] sm:$0xff] }
 0x13a   :  { %v537_v0 = vunpack.c.l.s8.bf16 %v489_v56 }
 0x13b   :  { %591 = vmatpush2.bf16.msra.mxu0 %v546_v49 }
 0x13c   :  { %616 = vmatpush1.bf16.msra.mxu1 %v520_v58  ;;  %592 = vmatprep.subr.bf16.mxu0 %v543_v51  ;;  %v541_v58 = vunpack.c.h.s8.bf16 %v489_v56  ;;  %v2766_v51 = vmov 1966171168  }
 0x13d   :  { %617 = vmatprep.subr.bf16.mxu1 %v517_v62  ;;  %v540_v62 = vunpack.c.h.s8.bf16 %v488_v60 }
 0x13f   :  { %593 = vmatpush2.bf16.msra.mxu0 %v542_v53  ;;  %v392_v53 = vlaneseq }
 0x140   :  { %618 = vmatpush1.bf16.msra.mxu1 %v516_v2  ;;  %594 = vmatprep.subr.bf16.mxu0 %v539_v57  ;;  %v536_v2 = vunpack.c.l.s8.bf16 %v488_v60 }
 0x141   :  { %619 = vmatprep.subr.bf16.mxu1 %v513_v4  ;;  %v2851_v55 = vshrl.u32 %v392_v53, 7 }
 0x143   :  { %595 = vmatpush2.bf16.msra.mxu0 %v538_v61  ;;  %v337_v61 = vld [vmem:[#allocation12 + $0x1] sm:$0x3] }
 0x144   :  { %620 = vmatpush1.bf16.msra.mxu1 %v512_v6  ;;  %596 = vmatprep.subr.bf16.mxu0 %v535_v63  ;;  %v2859_v63 = vsub.s32 0, %v2851_v55 }
 0x145   :  { %621 = vmatprep.subr.bf16.mxu1 %v509_v10 }
 0x147   :  { %597 = vmatpush2.bf16.msra.mxu0 %v534_v1 }
 0x148   :  { %622 = vmatpush1.bf16.msra.mxu1 %v508_v14 }
 0x149   :  { %623 = vmatprep.subr.bf16.mxu1 %v505_v16 }
 0x14c   :  { %624 = vmatpush1.bf16.msra.mxu1 %v504_v18 }
 0x14d   :  { %625 = vmatprep.subr.bf16.mxu1 %v565_v22 }
 0x150   :  { %626 = vmatpush2.bf16.msra.mxu1 %v564_v26 }
 0x151   :  { %627 = vmatprep.subr.bf16.mxu1 %v561_v28 }
 0x154   :  { %628 = vmatpush2.bf16.msra.mxu1 %v560_v30 }
 0x155   :  { %629 = vmatprep.subr.bf16.mxu1 %v557_v34 }
 0x158   :  { %630 = vmatpush2.bf16.msra.mxu1 %v556_v38 }
 0x159   :  { %631 = vmatprep.subr.bf16.mxu1 %v553_v40 }
 0x15c   :  { %632 = vmatpush2.bf16.msra.mxu1 %v552_v42 }
 0x15d   :  { %633 = vmatprep.subr.bf16.mxu1 %v549_v46 }
 0x160   :  { %634 = vmatpush2.bf16.msra.mxu1 %v548_v50 }
 0x161   :  { %635 = vmatprep.subr.bf16.mxu1 %v545_v52  ;;  %v390_v52 = vunpack.c.l.s4 %v2766_v51 }
 0x164   :  { %636 = vmatpush2.bf16.msra.mxu1 %v544_v54  ;;  %v391_v54 = vunpack.c.0.s8 %v390_v52 }
 0x165   :  { %637 = vmatprep.subr.bf16.mxu1 %v541_v58 }
 0x166   :  { %v2854_v57 = vsub.s32 %v391_v54, %v2851_v55 }
 0x168   :  { %638 = vmatpush2.bf16.msra.mxu1 %v540_v62 }
 0x169   :  { %639 = vmatprep.subr.bf16.mxu1 %v537_v0  ;;  %v2862_v0 = vsub.s32 1, %v2851_v55 }
 0x16c   :  { %640 = vmatpush2.bf16.msra.mxu1 %v536_v2 }
 0x1ef   :  { %v2831_v3 = vpop.f32.mrf.mxu1 }
 0x1f0   :  { %v356_v6 = vmul.f32 %v2831_v3, %v2831_v3 }
 0x1f1   :  { %v2833_v4 = vpop.f32.mrf.mxu1 }
 0x1f2   :  { %v357_v9 = vmul.f32 %v2833_v4, %v2833_v4 }
 0x1f3   :  { %v2835_v5 = vpop.f32.mrf.mxu1 }
 0x1f4   :  { %v339_v7 = vadd.f32 %v2835_v5, %v2831_v3  ;;  %v358_v8 = vmul.f32 %v2835_v5, %v2835_v5 }
 0x1f5   :  { %v2845_v10 = vpop.f32.mrf.mxu1 }
 0x1f6   :  { %v340_v11 = vrot.slane %v339_v7, 4  ;;  %v360_v12 = vadd.f32 %v358_v8, %v356_v6  ;;  %v346_v13 = vadd.f32 %v2845_v10, %v2833_v4  ;;  %v359_v14 = vmul.f32 %v2845_v10, %v2845_v10 }
 0x1f8   :  { %v341_v15 = vadd.f32 %v340_v11, %v339_v7  ;;  %v361_v16 = vrot.slane %v360_v12, 4  ;;  %v347_v17 = vrot.slane %v346_v13, 4  ;;  %v367_v18 = vadd.f32 %v359_v14, %v357_v9 }
 0x1fa   :  { %v342_v19 = vrot.slane %v341_v15, 2  ;;  %v362_v20 = vadd.f32 %v361_v16, %v360_v12  ;;  %v348_v21 = vadd.f32 %v347_v17, %v346_v13  ;;  %v368_v22 = vrot.slane %v367_v18, 4  ;;  %v338_v12 = vld [vmem:[#allocation12 + $0x3] sm:$0x3] }
 0x1fc   :  { %v343_v23 = vadd.f32 %v342_v19, %v341_v15  ;;  %v363_v24 = vrot.slane %v362_v20, 2  ;;  %v349_v25 = vrot.slane %v348_v21, 2  ;;  %v369_v26 = vadd.f32 %v368_v22, %v367_v18 }
 0x1fe   :  { %v344_v27 = vrot.slane %v343_v23, 1  ;;  %v364_v28 = vadd.f32 %v363_v24, %v362_v20  ;;  %v350_v29 = vadd.f32 %v349_v25, %v348_v21  ;;  %v370_v30 = vrot.slane %v369_v26, 2 }
 0x200   :  { %v345_v31 = vadd.f32 %v344_v27, %v343_v23  ;;  %v365_v32 = vrot.slane %v364_v28, 1  ;;  %v351_v33 = vrot.slane %v350_v29, 1  ;;  %v371_v34 = vadd.f32 %v370_v30, %v369_v26 }
 0x202   :  { %v354_v35 = vmul.f32 0.0625, %v345_v31  ;;  %v366_v36 = vadd.f32 %v365_v32, %v364_v28  ;;  %v352_v37 = vadd.f32 %v351_v33, %v350_v29  ;;  %v372_v38 = vrot.slane %v371_v34, 1  ;;  %v983_v32 = vld [vmem:[#allocation9 + $0x2c8] sm:$0xff] }
 0x204   :  { %v374_v39 = vmul.f32 0.0625, %v366_v36  ;;  %v376_v40 = vmul.f32 %v354_v35, %v354_v35  ;;  %v355_v41 = vmul.f32 0.0625, %v352_v37  ;;  %v373_v42 = vadd.f32 %v372_v38, %v371_v34  ;;  %v982_v36 = vld [vmem:[#allocation9 + $0x2c0] sm:$0xff] }
 0x205   :  { %v1207_v34 = vunpack.c.h.s8.bf16 %v983_v32  ;;  %v1206_v38 = vunpack.c.h.s8.bf16 %v982_v36 }
 0x206   :  { %v378_v43 = vsub.f32 %v374_v39, %v376_v40  ;;  %v375_v44 = vmul.f32 0.0625, %v373_v42  ;;  %v377_v45 = vmul.f32 %v355_v41, %v355_v41  ;;  %v1199_v40 = vunpack.c.l.s8.bf16 %v983_v32  ;;  %v1007_v32 = vld [vmem:[#allocation9 + $0x388] sm:$0xff] }
 0x207   :  { %1321 = vmatprep.subr.bf16.mxu1 %v1207_v34  ;;  %v1198_v42 = vunpack.c.l.s8.bf16 %v982_v36  ;;  %v1255_v34 = vunpack.c.h.s8.bf16 %v1007_v32  ;;  %v1006_v36 = vld [vmem:[#allocation9 + $0x380] sm:$0xff] }
 0x208   :  { %v380_v46 = vmax.f32 %v378_v43, 0.0  ;;  %v379_v47 = vsub.f32 %v375_v44, %v377_v45  ;;  %v911_v43 = vld [vmem:[#allocation9 + $0x88] sm:$0xff] }
 0x209   :  { %v975_v44 = vld [vmem:[#allocation9 + $0x288] sm:$0xff]  ;;  %v1063_v45 = vunpack.c.h.s8.bf16 %v911_v43  ;;  %v1055_v51 = vunpack.c.l.s8.bf16 %v911_v43 }
 0x20a   :  { %v382_v48 = vadd.f32 0.8, %v380_v46  ;;  %v381_v49 = vmax.f32 %v379_v47, 0.0  ;;  %v1191_v46 = vunpack.c.h.s8.bf16 %v975_v44  ;;  %v910_v47 = vld [vmem:[#allocation9 + $0x80] sm:$0xff]  ;;  %v1183_v52 = vunpack.c.l.s8.bf16 %v975_v44  ;;  %v935_v43 = vld [vmem:[#allocation9 + $0x148] sm:$0xff] }
 0x20b   :  { %v1054_v53 = vunpack.c.l.s8.bf16 %v910_v47  ;;  %v999_v44 = vld [vmem:[#allocation9 + $0x348] sm:$0xff] }
 0x20c   :  { %v383_v50 = vadd.f32 0.8, %v381_v49  ;;  %2583 = vrsqrt.f32 %v382_v48  ;;  %v974_v48 = vld [vmem:[#allocation9 + $0x280] sm:$0xff]  ;;  %v1062_v49 = vunpack.c.h.s8.bf16 %v910_v47 }
 0x20d   :  { %v1182_v54 = vunpack.c.l.s8.bf16 %v974_v48  ;;  %v934_v47 = vld [vmem:[#allocation9 + $0x140] sm:$0xff] }
 0x20e   :  { %2585 = vrsqrt.f32 %v383_v50  ;;  %v1190_v50 = vunpack.c.h.s8.bf16 %v974_v48  ;;  %v998_v48 = vld [vmem:[#allocation9 + $0x340] sm:$0xff] }
 0x219   :  { %v2584_v56 = vpop.eup %2583 }
 0x21b   :  { %v2586_v58 = vpop.eup %2585 }
 0x21c   :  { %v388_v59 = vcombine.low %v2584_v56, %v2586_v58  ;;  %v903_v56 = vld [vmem:[#allocation9 + $0x48] sm:$0xff] }
 0x21d   :  { %v967_v58 = vld [vmem:[#allocation9 + $0x248] sm:$0xff] }
 0x21e   :  { %v395_v60 = vrot.slane %v388_v59, %v2854_v57  ;;  %v1047_v59 = vunpack.c.h.s8.bf16 %v903_v56 }
 0x220   :  { %v402_v62 = vrot.slane %v395_v60, %v2854_v57  ;;  %v1175_v60 = vunpack.c.h.s8.bf16 %v967_v58 }
 0x222   :  { %v404_v1 = vmul.f32 %v402_v62, %v337_v61  ;;  %v902_v61 = vld [vmem:[#allocation9 + $0x40] sm:$0xff] }
 0x223   :  { %v966_v62 = vld [vmem:[#allocation9 + $0x240] sm:$0xff] }
 0x224   :  { %v409_v2 = vrot.slane %v404_v1, %v2859_v63  ;;  %v413_v6 = vrot.slane %v404_v1, %v2862_v0  ;;  %v1046_v1 = vunpack.c.h.s8.bf16 %v902_v61 }
 0x226   :  { %v420_v7 = vmul.f32 %v409_v2, %v354_v35  ;;  %v421_v8 = vmul.f32 %v413_v6, %v355_v41  ;;  %v419_v15 = vmul.f32 %v413_v6, %v2845_v10  ;;  %v417_v16 = vmul.f32 %v413_v6, %v2833_v4  ;;  %v918_v35 = vld [vmem:[#allocation9 + $0xc0] sm:$0xff] }
 0x227   :  { %v416_v19 = vmul.f32 %v409_v2, %v2831_v3  ;;  %v418_v20 = vmul.f32 %v409_v2, %v2835_v5  ;;  %v919_v5 = vld [vmem:[#allocation9 + $0xc8] sm:$0xff]  ;;  %v1078_v37 = vunpack.c.h.s8.bf16 %v918_v35  ;;  %v1070_v41 = vunpack.c.l.s8.bf16 %v918_v35  ;;  %v942_v35 = vld [vmem:[#allocation9 + $0x180] sm:$0xff] }
 0x228   :  { %v424_v9 = vcombine.low %v420_v7, %v421_v8  ;;  %v1079_v33 = vunpack.c.h.s8.bf16 %v919_v5  ;;  %v1071_v39 = vunpack.c.l.s8.bf16 %v919_v5  ;;  %v1174_v2 = vunpack.c.h.s8.bf16 %v966_v62  ;;  %v943_v5 = vld [vmem:[#allocation9 + $0x188] sm:$0xff] }
 0x229   :  { %v1039_v6 = vunpack.c.l.s8.bf16 %v903_v56  ;;  %v1167_v7 = vunpack.c.l.s8.bf16 %v967_v58  ;;  %v1038_v8 = vunpack.c.l.s8.bf16 %v902_v61  ;;  %v927_v56 = vld [vmem:[#allocation9 + $0x108] sm:$0xff]  ;;  %v926_v61 = vld [vmem:[#allocation9 + $0x100] sm:$0xff] }
 0x22a   :  { %v431_v11 = vrot.slane %v424_v9, %v2854_v57  ;;  %1278 = vmatprep.subr.bf16.mxu0 %v1079_v33  ;;  %v1166_v9 = vunpack.c.l.s8.bf16 %v966_v62  ;;  %v1127_v33 = vunpack.c.h.s8.bf16 %v943_v5  ;;  %v991_v58 = vld [vmem:[#allocation9 + $0x308] sm:$0xff]  ;;  %v990_v62 = vld [vmem:[#allocation9 + $0x300] sm:$0xff] }
 0x22c   :  { %v438_v13 = vrot.slane %v431_v11, %v2854_v57  ;;  %v895_v11 = vld [vmem:[#allocation9 + $0x8] sm:$0xff] }
 0x22e   :  { %v440_v14 = vsub.f32 %v338_v12, %v438_v13  ;;  %v959_v12 = vld [vmem:[#allocation9 + $0x208] sm:$0xff]  ;;  %v1031_v13 = vunpack.c.h.s8.bf16 %v895_v11 }
 0x230   :  { %v445_v17 = vrot.slane %v440_v14, %v2859_v63  ;;  %v449_v18 = vrot.slane %v440_v14, %v2862_v0  ;;  %v1159_v14 = vunpack.c.h.s8.bf16 %v959_v12 }
 0x232   :  { %v455_v21 = vadd.f32 %v449_v18, %v419_v15  ;;  %v453_v22 = vadd.f32 %v449_v18, %v417_v16  ;;  %v452_v23 = vadd.f32 %v445_v17, %v416_v19  ;;  %v454_v24 = vadd.f32 %v445_v17, %v418_v20  ;;  %v894_v15 = vld [vmem:[#allocation9] sm:$0xff] }
 0x233   :  { %v958_v16 = vld [vmem:[#allocation9 + $0x200] sm:$0xff]  ;;  %v1030_v17 = vunpack.c.h.s8.bf16 %v894_v15  ;;  %v1023_v19 = vunpack.c.l.s8.bf16 %v895_v11  ;;  %v1151_v20 = vunpack.c.l.s8.bf16 %v959_v12  ;;  %v2874_v11 = vld [vmem:[#allocation9 + $0xd8] sm:$0xff] }
 0x234   :  { %vm457_vm4 = vcmp.gt.f32.partialorder %v453_v22, 0.0  ;;  %vm459_vm5 = vcmp.gt.f32.partialorder %v455_v21, 0.0  ;;  %v461_v25 = vmul.f32 0.2, %v453_v22  ;;  %v463_v26 = vmul.f32 0.2, %v455_v21 }
 0x235   :  { %vm456_vm6 = vcmp.gt.f32.partialorder %v452_v23, 0.0  ;;  %vm458_vm7 = vcmp.gt.f32.partialorder %v454_v24, 0.0  ;;  %v460_v10 = vmul.f32 0.2, %v452_v23  ;;  %v462_v4 = vmul.f32 0.2, %v454_v24 }
 0x236   :  { %v465_v27 = vsel %vm457_vm4, %v453_v22, %v461_v25  ;;  %v467_v28 = vsel %vm459_vm5, %v455_v21, %v463_v26  ;;  %v1158_v18 = vunpack.c.h.s8.bf16 %v958_v16  ;;  %v1022_v21 = vunpack.c.l.s8.bf16 %v894_v15  ;;  %v2876_v12 = vld [vmem:[#allocation9 + $0x2d8] sm:$0xff] }
 0x237   :  { %v469_v29 = vpack.c.bf16 %v467_v28, %v465_v27  ;;  %v464_v30 = vsel %vm456_vm6, %v452_v23, %v460_v10  ;;  %v466_v31 = vsel %vm458_vm7, %v454_v24, %v462_v4  ;;  %v1150_v22 = vunpack.c.l.s8.bf16 %v958_v16  ;;  %v951_v23 = vld [vmem:[#allocation9 + $0x1c8] sm:$0xff]  ;;  %v950_v10 = vld [vmem:[#allocation9 + $0x1c0] sm:$0xff] }
 0x238   :  { %v468_v3 = vpack.c.bf16 %v466_v31, %v464_v30  ;;  %v1015_v24 = vld [vmem:[#allocation9 + $0x3c8] sm:$0xff]  ;;  %v1143_v25 = vunpack.c.h.s8.bf16 %v951_v23  ;;  %v1014_v4 = vld [vmem:[#allocation9 + $0x3c0] sm:$0xff]  ;;  %v1142_v27 = vunpack.c.h.s8.bf16 %v950_v10  ;;  %v1134_v31 = vunpack.c.l.s8.bf16 %v950_v10 }
 0x239   :  { %598 = vmatprep.mubr.bf16.mxu0 %v469_v29  ;;  %641 = vmatprep.mubr.bf16.mxu1 %v469_v29  ;;  %v1271_v26 = vunpack.c.h.s8.bf16 %v1015_v24  ;;  %v1270_v28 = vunpack.c.h.s8.bf16 %v1014_v4  ;;  %v1135_v29 = vunpack.c.l.s8.bf16 %v951_v23  ;;  %v1263_v30 = vunpack.c.l.s8.bf16 %v1015_v24 }
 0x23a   :  { %599 = vmatmul.mubr.bf16.vlgmr.msra.gmra.mxu0 %v468_v3  ;;  %642 = vmatmul.mubr.bf16.vlgmr.msra.gmra.mxu1 %v468_v3  ;;  %v1262_v3 = vunpack.c.l.s8.bf16 %v1014_v4 }
 0x23b   :  { %1279 = vmatpush1.bf16.msra.mxu0 %v1078_v37  ;;  %1322 = vmatpush1.bf16.msra.mxu1 %v1206_v38  ;;  %v1126_v37 = vunpack.c.h.s8.bf16 %v942_v35  ;;  %v1254_v38 = vunpack.c.h.s8.bf16 %v1006_v36 }
 0x23c   :  { %1280 = vmatprep.subr.bf16.mxu0 %v1071_v39  ;;  %1323 = vmatprep.subr.bf16.mxu1 %v1199_v40  ;;  %v1119_v39 = vunpack.c.l.s8.bf16 %v943_v5  ;;  %v1247_v40 = vunpack.c.l.s8.bf16 %v1007_v32 }
 0x23f   :  { %1281 = vmatpush1.bf16.msra.mxu0 %v1070_v41  ;;  %1324 = vmatpush1.bf16.msra.mxu1 %v1198_v42  ;;  %v1118_v41 = vunpack.c.l.s8.bf16 %v942_v35  ;;  %v1246_v42 = vunpack.c.l.s8.bf16 %v1006_v36 }
 0x240   :  { %1282 = vmatprep.subr.bf16.mxu0 %v1063_v45  ;;  %1325 = vmatprep.subr.bf16.mxu1 %v1191_v46  ;;  %v1111_v45 = vunpack.c.h.s8.bf16 %v935_v43  ;;  %v1239_v46 = vunpack.c.h.s8.bf16 %v999_v44 }
 0x243   :  { %1283 = vmatpush1.bf16.msra.mxu0 %v1062_v49  ;;  %1326 = vmatpush1.bf16.msra.mxu1 %v1190_v50  ;;  %v1110_v49 = vunpack.c.h.s8.bf16 %v934_v47  ;;  %v1238_v50 = vunpack.c.h.s8.bf16 %v998_v48 }
 0x244   :  { %1284 = vmatprep.subr.bf16.mxu0 %v1055_v51  ;;  %1327 = vmatprep.subr.bf16.mxu1 %v1183_v52  ;;  %v1103_v51 = vunpack.c.l.s8.bf16 %v935_v43  ;;  %v1231_v52 = vunpack.c.l.s8.bf16 %v999_v44 }
 0x247   :  { %1285 = vmatpush1.bf16.msra.mxu0 %v1054_v53  ;;  %1328 = vmatpush1.bf16.msra.mxu1 %v1182_v54  ;;  %v1102_v53 = vunpack.c.l.s8.bf16 %v934_v47  ;;  %v1230_v54 = vunpack.c.l.s8.bf16 %v998_v48 }
 0x248   :  { %1286 = vmatprep.subr.bf16.mxu0 %v1047_v59  ;;  %1329 = vmatprep.subr.bf16.mxu1 %v1175_v60  ;;  %v1095_v59 = vunpack.c.h.s8.bf16 %v927_v56  ;;  %v1223_v60 = vunpack.c.h.s8.bf16 %v991_v58 }
 0x24b   :  { %1287 = vmatpush1.bf16.msra.mxu0 %v1046_v1  ;;  %1330 = vmatpush1.bf16.msra.mxu1 %v1174_v2  ;;  %v1094_v1 = vunpack.c.h.s8.bf16 %v926_v61  ;;  %v1222_v2 = vunpack.c.h.s8.bf16 %v990_v62 }
 0x24c   :  { %1288 = vmatprep.subr.bf16.mxu0 %v1039_v6  ;;  %1331 = vmatprep.subr.bf16.mxu1 %v1167_v7  ;;  %v1087_v6 = vunpack.c.l.s8.bf16 %v927_v56  ;;  %v1215_v7 = vunpack.c.l.s8.bf16 %v991_v58 }
 0x24f   :  { %1289 = vmatpush1.bf16.msra.mxu0 %v1038_v8  ;;  %1332 = vmatpush1.bf16.msra.mxu1 %v1166_v9  ;;  %v1086_v8 = vunpack.c.l.s8.bf16 %v926_v61  ;;  %v1214_v9 = vunpack.c.l.s8.bf16 %v990_v62 }
 0x250   :  { %1290 = vmatprep.subr.bf16.mxu0 %v1031_v13  ;;  %1333 = vmatprep.subr.bf16.mxu1 %v1159_v14  ;;  %v1081_v13 = vunpack.c.h.s8.bf16 %v2874_v11  ;;  %v1209_v14 = vunpack.c.h.s8.bf16 %v2876_v12 }
 0x253   :  { %1291 = vmatpush1.bf16.msra.mxu0 %v1030_v17  ;;  %1334 = vmatpush1.bf16.msra.mxu1 %v1158_v18 }
 0x254   :  { %1292 = vmatprep.subr.bf16.mxu0 %v1023_v19  ;;  %1335 = vmatprep.subr.bf16.mxu1 %v1151_v20 }
 0x257   :  { %1293 = vmatpush1.bf16.msra.mxu0 %v1022_v21  ;;  %1336 = vmatpush1.bf16.msra.mxu1 %v1150_v22 }
 0x258   :  { %1294 = vmatprep.subr.bf16.mxu0 %v1143_v25  ;;  %1337 = vmatprep.subr.bf16.mxu1 %v1271_v26 }
 0x25b   :  { %1295 = vmatpush2.bf16.msra.mxu0 %v1142_v27  ;;  %1338 = vmatpush2.bf16.msra.mxu1 %v1270_v28 }
 0x25c   :  { %1296 = vmatprep.subr.bf16.mxu0 %v1135_v29  ;;  %1339 = vmatprep.subr.bf16.mxu1 %v1263_v30 }
 0x25f   :  { %1297 = vmatpush2.bf16.msra.mxu0 %v1134_v31  ;;  %1340 = vmatpush2.bf16.msra.mxu1 %v1262_v3 }
 0x260   :  { %1298 = vmatprep.subr.bf16.mxu0 %v1127_v33  ;;  %1341 = vmatprep.subr.bf16.mxu1 %v1255_v34 }
 0x263   :  { %1299 = vmatpush2.bf16.msra.mxu0 %v1126_v37  ;;  %1342 = vmatpush2.bf16.msra.mxu1 %v1254_v38 }
 0x264   :  { %1300 = vmatprep.subr.bf16.mxu0 %v1119_v39  ;;  %1343 = vmatprep.subr.bf16.mxu1 %v1247_v40 }
 0x267   :  { %1301 = vmatpush2.bf16.msra.mxu0 %v1118_v41  ;;  %1344 = vmatpush2.bf16.msra.mxu1 %v1246_v42 }
 0x268   :  { %1302 = vmatprep.subr.bf16.mxu0 %v1111_v45  ;;  %1345 = vmatprep.subr.bf16.mxu1 %v1239_v46 }
 0x26b   :  { %1303 = vmatpush2.bf16.msra.mxu0 %v1110_v49  ;;  %1346 = vmatpush2.bf16.msra.mxu1 %v1238_v50 }
 0x26c   :  { %1304 = vmatprep.subr.bf16.mxu0 %v1103_v51  ;;  %1347 = vmatprep.subr.bf16.mxu1 %v1231_v52 }
 0x26f   :  { %1305 = vmatpush2.bf16.msra.mxu0 %v1102_v53  ;;  %1348 = vmatpush2.bf16.msra.mxu1 %v1230_v54 }
 0x270   :  { %1306 = vmatprep.subr.bf16.mxu0 %v1095_v59  ;;  %1349 = vmatprep.subr.bf16.mxu1 %v1223_v60 }
 0x273   :  { %1307 = vmatpush2.bf16.msra.mxu0 %v1094_v1  ;;  %1350 = vmatpush2.bf16.msra.mxu1 %v1222_v2 }
 0x274   :  { %1308 = vmatprep.subr.bf16.mxu0 %v1087_v6  ;;  %1351 = vmatprep.subr.bf16.mxu1 %v1215_v7 }
 0x277   :  { %1309 = vmatpush2.bf16.msra.mxu0 %v1086_v8  ;;  %1352 = vmatpush2.bf16.msra.mxu1 %v1214_v9 }
 0x278   :  { %1364 = vmatprep.subr.bf16.mxu0 %v1081_v13  ;;  %1407 = vmatprep.subr.bf16.mxu1 %v1209_v14 }
 0x2fa   :  { %v2880_v15 = vpop.f32.mrf.mxu0  ;;  %v2882_v16 = vpop.f32.mrf.mxu1 }
 0x2fb   :  { %v687_v19 = vmul.f32 %v2880_v15, %v2880_v15  ;;  %v689_v20 = vmul.f32 %v2882_v16, %v2882_v16 }
 0x2fc   :  { %v2884_v17 = vpop.f32.mrf.mxu0  ;;  %v2886_v18 = vpop.f32.mrf.mxu1 }
 0x2fd   :  { %v688_v10 = vmul.f32 %v2884_v17, %v2884_v17  ;;  %v690_v4 = vmul.f32 %v2886_v18, %v2886_v18 }
 0x2fe   :  { %v2892_v21 = vpop.f32.mrf.mxu0  ;;  %v2894_v22 = vpop.f32.mrf.mxu1 }
 0x2ff   :  { %v655_v23 = vadd.f32 %v2892_v21, %v2880_v15  ;;  %v691_v24 = vmul.f32 %v2892_v21, %v2892_v21  ;;  %v669_v25 = vadd.f32 %v2894_v22, %v2882_v16  ;;  %v693_v26 = vmul.f32 %v2894_v22, %v2894_v22 }
 0x300   :  { %v2908_v27 = vpop.f32.mrf.mxu0  ;;  %v2910_v28 = vpop.f32.mrf.mxu1 }
 0x301   :  { %v656_v29 = vrot.slane %v655_v23, 4  ;;  %v695_v30 = vadd.f32 %v691_v24, %v687_v19  ;;  %v670_v31 = vrot.slane %v669_v25, 4  ;;  %v709_v3 = vadd.f32 %v693_v26, %v689_v20 }
 0x302   :  { %v662_v5 = vadd.f32 %v2908_v27, %v2884_v17  ;;  %v692_v32 = vmul.f32 %v2908_v27, %v2908_v27  ;;  %v676_v33 = vadd.f32 %v2910_v28, %v2886_v18  ;;  %v694_v34 = vmul.f32 %v2910_v28, %v2910_v28 }
 0x303   :  { %v657_v35 = vadd.f32 %v656_v29, %v655_v23  ;;  %v696_v36 = vrot.slane %v695_v30, 4  ;;  %v671_v37 = vadd.f32 %v670_v31, %v669_v25  ;;  %v710_v38 = vrot.slane %v709_v3, 4 }
 0x304   :  { %v663_v39 = vrot.slane %v662_v5, 4  ;;  %v702_v40 = vadd.f32 %v692_v32, %v688_v10  ;;  %v677_v41 = vrot.slane %v676_v33, 4  ;;  %v716_v42 = vadd.f32 %v694_v34, %v690_v4 }
 0x305   :  { %v658_v43 = vrot.slane %v657_v35, 2  ;;  %v697_v44 = vadd.f32 %v696_v36, %v695_v30  ;;  %v672_v45 = vrot.slane %v671_v37, 2  ;;  %v711_v46 = vadd.f32 %v710_v38, %v709_v3 }
 0x306   :  { %v664_v47 = vadd.f32 %v663_v39, %v662_v5  ;;  %v703_v48 = vrot.slane %v702_v40, 4  ;;  %v678_v49 = vadd.f32 %v677_v41, %v676_v33  ;;  %v717_v50 = vrot.slane %v716_v42, 4 }
 0x307   :  { %v659_v51 = vadd.f32 %v658_v43, %v657_v35  ;;  %v698_v52 = vrot.slane %v697_v44, 2  ;;  %v673_v53 = vadd.f32 %v672_v45, %v671_v37  ;;  %v712_v54 = vrot.slane %v711_v46, 2 }
 0x308   :  { %v665_v56 = vrot.slane %v664_v47, 2  ;;  %v704_v58 = vadd.f32 %v703_v48, %v702_v40  ;;  %v679_v59 = vrot.slane %v678_v49, 2  ;;  %v718_v60 = vadd.f32 %v717_v50, %v716_v42 }
 0x309   :  { %v660_v61 = vrot.slane %v659_v51, 1  ;;  %v699_v62 = vadd.f32 %v698_v52, %v697_v44  ;;  %v674_v1 = vrot.slane %v673_v53, 1  ;;  %v713_v2 = vadd.f32 %v712_v54, %v711_v46 }
 0x30a   :  { %v666_v6 = vadd.f32 %v665_v56, %v664_v47  ;;  %v705_v7 = vrot.slane %v704_v58, 2  ;;  %v680_v8 = vadd.f32 %v679_v59, %v678_v49  ;;  %v719_v9 = vrot.slane %v718_v60, 2  ;;  %v654_v56 = vld [vmem:[#allocation12 + $0x1d] sm:$0xf] }
 0x30b   :  { %v661_v13 = vadd.f32 %v660_v61, %v659_v51  ;;  %v700_v14 = vrot.slane %v699_v62, 1  ;;  %v675_v19 = vadd.f32 %v674_v1, %v673_v53  ;;  %v714_v20 = vrot.slane %v713_v2, 1 }
 0x30c   :  { %v667_v23 = vrot.slane %v666_v6, 1  ;;  %v706_v24 = vadd.f32 %v705_v7, %v704_v58  ;;  %v681_v25 = vrot.slane %v680_v8, 1  ;;  %v720_v26 = vadd.f32 %v719_v9, %v718_v60 }
 0x30d   :  { %v683_v10 = vmul.f32 0.0625, %v661_v13  ;;  %v701_v4 = vadd.f32 %v700_v14, %v699_v62  ;;  %v685_v29 = vmul.f32 0.0625, %v675_v19  ;;  %v715_v30 = vadd.f32 %v714_v20, %v713_v2 }
 0x30e   :  { %v668_v31 = vadd.f32 %v667_v23, %v666_v6  ;;  %v707_v3 = vrot.slane %v706_v24, 1  ;;  %v682_v5 = vadd.f32 %v681_v25, %v680_v8  ;;  %v721_v32 = vrot.slane %v720_v26, 1  ;;  %v652_v6 = vld [vmem:[#allocation12 + $0x5] sm:$0xf] }
 0x30f   :  { %v723_v33 = vmul.f32 0.0625, %v701_v4  ;;  %v727_v34 = vmul.f32 %v683_v10, %v683_v10  ;;  %v725_v35 = vmul.f32 0.0625, %v715_v30  ;;  %v729_v36 = vmul.f32 %v685_v29, %v685_v29 }
 0x310   :  { %v684_v37 = vmul.f32 0.0625, %v668_v31  ;;  %v708_v38 = vadd.f32 %v707_v3, %v706_v24  ;;  %v686_v39 = vmul.f32 0.0625, %v682_v5  ;;  %v722_v40 = vadd.f32 %v721_v32, %v720_v26 }
 0x311   :  { %v731_v41 = vsub.f32 %v723_v33, %v727_v34  ;;  %v733_v42 = vsub.f32 %v725_v35, %v729_v36  ;;  %v740_v60 = vmul.f32 %v654_v56, %v654_v56  ;;  %v739_v7 = vmul.f32 %v654_v56, %v652_v6  ;;  %v653_v34 = vld [vmem:[#allocation12 + $0x9] sm:$0xf]  ;;  %v2935_v35 = vld [vmem:[#allocation9 + $0xd0] sm:$0xff] }
 0x312   :  { %v724_v43 = vmul.f32 0.0625, %v708_v38  ;;  %v728_v44 = vmul.f32 %v684_v37, %v684_v37  ;;  %v726_v45 = vmul.f32 0.0625, %v722_v40  ;;  %v730_v46 = vmul.f32 %v686_v39, %v686_v39 }
 0x313   :  { %v735_v49 = vmax.f32 %v731_v41, 0.0  ;;  %v737_v50 = vmax.f32 %v733_v42, 0.0  ;;  %v2924_v8 = vsub.s32 2, %v2851_v55  ;;  %v2927_v9 = vsub.s32 3, %v2851_v55 }
 0x314   :  { %v732_v47 = vsub.f32 %v724_v43, %v728_v44  ;;  %v734_v48 = vsub.f32 %v726_v45, %v730_v46  ;;  %v1080_v40 = vunpack.c.h.s8.bf16 %v2935_v35 }
 0x316   :  { %v736_v51 = vmax.f32 %v732_v47, 0.0  ;;  %v738_v52 = vmax.f32 %v734_v48, 0.0 }
 0x318   :  { %v745_v53 = vcombine.low %v735_v49, %v736_v51  ;;  %v746_v54 = vcombine.low %v737_v50, %v738_v52 }
 0x31a   :  { %v753_v58 = vrot.slane %v745_v53, %v2854_v57  ;;  %v760_v59 = vrot.slane %v746_v54, %v2854_v57 }
 0x31c   :  { %v761_v61 = vcombine.low %v753_v58, %v760_v59 }
 0x31e   :  { %v768_v62 = vrot.slane %v761_v61, %v2854_v57 }
 0x320   :  { %v770_v1 = vmul.f32 %v768_v62, %v740_v60 }
 0x322   :  { %v771_v2 = vadd.f32 0.8, %v770_v1  ;;  %v984_v1 = vld [vmem:[#allocation9 + $0x2d0] sm:$0xff] }
 0x324   :  { %2587 = vrsqrt.f32 %v771_v2 }
 0x331   :  { %v2588_v13 = vpop.eup %2587 }
 0x332   :  { %v773_v14 = vmul.f32 %v2588_v13, %v739_v7 }
 0x334   :  { %v778_v19 = vrot.slane %v773_v14, %v2859_v63  ;;  %v782_v20 = vrot.slane %v773_v14, %v2862_v0  ;;  %v786_v23 = vrot.slane %v773_v14, %v2924_v8  ;;  %v790_v24 = vrot.slane %v773_v14, %v2927_v9 }
 0x336   :  { %v803_v25 = vmul.f32 %v778_v19, %v683_v10  ;;  %v804_v26 = vmul.f32 %v782_v20, %v684_v37  ;;  %v805_v4 = vmul.f32 %v786_v23, %v685_v29  ;;  %v806_v30 = vmul.f32 %v790_v24, %v686_v39 }
 0x337   :  { %v798_v10 = vmul.f32 %v790_v24, %v2886_v18  ;;  %v802_v29 = vmul.f32 %v790_v24, %v2910_v28  ;;  %v796_v37 = vmul.f32 %v782_v20, %v2884_v17  ;;  %v800_v39 = vmul.f32 %v782_v20, %v2908_v27 }
 0x338   :  { %v811_v31 = vcombine.low %v803_v25, %v804_v26  ;;  %v812_v3 = vcombine.low %v805_v4, %v806_v30  ;;  %v795_v45 = vmul.f32 %v778_v19, %v2880_v15  ;;  %v799_v46 = vmul.f32 %v778_v19, %v2892_v21  ;;  %v913_v25 = vld [vmem:[#allocation9 + $0x98] sm:$0xff] }
 0x339   :  { %v797_v18 = vmul.f32 %v786_v23, %v2882_v16  ;;  %v801_v28 = vmul.f32 %v786_v23, %v2894_v22  ;;  %v1073_v19 = vunpack.c.l.s8.bf16 %v2874_v11  ;;  %v1208_v24 = vunpack.c.h.s8.bf16 %v984_v1 }
 0x33a   :  { %v819_v5 = vrot.slane %v811_v31, %v2854_v57  ;;  %v826_v32 = vrot.slane %v812_v3, %v2854_v57  ;;  %v1201_v4 = vunpack.c.l.s8.bf16 %v2876_v12  ;;  %v1072_v30 = vunpack.c.l.s8.bf16 %v2935_v35  ;;  %v977_v31 = vld [vmem:[#allocation9 + $0x298] sm:$0xff]  ;;  %v912_v3 = vld [vmem:[#allocation9 + $0x90] sm:$0xff] }
 0x33b   :  { %v1065_v11 = vunpack.c.h.s8.bf16 %v913_v25  ;;  %v1064_v12 = vunpack.c.h.s8.bf16 %v912_v3  ;;  %v905_v35 = vld [vmem:[#allocation9 + $0x58] sm:$0xff] }
 0x33c   :  { %v827_v33 = vcombine.low %v819_v5, %v826_v32  ;;  %v1200_v5 = vunpack.c.l.s8.bf16 %v984_v1  ;;  %v1193_v32 = vunpack.c.h.s8.bf16 %v977_v31 }
 0x33e   :  { %v834_v36 = vrot.slane %v827_v33, %v2854_v57  ;;  %v976_v33 = vld [vmem:[#allocation9 + $0x290] sm:$0xff] }
 0x340   :  { %v836_v38 = vsub.f32 %v653_v34, %v834_v36  ;;  %v1057_v34 = vunpack.c.l.s8.bf16 %v913_v25  ;;  %v1192_v36 = vunpack.c.h.s8.bf16 %v976_v33 }
 0x342   :  { %v853_v41 = vrot.slane %v836_v38, %v2927_v9  ;;  %v845_v42 = vrot.slane %v836_v38, %v2862_v0  ;;  %v841_v43 = vrot.slane %v836_v38, %v2859_v63  ;;  %v849_v44 = vrot.slane %v836_v38, %v2924_v8 }
 0x343   :  { %v1185_v38 = vunpack.c.l.s8.bf16 %v977_v31 }
 0x344   :  { %v861_v47 = vadd.f32 %v853_v41, %v798_v10  ;;  %v865_v17 = vadd.f32 %v853_v41, %v802_v29  ;;  %v859_v48 = vadd.f32 %v845_v42, %v796_v37  ;;  %v863_v27 = vadd.f32 %v845_v42, %v800_v39  ;;  %v969_v10 = vld [vmem:[#allocation9 + $0x258] sm:$0xff]  ;;  %v904_v37 = vld [vmem:[#allocation9 + $0x50] sm:$0xff] }
 0x345   :  { %v858_v49 = vadd.f32 %v841_v43, %v795_v45  ;;  %v862_v50 = vadd.f32 %v841_v43, %v799_v46  ;;  %v860_v51 = vadd.f32 %v849_v44, %v797_v18  ;;  %v864_v52 = vadd.f32 %v849_v44, %v801_v28  ;;  %v968_v42 = vld [vmem:[#allocation9 + $0x250] sm:$0xff]  ;;  %v897_v46 = vld [vmem:[#allocation9 + $0x18] sm:$0xff] }
 0x346   :  { %vm873_vm8 = vcmp.gt.f32.partialorder %v865_v17, 0.0  ;;  %v881_v53 = vmul.f32 0.2, %v865_v17  ;;  %vm867_vm9 = vcmp.gt.f32.partialorder %v859_v48, 0.0  ;;  %vm871_vm10 = vcmp.gt.f32.partialorder %v863_v27, 0.0 }
 0x347   :  { %v875_v54 = vmul.f32 0.2, %v859_v48  ;;  %v879_v15 = vmul.f32 0.2, %v863_v27  ;;  %vm869_vm11 = vcmp.gt.f32.partialorder %v861_v47, 0.0  ;;  %vm866_vm12 = vcmp.gt.f32.partialorder %v858_v49, 0.0 }
 0x348   :  { %v877_v21 = vmul.f32 0.2, %v861_v47  ;;  %v889_v16 = vsel %vm873_vm8, %v865_v17, %v881_v53  ;;  %vm870_vm13 = vcmp.gt.f32.partialorder %v862_v50, 0.0  ;;  %v874_v22 = vmul.f32 0.2, %v858_v49 }
 0x349   :  { %v883_v56 = vsel %vm867_vm9, %v859_v48, %v875_v54  ;;  %v887_v58 = vsel %vm871_vm10, %v863_v27, %v879_v15  ;;  %v878_v59 = vmul.f32 0.2, %v862_v50  ;;  %vm868_vm14 = vcmp.gt.f32.partialorder %v860_v51, 0.0  ;;  %v896_v48 = vld [vmem:[#allocation9 + $0x10] sm:$0xff]  ;;  %v953_v54 = vld [vmem:[#allocation9 + $0x1d8] sm:$0xff] }
 0x34a   :  { %v2951_v60 = vpack.c.bf16 %v887_v58, %v883_v56  ;;  %v885_v61 = vsel %vm869_vm11, %v861_v47, %v877_v21  ;;  %v882_v62 = vsel %vm866_vm12, %v858_v49, %v874_v22  ;;  %vm872_vm15 = vcmp.gt.f32.partialorder %v864_v52, 0.0  ;;  %v961_v47 = vld [vmem:[#allocation9 + $0x218] sm:$0xff]  ;;  %v952_v56 = vld [vmem:[#allocation9 + $0x1d0] sm:$0xff] }
 0x34b   :  { %v2953_v2 = vpack.c.bf16 %v889_v16, %v885_v61  ;;  %v886_v6 = vsel %vm870_vm13, %v862_v50, %v878_v59  ;;  %v876_v7 = vmul.f32 0.2, %v860_v51  ;;  %v880_v13 = vmul.f32 0.2, %v864_v52  ;;  %v960_v50 = vld [vmem:[#allocation9 + $0x210] sm:$0xff]  ;;  %v1017_v16 = vld [vmem:[#allocation9 + $0x3d8] sm:$0xff] }
 0x34c   :  { %1310 = vmatprep.mubr.bf16.mxu0 %v2951_v60  ;;  %v2956_v14 = vpack.c.bf16 %v886_v6, %v882_v62  ;;  %v1049_v29 = vunpack.c.h.s8.bf16 %v905_v35  ;;  %v1184_v39 = vunpack.c.l.s8.bf16 %v976_v33  ;;  %v1177_v41 = vunpack.c.h.s8.bf16 %v969_v10  ;;  %v1016_v61 = vld [vmem:[#allocation9 + $0x3d0] sm:$0xff] }
 0x34d   :  { %1353 = vmatprep.mubr.bf16.mxu1 %v2953_v2  ;;  %v884_v20 = vsel %vm868_vm14, %v860_v51, %v876_v7  ;;  %v888_v23 = vsel %vm872_vm15, %v864_v52, %v880_v13  ;;  %v1048_v43 = vunpack.c.h.s8.bf16 %v904_v37  ;;  %v1041_v44 = vunpack.c.l.s8.bf16 %v905_v35  ;;  %v945_v7 = vld [vmem:[#allocation9 + $0x198] sm:$0xff] }
 0x34e   :  { %1311 = vmatmul.mubr.bf16.vlgmr.msra.gmra.mxu0 %v2956_v14  ;;  %v2961_v26 = vpack.c.bf16 %v888_v23, %v884_v20  ;;  %v1176_v45 = vunpack.c.h.s8.bf16 %v968_v42  ;;  %v1169_v18 = vunpack.c.l.s8.bf16 %v969_v10  ;;  %v1040_v28 = vunpack.c.l.s8.bf16 %v904_v37  ;;  %v1009_v20 = vld [vmem:[#allocation9 + $0x398] sm:$0xff] }
 0x34f   :  { %1365 = vmatpush1.bf16.msra.mxu0 %v1080_v40  ;;  %1396 = vmatprep.mubr.bf16.mxu0 %v2951_v60  ;;  %v1056_v40 = vunpack.c.l.s8.bf16 %v912_v3  ;;  %v1033_v17 = vunpack.c.h.s8.bf16 %v897_v46  ;;  %v1168_v27 = vunpack.c.l.s8.bf16 %v968_v42  ;;  %v1161_v49 = vunpack.c.h.s8.bf16 %v961_v47 }
 0x350   :  { %1354 = vmatmul.mubr.bf16.vlgmr.msra.gmra.mxu1 %v2961_v26  ;;  %1366 = vmatprep.subr.bf16.mxu0 %v1073_v19  ;;  %v1032_v51 = vunpack.c.h.s8.bf16 %v896_v48  ;;  %v1025_v52 = vunpack.c.l.s8.bf16 %v897_v46  ;;  %v1160_v53 = vunpack.c.h.s8.bf16 %v960_v50  ;;  %v1153_v15 = vunpack.c.l.s8.bf16 %v961_v47 }
 0x351   :  { %1408 = vmatpush1.bf16.msra.mxu1 %v1208_v24  ;;  %1439 = vmatprep.mubr.bf16.mxu1 %v2953_v2  ;;  %v1024_v21 = vunpack.c.l.s8.bf16 %v896_v48  ;;  %v1145_v22 = vunpack.c.h.s8.bf16 %v953_v54  ;;  %v1152_v58 = vunpack.c.l.s8.bf16 %v960_v50  ;;  %v1273_v59 = vunpack.c.h.s8.bf16 %v1017_v16  ;;  %v944_v24 = vld [vmem:[#allocation9 + $0x190] sm:$0xff] }
 0x352   :  { %1409 = vmatprep.subr.bf16.mxu1 %v1201_v4  ;;  %v1144_v62 = vunpack.c.h.s8.bf16 %v952_v56  ;;  %v1137_v1 = vunpack.c.l.s8.bf16 %v953_v54  ;;  %v1272_v6 = vunpack.c.h.s8.bf16 %v1016_v61  ;;  %v1265_v13 = vunpack.c.l.s8.bf16 %v1017_v16 }
 0x353   :  { %1367 = vmatpush1.bf16.msra.mxu0 %v1072_v30  ;;  %v1136_v19 = vunpack.c.l.s8.bf16 %v952_v56  ;;  %v1129_v23 = vunpack.c.h.s8.bf16 %v945_v7  ;;  %v1264_v25 = vunpack.c.l.s8.bf16 %v1016_v61  ;;  %v1257_v4 = vunpack.c.h.s8.bf16 %v1009_v20  ;;  %v1008_v30 = vld [vmem:[#allocation9 + $0x390] sm:$0xff] }
 0x354   :  { %1368 = vmatprep.subr.bf16.mxu0 %v1065_v11  ;;  %v1128_v31 = vunpack.c.h.s8.bf16 %v944_v24  ;;  %v1121_v11 = vunpack.c.l.s8.bf16 %v945_v7  ;;  %v1256_v3 = vunpack.c.h.s8.bf16 %v1008_v30  ;;  %v1120_v33 = vunpack.c.l.s8.bf16 %v944_v24 }
 0x355   :  { %1410 = vmatpush1.bf16.msra.mxu1 %v1200_v5  ;;  %v937_v5 = vld [vmem:[#allocation9 + $0x158] sm:$0xff]  ;;  %v1248_v35 = vunpack.c.l.s8.bf16 %v1008_v30 }
 0x356   :  { %1411 = vmatprep.subr.bf16.mxu1 %v1193_v32  ;;  %v1249_v32 = vunpack.c.l.s8.bf16 %v1009_v20 }
 0x357   :  { %1369 = vmatpush1.bf16.msra.mxu0 %v1064_v12  ;;  %v1001_v12 = vld [vmem:[#allocation9 + $0x358] sm:$0xff] }
 0x358   :  { %1370 = vmatprep.subr.bf16.mxu0 %v1057_v34  ;;  %v1113_v34 = vunpack.c.h.s8.bf16 %v937_v5 }
 0x359   :  { %1412 = vmatpush1.bf16.msra.mxu1 %v1192_v36  ;;  %v936_v36 = vld [vmem:[#allocation9 + $0x150] sm:$0xff] }
 0x35a   :  { %1413 = vmatprep.subr.bf16.mxu1 %v1185_v38  ;;  %v1241_v38 = vunpack.c.h.s8.bf16 %v1001_v12  ;;  %v1112_v10 = vunpack.c.h.s8.bf16 %v936_v36  ;;  %v1104_v42 = vunpack.c.l.s8.bf16 %v936_v36 }
 0x35b   :  { %1371 = vmatpush1.bf16.msra.mxu0 %v1056_v40  ;;  %v1000_v40 = vld [vmem:[#allocation9 + $0x350] sm:$0xff] }
 0x35c   :  { %1372 = vmatprep.subr.bf16.mxu0 %v1049_v29  ;;  %v1105_v29 = vunpack.c.l.s8.bf16 %v937_v5  ;;  %v1240_v37 = vunpack.c.h.s8.bf16 %v1000_v40  ;;  %v1232_v46 = vunpack.c.l.s8.bf16 %v1000_v40 }
 0x35d   :  { %1414 = vmatpush1.bf16.msra.mxu1 %v1184_v39  ;;  %v929_v39 = vld [vmem:[#allocation9 + $0x118] sm:$0xff] }
 0x35e   :  { %1415 = vmatprep.subr.bf16.mxu1 %v1177_v41  ;;  %v1233_v41 = vunpack.c.l.s8.bf16 %v1001_v12 }
 0x35f   :  { %1373 = vmatpush1.bf16.msra.mxu0 %v1048_v43  ;;  %v993_v43 = vld [vmem:[#allocation9 + $0x318] sm:$0xff] }
 0x360   :  { %1374 = vmatprep.subr.bf16.mxu0 %v1041_v44  ;;  %v1097_v44 = vunpack.c.h.s8.bf16 %v929_v39 }
 0x361   :  { %1416 = vmatpush1.bf16.msra.mxu1 %v1176_v45  ;;  %v928_v45 = vld [vmem:[#allocation9 + $0x110] sm:$0xff] }
 0x362   :  { %1417 = vmatprep.subr.bf16.mxu1 %v1169_v18  ;;  %v1225_v18 = vunpack.c.h.s8.bf16 %v993_v43  ;;  %v1096_v47 = vunpack.c.h.s8.bf16 %v928_v45  ;;  %v1088_v50 = vunpack.c.l.s8.bf16 %v928_v45 }
 0x363   :  { %1375 = vmatpush1.bf16.msra.mxu0 %v1040_v28  ;;  %v992_v28 = vld [vmem:[#allocation9 + $0x310] sm:$0xff] }
 0x364   :  { %1376 = vmatprep.subr.bf16.mxu0 %v1033_v17  ;;  %v1089_v17 = vunpack.c.l.s8.bf16 %v929_v39  ;;  %v1224_v48 = vunpack.c.h.s8.bf16 %v992_v28  ;;  %v1216_v54 = vunpack.c.l.s8.bf16 %v992_v28 }
 0x365   :  { %1418 = vmatpush1.bf16.msra.mxu1 %v1168_v27  ;;  %v923_v27 = vld [vmem:[#allocation9 + $0xe8] sm:$0xff] }
 0x366   :  { %1419 = vmatprep.subr.bf16.mxu1 %v1161_v49  ;;  %v1217_v49 = vunpack.c.l.s8.bf16 %v993_v43 }
 0x367   :  { %1377 = vmatpush1.bf16.msra.mxu0 %v1032_v51  ;;  %v987_v51 = vld [vmem:[#allocation9 + $0x2e8] sm:$0xff] }
 0x368   :  { %1378 = vmatprep.subr.bf16.mxu0 %v1025_v52  ;;  %v1083_v52 = vunpack.c.h.s8.bf16 %v923_v27 }
 0x369   :  { %1420 = vmatpush1.bf16.msra.mxu1 %v1160_v53  ;;  %v922_v53 = vld [vmem:[#allocation9 + $0xe0] sm:$0xff] }
 0x36a   :  { %1421 = vmatprep.subr.bf16.mxu1 %v1153_v15  ;;  %v1211_v15 = vunpack.c.h.s8.bf16 %v987_v51  ;;  %v1082_v16 = vunpack.c.h.s8.bf16 %v922_v53  ;;  %v1074_v61 = vunpack.c.l.s8.bf16 %v922_v53 }
 0x36b   :  { %1379 = vmatpush1.bf16.msra.mxu0 %v1024_v21  ;;  %v986_v21 = vld [vmem:[#allocation9 + $0x2e0] sm:$0xff] }
 0x36c   :  { %1380 = vmatprep.subr.bf16.mxu0 %v1145_v22  ;;  %v1075_v22 = vunpack.c.l.s8.bf16 %v923_v27  ;;  %v1210_v56 = vunpack.c.h.s8.bf16 %v986_v21  ;;  %v1202_v7 = vunpack.c.l.s8.bf16 %v986_v21 }
 0x36d   :  { %1422 = vmatpush1.bf16.msra.mxu1 %v1152_v58  ;;  %v915_v58 = vld [vmem:[#allocation9 + $0xa8] sm:$0xff] }
 0x36e   :  { %1423 = vmatprep.subr.bf16.mxu1 %v1273_v59  ;;  %v1203_v59 = vunpack.c.l.s8.bf16 %v987_v51 }
 0x36f   :  { %1381 = vmatpush2.bf16.msra.mxu0 %v1144_v62  ;;  %v979_v62 = vld [vmem:[#allocation9 + $0x2a8] sm:$0xff] }
 0x370   :  { %1382 = vmatprep.subr.bf16.mxu0 %v1137_v1  ;;  %v1067_v1 = vunpack.c.h.s8.bf16 %v915_v58 }
 0x371   :  { %1424 = vmatpush2.bf16.msra.mxu1 %v1272_v6  ;;  %v914_v6 = vld [vmem:[#allocation9 + $0xa0] sm:$0xff] }
 0x372   :  { %1425 = vmatprep.subr.bf16.mxu1 %v1265_v13  ;;  %v1195_v13 = vunpack.c.h.s8.bf16 %v979_v62  ;;  %v1066_v20 = vunpack.c.h.s8.bf16 %v914_v6  ;;  %v1058_v30 = vunpack.c.l.s8.bf16 %v914_v6 }
 0x373   :  { %1383 = vmatpush2.bf16.msra.mxu0 %v1136_v19  ;;  %v978_v19 = vld [vmem:[#allocation9 + $0x2a0] sm:$0xff] }
 0x374   :  { %1384 = vmatprep.subr.bf16.mxu0 %v1129_v23  ;;  %v1059_v23 = vunpack.c.l.s8.bf16 %v915_v58  ;;  %v1194_v24 = vunpack.c.h.s8.bf16 %v978_v19  ;;  %v1186_v5 = vunpack.c.l.s8.bf16 %v978_v19 }
 0x375   :  { %1426 = vmatpush2.bf16.msra.mxu1 %v1264_v25  ;;  %v907_v25 = vld [vmem:[#allocation9 + $0x68] sm:$0xff] }
 0x376   :  { %1427 = vmatprep.subr.bf16.mxu1 %v1257_v4  ;;  %v1187_v4 = vunpack.c.l.s8.bf16 %v979_v62 }
 0x377   :  { %1385 = vmatpush2.bf16.msra.mxu0 %v1128_v31  ;;  %v971_v31 = vld [vmem:[#allocation9 + $0x268] sm:$0xff] }
 0x378   :  { %1386 = vmatprep.subr.bf16.mxu0 %v1121_v11  ;;  %v1051_v11 = vunpack.c.h.s8.bf16 %v907_v25 }
 0x379   :  { %1428 = vmatpush2.bf16.msra.mxu1 %v1256_v3  ;;  %v906_v3 = vld [vmem:[#allocation9 + $0x60] sm:$0xff] }
 0x37a   :  { %1429 = vmatprep.subr.bf16.mxu1 %v1249_v32  ;;  %v1179_v32 = vunpack.c.h.s8.bf16 %v971_v31  ;;  %v1050_v12 = vunpack.c.h.s8.bf16 %v906_v3  ;;  %v1042_v40 = vunpack.c.l.s8.bf16 %v906_v3 }
 0x37b   :  { %1387 = vmatpush2.bf16.msra.mxu0 %v1120_v33  ;;  %v970_v33 = vld [vmem:[#allocation9 + $0x260] sm:$0xff] }
 0x37c   :  { %1388 = vmatprep.subr.bf16.mxu0 %v1113_v34  ;;  %v1043_v34 = vunpack.c.l.s8.bf16 %v907_v25  ;;  %v1178_v36 = vunpack.c.h.s8.bf16 %v970_v33  ;;  %v1170_v39 = vunpack.c.l.s8.bf16 %v970_v33 }
 0x37d   :  { %1430 = vmatpush2.bf16.msra.mxu1 %v1248_v35  ;;  %v899_v35 = vld [vmem:[#allocation9 + $0x28] sm:$0xff] }
 0x37e   :  { %1431 = vmatprep.subr.bf16.mxu1 %v1241_v38  ;;  %v1171_v38 = vunpack.c.l.s8.bf16 %v971_v31 }
 0x37f   :  { %1389 = vmatpush2.bf16.msra.mxu0 %v1112_v10  ;;  %v963_v10 = vld [vmem:[#allocation9 + $0x228] sm:$0xff] }
 0x380   :  { %1390 = vmatprep.subr.bf16.mxu0 %v1105_v29  ;;  %v1035_v29 = vunpack.c.h.s8.bf16 %v899_v35 }
 0x381   :  { %1432 = vmatpush2.bf16.msra.mxu1 %v1240_v37  ;;  %v898_v37 = vld [vmem:[#allocation9 + $0x20] sm:$0xff] }
 0x382   :  { %1433 = vmatprep.subr.bf16.mxu1 %v1233_v41  ;;  %v1163_v41 = vunpack.c.h.s8.bf16 %v963_v10  ;;  %v1034_v43 = vunpack.c.h.s8.bf16 %v898_v37  ;;  %v1026_v28 = vunpack.c.l.s8.bf16 %v898_v37 }
 0x383   :  { %1391 = vmatpush2.bf16.msra.mxu0 %v1104_v42  ;;  %v962_v42 = vld [vmem:[#allocation9 + $0x220] sm:$0xff] }
 0x384   :  { %1392 = vmatprep.subr.bf16.mxu0 %v1097_v44  ;;  %v1027_v44 = vunpack.c.l.s8.bf16 %v899_v35  ;;  %v1162_v45 = vunpack.c.h.s8.bf16 %v962_v42  ;;  %v1154_v27 = vunpack.c.l.s8.bf16 %v962_v42 }
 0x385   :  { %1434 = vmatpush2.bf16.msra.mxu1 %v1232_v46  ;;  %v955_v46 = vld [vmem:[#allocation9 + $0x1e8] sm:$0xff] }
 0x386   :  { %1435 = vmatprep.subr.bf16.mxu1 %v1225_v18  ;;  %v1155_v18 = vunpack.c.l.s8.bf16 %v963_v10 }
 0x387   :  { %1393 = vmatpush2.bf16.msra.mxu0 %v1096_v47  ;;  %v1019_v47 = vld [vmem:[#allocation9 + $0x3e8] sm:$0xff] }
 0x388   :  { %1394 = vmatprep.subr.bf16.mxu0 %v1089_v17  ;;  %v1147_v17 = vunpack.c.h.s8.bf16 %v955_v46 }
 0x389   :  { %1436 = vmatpush2.bf16.msra.mxu1 %v1224_v48  ;;  %v954_v48 = vld [vmem:[#allocation9 + $0x1e0] sm:$0xff] }
 0x38a   :  { %1437 = vmatprep.subr.bf16.mxu1 %v1217_v49  ;;  %v1275_v49 = vunpack.c.h.s8.bf16 %v1019_v47  ;;  %v1146_v51 = vunpack.c.h.s8.bf16 %v954_v48  ;;  %v1138_v21 = vunpack.c.l.s8.bf16 %v954_v48 }
 0x38b   :  { %1395 = vmatpush2.bf16.msra.mxu0 %v1088_v50  ;;  %v1018_v50 = vld [vmem:[#allocation9 + $0x3e0] sm:$0xff] }
 0x38c   :  { %1450 = vmatprep.subr.bf16.mxu0 %v1083_v52  ;;  %v1139_v52 = vunpack.c.l.s8.bf16 %v955_v46  ;;  %v1274_v53 = vunpack.c.h.s8.bf16 %v1018_v50  ;;  %v1266_v58 = vunpack.c.l.s8.bf16 %v1018_v50 }
 0x38d   :  { %1438 = vmatpush2.bf16.msra.mxu1 %v1216_v54  ;;  %v947_v54 = vld [vmem:[#allocation9 + $0x1a8] sm:$0xff] }
 0x38e   :  { %1397 = vmatmul.mubr.bf16.vlgmr.msra.gmra.mxu0 %v2956_v14  ;;  %1493 = vmatprep.subr.bf16.mxu1 %v1211_v15  ;;  %v1267_v15 = vunpack.c.l.s8.bf16 %v1019_v47 }
 0x38f   :  { %1451 = vmatpush1.bf16.msra.mxu0 %v1082_v16  ;;  %1482 = vmatprep.mubr.bf16.mxu0 %v2951_v60  ;;  %v1011_v16 = vld [vmem:[#allocation9 + $0x3a8] sm:$0xff] }
 0x390   :  { %1440 = vmatmul.mubr.bf16.vlgmr.msra.gmra.mxu1 %v2961_v26  ;;  %1452 = vmatprep.subr.bf16.mxu0 %v1075_v22  ;;  %v1131_v22 = vunpack.c.h.s8.bf16 %v947_v54 }
 0x391   :  { %1494 = vmatpush1.bf16.msra.mxu1 %v1210_v56  ;;  %1525 = vmatprep.mubr.bf16.mxu1 %v2953_v2  ;;  %v946_v56 = vld [vmem:[#allocation9 + $0x1a0] sm:$0xff] }
 0x392   :  { %1495 = vmatprep.subr.bf16.mxu1 %v1203_v59  ;;  %v1259_v59 = vunpack.c.h.s8.bf16 %v1011_v16  ;;  %v1130_v62 = vunpack.c.h.s8.bf16 %v946_v56  ;;  %v1122_v19 = vunpack.c.l.s8.bf16 %v946_v56  ;;  %v909_v56 = vld [vmem:[#allocation9 + $0x78] sm:$0xff] }
 0x393   :  { %1453 = vmatpush1.bf16.msra.mxu0 %v1074_v61  ;;  %v1010_v61 = vld [vmem:[#allocation9 + $0x3a0] sm:$0xff] }
 0x394   :  { %1454 = vmatprep.subr.bf16.mxu0 %v1067_v1  ;;  %v1123_v1 = vunpack.c.l.s8.bf16 %v947_v54  ;;  %v1258_v6 = vunpack.c.h.s8.bf16 %v1010_v61  ;;  %v1250_v25 = vunpack.c.l.s8.bf16 %v1010_v61  ;;  %v973_v61 = vld [vmem:[#allocation9 + $0x278] sm:$0xff] }
 0x395   :  { %1496 = vmatpush1.bf16.msra.mxu1 %v1202_v7  ;;  %v939_v7 = vld [vmem:[#allocation9 + $0x168] sm:$0xff] }
 0x396   :  { %1497 = vmatprep.subr.bf16.mxu1 %v1195_v13  ;;  %v1251_v13 = vunpack.c.l.s8.bf16 %v1011_v16 }
 0x397   :  { %1455 = vmatpush1.bf16.msra.mxu0 %v1066_v20  ;;  %v1003_v20 = vld [vmem:[#allocation9 + $0x368] sm:$0xff] }
 0x398   :  { %1456 = vmatprep.subr.bf16.mxu0 %v1059_v23  ;;  %v1115_v23 = vunpack.c.h.s8.bf16 %v939_v7 }
 0x399   :  { %1498 = vmatpush1.bf16.msra.mxu1 %v1194_v24  ;;  %v938_v24 = vld [vmem:[#allocation9 + $0x160] sm:$0xff] }
 0x39a   :  { %1499 = vmatprep.subr.bf16.mxu1 %v1187_v4  ;;  %v1243_v4 = vunpack.c.h.s8.bf16 %v1003_v20  ;;  %v1114_v31 = vunpack.c.h.s8.bf16 %v938_v24  ;;  %v1106_v33 = vunpack.c.l.s8.bf16 %v938_v24  ;;  %v1173_v24 = vunpack.c.l.s8.bf16 %v973_v61 }
 0x39b   :  { %1457 = vmatpush1.bf16.msra.mxu0 %v1058_v30  ;;  %v1002_v30 = vld [vmem:[#allocation9 + $0x360] sm:$0xff] }
 0x39c   :  { %1458 = vmatprep.subr.bf16.mxu0 %v1051_v11  ;;  %v1107_v11 = vunpack.c.l.s8.bf16 %v939_v7  ;;  %v1242_v3 = vunpack.c.h.s8.bf16 %v1002_v30  ;;  %v1234_v35 = vunpack.c.l.s8.bf16 %v1002_v30  ;;  %v972_v7 = vld [vmem:[#allocation9 + $0x270] sm:$0xff] }
 0x39d   :  { %1500 = vmatpush1.bf16.msra.mxu1 %v1186_v5  ;;  %v931_v5 = vld [vmem:[#allocation9 + $0x128] sm:$0xff] }
 0x39e   :  { %1501 = vmatprep.subr.bf16.mxu1 %v1179_v32  ;;  %v1235_v32 = vunpack.c.l.s8.bf16 %v1003_v20  ;;  %v1180_v20 = vunpack.c.h.s8.bf16 %v972_v7 }
 0x39f   :  { %1459 = vmatpush1.bf16.msra.mxu0 %v1050_v12  ;;  %v995_v12 = vld [vmem:[#allocation9 + $0x328] sm:$0xff] }
 0x3a0   :  { %1460 = vmatprep.subr.bf16.mxu0 %v1043_v34  ;;  %v1099_v34 = vunpack.c.h.s8.bf16 %v931_v5 }
 0x3a1   :  { %1502 = vmatpush1.bf16.msra.mxu1 %v1178_v36  ;;  %v930_v36 = vld [vmem:[#allocation9 + $0x120] sm:$0xff] }
 0x3a2   :  { %1503 = vmatprep.subr.bf16.mxu1 %v1171_v38  ;;  %v1227_v38 = vunpack.c.h.s8.bf16 %v995_v12  ;;  %v1098_v10 = vunpack.c.h.s8.bf16 %v930_v36  ;;  %v1090_v42 = vunpack.c.l.s8.bf16 %v930_v36 }
 0x3a3   :  { %1461 = vmatpush1.bf16.msra.mxu0 %v1042_v40  ;;  %v994_v40 = vld [vmem:[#allocation9 + $0x320] sm:$0xff] }
 0x3a4   :  { %1462 = vmatprep.subr.bf16.mxu0 %v1035_v29  ;;  %v1091_v29 = vunpack.c.l.s8.bf16 %v931_v5  ;;  %v1226_v37 = vunpack.c.h.s8.bf16 %v994_v40  ;;  %v1218_v46 = vunpack.c.l.s8.bf16 %v994_v40  ;;  %v964_v5 = vld [vmem:[#allocation9 + $0x230] sm:$0xff] }
 0x3a5   :  { %1504 = vmatpush1.bf16.msra.mxu1 %v1170_v39  ;;  %v925_v39 = vld [vmem:[#allocation9 + $0xf8] sm:$0xff] }
 0x3a6   :  { %1505 = vmatprep.subr.bf16.mxu1 %v1163_v41  ;;  %v1219_v41 = vunpack.c.l.s8.bf16 %v995_v12  ;;  %v1164_v12 = vunpack.c.h.s8.bf16 %v964_v5 }
 0x3a7   :  { %1463 = vmatpush1.bf16.msra.mxu0 %v1034_v43  ;;  %v989_v43 = vld [vmem:[#allocation9 + $0x2f8] sm:$0xff] }
 0x3a8   :  { %1464 = vmatprep.subr.bf16.mxu0 %v1027_v44  ;;  %v1085_v44 = vunpack.c.h.s8.bf16 %v925_v39 }
 0x3a9   :  { %1506 = vmatpush1.bf16.msra.mxu1 %v1162_v45  ;;  %v924_v45 = vld [vmem:[#allocation9 + $0xf0] sm:$0xff] }
 0x3aa   :  { %1507 = vmatprep.subr.bf16.mxu1 %v1155_v18  ;;  %v1213_v18 = vunpack.c.h.s8.bf16 %v989_v43  ;;  %v1084_v47 = vunpack.c.h.s8.bf16 %v924_v45  ;;  %v1076_v50 = vunpack.c.l.s8.bf16 %v924_v45 }
 0x3ab   :  { %1465 = vmatpush1.bf16.msra.mxu0 %v1026_v28  ;;  %v988_v28 = vld [vmem:[#allocation9 + $0x2f0] sm:$0xff] }
 0x3ac   :  { %1466 = vmatprep.subr.bf16.mxu0 %v1147_v17  ;;  %v1077_v17 = vunpack.c.l.s8.bf16 %v925_v39  ;;  %v1212_v48 = vunpack.c.h.s8.bf16 %v988_v28  ;;  %v1204_v54 = vunpack.c.l.s8.bf16 %v988_v28  ;;  %v1020_v39 = vld [vmem:[#allocation9 + $0x3f0] sm:$0xff] }
 0x3ad   :  { %1508 = vmatpush1.bf16.msra.mxu1 %v1154_v27  ;;  %v917_v27 = vld [vmem:[#allocation9 + $0xb8] sm:$0xff] }
 0x3ae   :  { %1509 = vmatprep.subr.bf16.mxu1 %v1275_v49  ;;  %v1205_v49 = vunpack.c.l.s8.bf16 %v989_v43  ;;  %v1276_v43 = vunpack.c.h.s8.bf16 %v1020_v39 }
 0x3af   :  { %1467 = vmatpush2.bf16.msra.mxu0 %v1146_v51  ;;  %v981_v51 = vld [vmem:[#allocation9 + $0x2b8] sm:$0xff] }
 0x3b0   :  { %1468 = vmatprep.subr.bf16.mxu0 %v1139_v52  ;;  %v1069_v52 = vunpack.c.h.s8.bf16 %v917_v27 }
 0x3b1   :  { %1510 = vmatpush2.bf16.msra.mxu1 %v1274_v53  ;;  %v916_v53 = vld [vmem:[#allocation9 + $0xb0] sm:$0xff] }
 0x3b2   :  { %1511 = vmatprep.subr.bf16.mxu1 %v1267_v15  ;;  %v1197_v15 = vunpack.c.h.s8.bf16 %v981_v51  ;;  %v1068_v16 = vunpack.c.h.s8.bf16 %v916_v53 }
 0x3b3   :  { %1469 = vmatpush2.bf16.msra.mxu0 %v1138_v21  ;;  %v980_v21 = vld [vmem:[#allocation9 + $0x2b0] sm:$0xff] }
 0x3b4   :  { %1470 = vmatprep.subr.bf16.mxu0 %v1131_v22  ;;  %v1061_v22 = vunpack.c.l.s8.bf16 %v917_v27  ;;  %v1012_v27 = vld [vmem:[#allocation9 + $0x3b0] sm:$0xff] }
 0x3b5   :  { %1512 = vmatpush2.bf16.msra.mxu1 %v1266_v58  ;;  %v1189_v58 = vunpack.c.l.s8.bf16 %v981_v51  ;;  %v1260_v51 = vunpack.c.h.s8.bf16 %v1012_v27 }
 0x3b6   :  { %1513 = vmatprep.subr.bf16.mxu1 %v1259_v59  ;;  %v1060_v59 = vunpack.c.l.s8.bf16 %v916_v53 }
 0x3b7   :  { %1471 = vmatpush2.bf16.msra.mxu0 %v1130_v62  ;;  %v1053_v62 = vunpack.c.h.s8.bf16 %v909_v56 }
 0x3b8   :  { %1472 = vmatprep.subr.bf16.mxu0 %v1123_v1  ;;  %v908_v1 = vld [vmem:[#allocation9 + $0x70] sm:$0xff] }
 0x3b9   :  { %1514 = vmatpush2.bf16.msra.mxu1 %v1258_v6  ;;  %v1181_v6 = vunpack.c.h.s8.bf16 %v973_v61 }
 0x3ba   :  { %1515 = vmatprep.subr.bf16.mxu1 %v1251_v13  ;;  %v1052_v13 = vunpack.c.h.s8.bf16 %v908_v1 }
 0x3bb   :  { %1473 = vmatpush2.bf16.msra.mxu0 %v1122_v19  ;;  %v1045_v19 = vunpack.c.l.s8.bf16 %v909_v56  ;;  %v1004_v56 = vld [vmem:[#allocation9 + $0x370] sm:$0xff] }
 0x3bc   :  { %1474 = vmatprep.subr.bf16.mxu0 %v1115_v23  ;;  %v901_v23 = vld [vmem:[#allocation9 + $0x38] sm:$0xff]  ;;  %v1244_v61 = vunpack.c.h.s8.bf16 %v1004_v56 }
 0x3bd   :  { %1516 = vmatpush2.bf16.msra.mxu1 %v1250_v25  ;;  %v1044_v25 = vunpack.c.l.s8.bf16 %v908_v1  ;;  %v1037_v30 = vunpack.c.h.s8.bf16 %v901_v23 }
 0x3be   :  { %1517 = vmatprep.subr.bf16.mxu1 %v1243_v4  ;;  %v965_v4 = vld [vmem:[#allocation9 + $0x238] sm:$0xff] }
 0x3bf   :  { %1475 = vmatpush2.bf16.msra.mxu0 %v1114_v31  ;;  %v900_v31 = vld [vmem:[#allocation9 + $0x30] sm:$0xff]  ;;  %v1157_v36 = vunpack.c.l.s8.bf16 %v965_v4 }
 0x3c0   :  { %1476 = vmatprep.subr.bf16.mxu0 %v1107_v11  ;;  %v1172_v11 = vunpack.c.l.s8.bf16 %v972_v7 }
 0x3c1   :  { %1518 = vmatpush2.bf16.msra.mxu1 %v1242_v3  ;;  %v1165_v3 = vunpack.c.h.s8.bf16 %v965_v4 }
 0x3c2   :  { %1519 = vmatprep.subr.bf16.mxu1 %v1235_v32  ;;  %v1036_v32 = vunpack.c.h.s8.bf16 %v900_v31 }
 0x3c3   :  { %1477 = vmatpush2.bf16.msra.mxu0 %v1106_v33  ;;  %v1029_v33 = vunpack.c.l.s8.bf16 %v901_v23  ;;  %v996_v23 = vld [vmem:[#allocation9 + $0x330] sm:$0xff] }
 0x3c4   :  { %1478 = vmatprep.subr.bf16.mxu0 %v1099_v34  ;;  %v957_v34 = vld [vmem:[#allocation9 + $0x1f8] sm:$0xff]  ;;  %v1228_v4 = vunpack.c.h.s8.bf16 %v996_v23 }
 0x3c5   :  { %1520 = vmatpush2.bf16.msra.mxu1 %v1234_v35  ;;  %v1028_v35 = vunpack.c.l.s8.bf16 %v900_v31  ;;  %v1149_v40 = vunpack.c.h.s8.bf16 %v957_v34 }
 0x3c6   :  { %1521 = vmatprep.subr.bf16.mxu1 %v1227_v38  ;;  %v1021_v38 = vld [vmem:[#allocation9 + $0x3f8] sm:$0xff] }
 0x3c7   :  { %1479 = vmatpush2.bf16.msra.mxu0 %v1098_v10  ;;  %v956_v10 = vld [vmem:[#allocation9 + $0x1f0] sm:$0xff]  ;;  %v1269_v45 = vunpack.c.l.s8.bf16 %v1021_v38 }
 0x3c8   :  { %1480 = vmatprep.subr.bf16.mxu0 %v1091_v29  ;;  %v1156_v29 = vunpack.c.l.s8.bf16 %v964_v5  ;;  %v2117_v5 = vld [vmem:[#allocation10 + $0xb8] sm:$0xff] }
 0x3c9   :  { %1522 = vmatpush2.bf16.msra.mxu1 %v1226_v37  ;;  %v1277_v37 = vunpack.c.h.s8.bf16 %v1021_v38 }
 0x3ca   :  { %1523 = vmatprep.subr.bf16.mxu1 %v1219_v41  ;;  %v1148_v41 = vunpack.c.h.s8.bf16 %v956_v10 }
 0x3cb   :  { %1481 = vmatpush2.bf16.msra.mxu0 %v1090_v42  ;;  %v1141_v42 = vunpack.c.l.s8.bf16 %v957_v34  ;;  %v2116_v34 = vld [vmem:[#allocation10 + $0xb0] sm:$0xff] }
 0x3cc   :  { %1536 = vmatprep.subr.bf16.mxu0 %v1085_v44  ;;  %v949_v44 = vld [vmem:[#allocation9 + $0x1b8] sm:$0xff] }
 0x3cd   :  { %1524 = vmatpush2.bf16.msra.mxu1 %v1218_v46  ;;  %v1140_v46 = vunpack.c.l.s8.bf16 %v956_v10  ;;  %v1133_v28 = vunpack.c.h.s8.bf16 %v949_v44 }
 0x3ce   :  { %1483 = vmatmul.mubr.bf16.vlgmr.msra.gmra.mxu0 %v2956_v14  ;;  %1579 = vmatprep.subr.bf16.mxu1 %v1213_v18  ;;  %v1013_v18 = vld [vmem:[#allocation9 + $0x3b8] sm:$0xff] }
 0x3cf   :  { %1537 = vmatpush1.bf16.msra.mxu0 %v1084_v47  ;;  %1568 = vmatprep.mubr.bf16.mxu0 %v2951_v60  ;;  %v1196_v60 = vunpack.c.h.s8.bf16 %v980_v21  ;;  %v948_v47 = vld [vmem:[#allocation9 + $0x1b0] sm:$0xff]  ;;  %v1253_v53 = vunpack.c.l.s8.bf16 %v1013_v18 }
 0x3d0   :  { %1526 = vmatmul.mubr.bf16.vlgmr.msra.gmra.mxu1 %v2961_v26  ;;  %1538 = vmatprep.subr.bf16.mxu0 %v1077_v17  ;;  %v1268_v17 = vunpack.c.l.s8.bf16 %v1020_v39 }
 0x3d1   :  { %1580 = vmatpush1.bf16.msra.mxu1 %v1212_v48  ;;  %1611 = vmatprep.mubr.bf16.mxu1 %v2953_v2  ;;  %v1188_v2 = vunpack.c.l.s8.bf16 %v980_v21  ;;  %v1261_v48 = vunpack.c.h.s8.bf16 %v1013_v18 }
 0x3d2   :  { %1581 = vmatprep.subr.bf16.mxu1 %v1205_v49  ;;  %v1132_v49 = vunpack.c.h.s8.bf16 %v948_v47 }
 0x3d3   :  { %1539 = vmatpush1.bf16.msra.mxu0 %v1076_v50  ;;  %v1125_v50 = vunpack.c.l.s8.bf16 %v949_v44 }
 0x3d4   :  { %1540 = vmatprep.subr.bf16.mxu0 %v1069_v52  ;;  %v941_v52 = vld [vmem:[#allocation9 + $0x178] sm:$0xff] }
 0x3d5   :  { %1582 = vmatpush1.bf16.msra.mxu1 %v1204_v54  ;;  %v1124_v54 = vunpack.c.l.s8.bf16 %v948_v47  ;;  %v1117_v21 = vunpack.c.h.s8.bf16 %v941_v52  ;;  %v2097_v47 = vld [vmem:[#allocation10 + $0x18] sm:$0xff] }
 0x3d6   :  { %1583 = vmatprep.subr.bf16.mxu1 %v1197_v15  ;;  %v1005_v15 = vld [vmem:[#allocation9 + $0x378] sm:$0xff] }
 0x3d7   :  { %1541 = vmatpush1.bf16.msra.mxu0 %v1068_v16  ;;  %v940_v16 = vld [vmem:[#allocation9 + $0x170] sm:$0xff]  ;;  %v1237_v1 = vunpack.c.l.s8.bf16 %v1005_v15 }
 0x3d8   :  { %1542 = vmatprep.subr.bf16.mxu0 %v1061_v22  ;;  %v1252_v22 = vunpack.c.l.s8.bf16 %v1012_v27 }
 0x3d9   :  { %1584 = vmatpush1.bf16.msra.mxu1 %v1196_v60  ;;  %v1245_v60 = vunpack.c.h.s8.bf16 %v1005_v15 }
 0x3da   :  { %1585 = vmatprep.subr.bf16.mxu1 %v1189_v58  ;;  %v1116_v58 = vunpack.c.h.s8.bf16 %v940_v16 }
 0x3db   :  { %1543 = vmatpush1.bf16.msra.mxu0 %v1060_v59  ;;  %v1109_v59 = vunpack.c.l.s8.bf16 %v941_v52 }
 0x3dc   :  { %1544 = vmatprep.subr.bf16.mxu0 %v1053_v62  ;;  %v933_v62 = vld [vmem:[#allocation9 + $0x138] sm:$0xff] }
 0x3dd   :  { %1586 = vmatpush1.bf16.msra.mxu1 %v1188_v2  ;;  %v1108_v2 = vunpack.c.l.s8.bf16 %v940_v16  ;;  %v1101_v7 = vunpack.c.h.s8.bf16 %v933_v62  ;;  %v2095_v16 = vld [vmem:[#allocation10 + $0x8] sm:$0xff] }
 0x3de   :  { %1587 = vmatprep.subr.bf16.mxu1 %v1181_v6  ;;  %v997_v6 = vld [vmem:[#allocation9 + $0x338] sm:$0xff] }
 0x3df   :  { %1545 = vmatpush1.bf16.msra.mxu0 %v1052_v13  ;;  %v932_v13 = vld [vmem:[#allocation9 + $0x130] sm:$0xff] }
 0x3e0   :  { %1546 = vmatprep.subr.bf16.mxu0 %v1045_v19  ;;  %v1236_v19 = vunpack.c.l.s8.bf16 %v1004_v56  ;;  %v1092_v31 = vunpack.c.l.s8.bf16 %v932_v13 }
 0x3e1   :  { %1588 = vmatpush1.bf16.msra.mxu1 %v1180_v20  ;;  %v1229_v20 = vunpack.c.h.s8.bf16 %v997_v6 }
 0x3e2   :  { %1589 = vmatprep.subr.bf16.mxu1 %v1173_v24  ;;  %v1100_v24 = vunpack.c.h.s8.bf16 %v932_v13  ;;  %v2109_v13 = vld [vmem:[#allocation10 + $0x78] sm:$0xff] }
 0x3e3   :  { %1547 = vmatpush1.bf16.msra.mxu0 %v1044_v25  ;;  %v1093_v25 = vunpack.c.l.s8.bf16 %v933_v62 }
 0x3e4   :  { %1548 = vmatprep.subr.bf16.mxu0 %v1037_v30  ;;  %v1221_v30 = vunpack.c.l.s8.bf16 %v997_v6 }
 0x3e5   :  { %1590 = vmatpush1.bf16.msra.mxu1 %v1172_v11  ;;  %v1220_v11 = vunpack.c.l.s8.bf16 %v996_v23 }
 0x3e6   :  { %1591 = vmatprep.subr.bf16.mxu1 %v1165_v3  ;;  %v2101_v3 = vld [vmem:[#allocation10 + $0x38] sm:$0xff] }
 0x3e7   :  { %1549 = vmatpush1.bf16.msra.mxu0 %v1036_v32  ;;  %v2173_v32 = vunpack.c.h.s8.bf16 %v2101_v3  ;;  %v2171_v38 = vunpack.c.l.s8.bf16 %v2101_v3 }
 0x3e8   :  { %1550 = vmatprep.subr.bf16.mxu0 %v1029_v33  ;;  %v2205_v33 = vunpack.c.h.s8.bf16 %v2117_v5 }
 0x3e9   :  { %1592 = vmatpush1.bf16.msra.mxu1 %v1164_v12  ;;  %v2100_v12 = vld [vmem:[#allocation10 + $0x30] sm:$0xff] }
 0x3ea   :  { %1593 = vmatprep.subr.bf16.mxu1 %v1157_v36  ;;  %v2172_v36 = vunpack.c.h.s8.bf16 %v2100_v12  ;;  %v2170_v10 = vunpack.c.l.s8.bf16 %v2100_v12 }
 0x3eb   :  { %1551 = vmatpush1.bf16.msra.mxu0 %v1028_v35  ;;  %v2204_v35 = vunpack.c.h.s8.bf16 %v2116_v34 }
 0x3ec   :  { %1552 = vmatprep.subr.bf16.mxu0 %v1149_v40  ;;  %v2203_v40 = vunpack.c.l.s8.bf16 %v2117_v5 }
 0x3ed   :  { %1594 = vmatpush1.bf16.msra.mxu1 %v1156_v29  ;;  %v2202_v29 = vunpack.c.l.s8.bf16 %v2116_v34 }
 0x3ee   :  { %1595 = vmatprep.subr.bf16.mxu1 %v1277_v37 }
 0x3ef   :  { %1553 = vmatpush2.bf16.msra.mxu0 %v1148_v41  ;;  %v2098_v41 = vld [vmem:[#allocation10 + $0x20] sm:$0xff] }
 0x3f0   :  { %1554 = vmatprep.subr.bf16.mxu0 %v1141_v42  ;;  %v2114_v42 = vld [vmem:[#allocation10 + $0xa0] sm:$0xff]  ;;  %v2166_v18 = vunpack.c.l.s8.bf16 %v2098_v41 }
 0x3f1   :  { %1596 = vmatpush2.bf16.msra.mxu1 %v1276_v43  ;;  %v2168_v43 = vunpack.c.h.s8.bf16 %v2098_v41  ;;  %v2200_v44 = vunpack.c.h.s8.bf16 %v2114_v42 }
 0x3f2   :  { %1597 = vmatprep.subr.bf16.mxu1 %v1269_v45 }
 0x3f3   :  { %1555 = vmatpush2.bf16.msra.mxu0 %v1140_v46 }
 0x3f4   :  { %1556 = vmatprep.subr.bf16.mxu0 %v1133_v28  ;;  %v2198_v28 = vunpack.c.l.s8.bf16 %v2114_v42 }
 0x3f5   :  { %1598 = vmatpush2.bf16.msra.mxu1 %v1268_v17  ;;  %v2113_v17 = vld [vmem:[#allocation10 + $0x98] sm:$0xff] }
 0x3f6   :  { %1599 = vmatprep.subr.bf16.mxu1 %v1261_v48  ;;  %v2165_v48 = vunpack.c.h.s8.bf16 %v2097_v47  ;;  %v2197_v27 = vunpack.c.h.s8.bf16 %v2113_v17 }
 0x3f7   :  { %1557 = vmatpush2.bf16.msra.mxu0 %v1132_v49  ;;  %v2096_v49 = vld [vmem:[#allocation10 + $0x10] sm:$0xff] }
 0x3f8   :  { %1558 = vmatprep.subr.bf16.mxu0 %v1125_v50  ;;  %v2112_v50 = vld [vmem:[#allocation10 + $0x90] sm:$0xff]  ;;  %v2162_v15 = vunpack.c.l.s8.bf16 %v2096_v49 }
 0x3f9   :  { %1600 = vmatpush2.bf16.msra.mxu1 %v1260_v51  ;;  %v2164_v51 = vunpack.c.h.s8.bf16 %v2096_v49  ;;  %v2196_v52 = vunpack.c.h.s8.bf16 %v2112_v50 }
 0x3fa   :  { %1601 = vmatprep.subr.bf16.mxu1 %v1253_v53  ;;  %v2163_v53 = vunpack.c.l.s8.bf16 %v2097_v47 }
 0x3fb   :  { %1559 = vmatpush2.bf16.msra.mxu0 %v1124_v54  ;;  %v2195_v54 = vunpack.c.l.s8.bf16 %v2113_v17 }
 0x3fc   :  { %1560 = vmatprep.subr.bf16.mxu0 %v1117_v21  ;;  %v2194_v21 = vunpack.c.l.s8.bf16 %v2112_v50 }
 0x3fd   :  { %1602 = vmatpush2.bf16.msra.mxu1 %v1252_v22  ;;  %v2111_v22 = vld [vmem:[#allocation10 + $0x88] sm:$0xff] }
 0x3fe   :  { %1603 = vmatprep.subr.bf16.mxu1 %v1245_v60  ;;  %v2161_v60 = vunpack.c.h.s8.bf16 %v2095_v16  ;;  %v2193_v56 = vunpack.c.h.s8.bf16 %v2111_v22 }
 0x3ff   :  { %1561 = vmatpush2.bf16.msra.mxu0 %v1116_v58  ;;  %v2094_v58 = vld [vmem:[#allocation10] sm:$0xff] }
 0x400   :  { %1562 = vmatprep.subr.bf16.mxu0 %v1109_v59  ;;  %v2110_v59 = vld [vmem:[#allocation10 + $0x80] sm:$0xff]  ;;  %v2158_v6 = vunpack.c.l.s8.bf16 %v2094_v58 }
 0x401   :  { %1604 = vmatpush2.bf16.msra.mxu1 %v1244_v61  ;;  %v2160_v61 = vunpack.c.h.s8.bf16 %v2094_v58  ;;  %v2192_v62 = vunpack.c.h.s8.bf16 %v2110_v59 }
 0x402   :  { %1605 = vmatprep.subr.bf16.mxu1 %v1237_v1  ;;  %v2159_v1 = vunpack.c.l.s8.bf16 %v2095_v16 }
 0x403   :  { %1563 = vmatpush2.bf16.msra.mxu0 %v1108_v2  ;;  %v2191_v2 = vunpack.c.l.s8.bf16 %v2111_v22 }
 0x404   :  { %1564 = vmatprep.subr.bf16.mxu0 %v1101_v7  ;;  %v2190_v7 = vunpack.c.l.s8.bf16 %v2110_v59 }
 0x405   :  { %1606 = vmatpush2.bf16.msra.mxu1 %v1236_v19  ;;  %v2125_v19 = vld [vmem:[#allocation10 + $0xf8] sm:$0xff] }
 0x406   :  { %1607 = vmatprep.subr.bf16.mxu1 %v1229_v20  ;;  %v2189_v20 = vunpack.c.h.s8.bf16 %v2109_v13  ;;  %v2221_v23 = vunpack.c.h.s8.bf16 %v2125_v19 }
 0x407   :  { %1565 = vmatpush2.bf16.msra.mxu0 %v1100_v24  ;;  %v2108_v24 = vld [vmem:[#allocation10 + $0x70] sm:$0xff] }
 0x408   :  { %1566 = vmatprep.subr.bf16.mxu0 %v1093_v25  ;;  %v2124_v25 = vld [vmem:[#allocation10 + $0xf0] sm:$0xff]  ;;  %v2186_v3 = vunpack.c.l.s8.bf16 %v2108_v24 }
 0x409   :  { %1608 = vmatpush2.bf16.msra.mxu1 %v1228_v4  ;;  %v2188_v4 = vunpack.c.h.s8.bf16 %v2108_v24  ;;  %v2218_v5 = vunpack.c.l.s8.bf16 %v2124_v25 }
 0x40a   :  { %1609 = vmatprep.subr.bf16.mxu1 %v1221_v30  ;;  %v2220_v30 = vunpack.c.h.s8.bf16 %v2124_v25 }
 0x40b   :  { %1567 = vmatpush2.bf16.msra.mxu0 %v1092_v31  ;;  %v2187_v31 = vunpack.c.l.s8.bf16 %v2109_v13 }
 0x40c   :  { %2286 = vmatprep.subr.bf16.mxu0 %v2173_v32  ;;  %v2107_v32 = vld [vmem:[#allocation10 + $0x68] sm:$0xff] }
 0x40d   :  { %1610 = vmatpush2.bf16.msra.mxu1 %v1220_v11  ;;  %v2219_v11 = vunpack.c.l.s8.bf16 %v2125_v19  ;;  %v2185_v12 = vunpack.c.h.s8.bf16 %v2107_v32 }
 0x40e   :  { %1569 = vmatmul.mubr.bf16.vlgmr.msra.gmra.mxu0 %v2956_v14  ;;  %2329 = vmatprep.subr.bf16.mxu1 %v2205_v33  ;;  %v2099_v14 = vld [vmem:[#allocation10 + $0x28] sm:$0xff] }
 0x40f   :  { %2287 = vmatpush1.bf16.msra.mxu0 %v2172_v36  ;;  %v2169_v37 = vunpack.c.h.s8.bf16 %v2099_v14  ;;  %v2167_v45 = vunpack.c.l.s8.bf16 %v2099_v14  ;;  %v2123_v33 = vld [vmem:[#allocation10 + $0xe8] sm:$0xff]  ;;  %v2106_v36 = vld [vmem:[#allocation10 + $0x60] sm:$0xff]  ;;  %v2183_v14 = vunpack.c.l.s8.bf16 %v2107_v32 }
 0x410   :  { %1612 = vmatmul.mubr.bf16.vlgmr.msra.gmra.mxu1 %v2961_v26  ;;  %2288 = vmatprep.subr.bf16.mxu0 %v2171_v38  ;;  %v2115_v26 = vld [vmem:[#allocation10 + $0xa8] sm:$0xff]  ;;  %v2217_v34 = vunpack.c.h.s8.bf16 %v2123_v33  ;;  %v2184_v38 = vunpack.c.h.s8.bf16 %v2106_v36 }
 0x411   :  { %2330 = vmatpush1.bf16.msra.mxu1 %v2204_v35  ;;  %v2201_v39 = vunpack.c.h.s8.bf16 %v2115_v26  ;;  %v2199_v46 = vunpack.c.l.s8.bf16 %v2115_v26  ;;  %v2122_v35 = vld [vmem:[#allocation10 + $0xe0] sm:$0xff]  ;;  %v2215_v26 = vunpack.c.l.s8.bf16 %v2123_v33 }
 0x412   :  { %2331 = vmatprep.subr.bf16.mxu1 %v2203_v40  ;;  %v2216_v40 = vunpack.c.h.s8.bf16 %v2122_v35 }
 0x413   :  { %2289 = vmatpush1.bf16.msra.mxu0 %v2170_v10  ;;  %v2978_v10 = vpop.f32.mrf.mxu0 }
 0x414   :  { %2290 = vmatprep.subr.bf16.mxu0 %v2169_v37  ;;  %v2182_v37 = vunpack.c.l.s8.bf16 %v2106_v36 }
 0x415   :  { %2332 = vmatpush1.bf16.msra.mxu1 %v2202_v29  ;;  %v2980_v29 = vpop.f32.mrf.mxu1  ;;  %v2982_v41 = vpop.f32.mrf.mxu0 }
 0x416   :  { %2333 = vmatprep.subr.bf16.mxu1 %v2201_v39  ;;  %v2214_v39 = vunpack.c.l.s8.bf16 %v2122_v35  ;;  %v2996_v33 = vadd.f32 %v2980_v29, %v2978_v10 }
 0x417   :  { %2291 = vmatpush1.bf16.msra.mxu0 %v2168_v43  ;;  %v2984_v42 = vpop.f32.mrf.mxu1  ;;  %v2105_v43 = vld [vmem:[#allocation10 + $0x58] sm:$0xff] }
 0x418   :  { %2292 = vmatprep.subr.bf16.mxu0 %v2167_v45  ;;  %v2181_v45 = vunpack.c.h.s8.bf16 %v2105_v43  ;;  %v2179_v49 = vunpack.c.l.s8.bf16 %v2105_v43  ;;  %v3002_v35 = vadd.f32 %v2984_v42, %v2982_v41 }
 0x419   :  { %2334 = vmatpush1.bf16.msra.mxu1 %v2200_v44  ;;  %v2121_v44 = vld [vmem:[#allocation10 + $0xd8] sm:$0xff] }
 0x41a   :  { %2335 = vmatprep.subr.bf16.mxu1 %v2199_v46  ;;  %v2213_v46 = vunpack.c.h.s8.bf16 %v2121_v44  ;;  %v2211_v50 = vunpack.c.l.s8.bf16 %v2121_v44 }
 0x41b   :  { %2293 = vmatpush1.bf16.msra.mxu0 %v2166_v18  ;;  %v2104_v18 = vld [vmem:[#allocation10 + $0x50] sm:$0xff] }
 0x41c   :  { %2294 = vmatprep.subr.bf16.mxu0 %v2165_v48  ;;  %v2180_v47 = vunpack.c.h.s8.bf16 %v2104_v18  ;;  %v1316_v48 = vpop.f32.mrf.mxu0 }
 0x41d   :  { %2336 = vmatpush1.bf16.msra.mxu1 %v2198_v28  ;;  %v2120_v28 = vld [vmem:[#allocation10 + $0xd0] sm:$0xff] }
 0x41e   :  { %2337 = vmatprep.subr.bf16.mxu1 %v2197_v27  ;;  %v2212_v17 = vunpack.c.h.s8.bf16 %v2120_v28  ;;  %v1359_v27 = vpop.f32.mrf.mxu1 }
 0x41f   :  { %2295 = vmatpush1.bf16.msra.mxu0 %v2164_v51  ;;  %v2178_v51 = vunpack.c.l.s8.bf16 %v2104_v18  ;;  %v2992_v32 = vadd.f32 %v1359_v27, %v1316_v48 }
 0x420   :  { %2296 = vmatprep.subr.bf16.mxu0 %v2163_v53  ;;  %v1318_v53 = vpop.f32.mrf.mxu0 }
 0x421   :  { %2338 = vmatpush1.bf16.msra.mxu1 %v2196_v52  ;;  %v2210_v52 = vunpack.c.l.s8.bf16 %v2120_v28  ;;  %v1625_v41 = vadd.f32 %v2992_v32, %v2996_v33 }
 0x422   :  { %2339 = vmatprep.subr.bf16.mxu1 %v2195_v54  ;;  %v1361_v54 = vpop.f32.mrf.mxu1 }
 0x423   :  { %2297 = vmatpush1.bf16.msra.mxu0 %v2162_v15  ;;  %v2103_v15 = vld [vmem:[#allocation10 + $0x48] sm:$0xff] }
 0x424   :  { %2298 = vmatprep.subr.bf16.mxu0 %v2161_v60  ;;  %v2177_v16 = vunpack.c.h.s8.bf16 %v2103_v15  ;;  %v2102_v60 = vld [vmem:[#allocation10 + $0x40] sm:$0xff] }
 0x425   :  { %2340 = vmatpush1.bf16.msra.mxu1 %v2194_v21  ;;  %v2119_v21 = vld [vmem:[#allocation10 + $0xc8] sm:$0xff] }
 0x426   :  { %2341 = vmatprep.subr.bf16.mxu1 %v2193_v56  ;;  %v2209_v22 = vunpack.c.h.s8.bf16 %v2119_v21  ;;  %v2118_v56 = vld [vmem:[#allocation10 + $0xc0] sm:$0xff] }
 0x427   :  { %2299 = vmatpush1.bf16.msra.mxu0 %v2160_v61  ;;  %v2176_v61 = vunpack.c.h.s8.bf16 %v2102_v60 }
 0x428   :  { %2300 = vmatprep.subr.bf16.mxu0 %v2159_v1  ;;  %v2175_v1 = vunpack.c.l.s8.bf16 %v2103_v15 }
 0x429   :  { %2342 = vmatpush1.bf16.msra.mxu1 %v2192_v62  ;;  %v2208_v62 = vunpack.c.h.s8.bf16 %v2118_v56 }
 0x42a   :  { %2343 = vmatprep.subr.bf16.mxu1 %v2191_v2  ;;  %v2207_v2 = vunpack.c.l.s8.bf16 %v2119_v21 }
 0x42b   :  { %2301 = vmatpush1.bf16.msra.mxu0 %v2158_v6  ;;  %v2174_v6 = vunpack.c.l.s8.bf16 %v2102_v60 }
 0x42c   :  { %2302 = vmatprep.subr.bf16.mxu0 %v2189_v20  ;;  %v2986_v20 = vld [vmem:[#allocation10 + $0x138] sm:$0xff] }
 0x42d   :  { %2344 = vmatpush1.bf16.msra.mxu1 %v2190_v7  ;;  %v2206_v7 = vunpack.c.l.s8.bf16 %v2118_v56 }
 0x42e   :  { %2345 = vmatprep.subr.bf16.mxu1 %v2221_v23  ;;  %v2988_v23 = vld [vmem:[#allocation10 + $0x1b8] sm:$0xff] }
 0x42f   :  { %2303 = vmatpush2.bf16.msra.mxu0 %v2188_v4  ;;  %v2237_v4 = vunpack.c.h.s8.bf16 %v2986_v20 }
 0x430   :  { %2304 = vmatprep.subr.bf16.mxu0 %v2187_v31 }
 0x431   :  { %2346 = vmatpush2.bf16.msra.mxu1 %v2220_v30  ;;  %v2269_v30 = vunpack.c.h.s8.bf16 %v2988_v23 }
 0x432   :  { %2347 = vmatprep.subr.bf16.mxu1 %v2219_v11 }
 0x433   :  { %2305 = vmatpush2.bf16.msra.mxu0 %v2186_v3 }
 0x434   :  { %2306 = vmatprep.subr.bf16.mxu0 %v2185_v12  ;;  %v2998_v12 = vadd.f32 %v1361_v54, %v1318_v53 }
 0x435   :  { %2348 = vmatpush2.bf16.msra.mxu1 %v2218_v5 }
 0x436   :  { %2349 = vmatprep.subr.bf16.mxu1 %v2217_v34  ;;  %v1698_v10 = vmul.f32 %v2998_v12, %v2998_v12 }
 0x437   :  { %2307 = vmatpush2.bf16.msra.mxu0 %v2184_v38  ;;  %v1697_v38 = vmul.f32 %v2992_v32, %v2992_v32 }
 0x438   :  { %2308 = vmatprep.subr.bf16.mxu0 %v2183_v14  ;;  %v1632_v14 = vadd.f32 %v2998_v12, %v3002_v35 }
 0x439   :  { %2350 = vmatpush2.bf16.msra.mxu1 %v2216_v40  ;;  %v1689_v40 = vmul.f32 %v2996_v33, %v2996_v33 }
 0x43a   :  { %2351 = vmatprep.subr.bf16.mxu1 %v2215_v26  ;;  %v1633_v44 = vrot.slane %v1632_v14, 4 }
 0x43b   :  { %2309 = vmatpush2.bf16.msra.mxu0 %v2182_v37  ;;  %v1705_v42 = vadd.f32 %v1697_v38, %v1689_v40 }
 0x43c   :  { %2310 = vmatprep.subr.bf16.mxu0 %v2181_v45 }
 0x43d   :  { %2352 = vmatpush2.bf16.msra.mxu1 %v2214_v39  ;;  %v1690_v39 = vmul.f32 %v3002_v35, %v3002_v35  ;;  %v1706_v48 = vrot.slane %v1705_v42, 4 }
 0x43e   :  { %2353 = vmatprep.subr.bf16.mxu1 %v2213_v46 }
 0x43f   :  { %2311 = vmatpush2.bf16.msra.mxu0 %v2180_v47  ;;  %v1712_v45 = vadd.f32 %v1698_v10, %v1690_v39  ;;  %v1707_v56 = vadd.f32 %v1706_v48, %v1705_v42 }
 0x440   :  { %2312 = vmatprep.subr.bf16.mxu0 %v2179_v49 }
 0x441   :  { %2354 = vmatpush2.bf16.msra.mxu1 %v2212_v17  ;;  %v1626_v17 = vrot.slane %v1625_v41, 4 }
 0x442   :  { %2355 = vmatprep.subr.bf16.mxu1 %v2211_v50 }
 0x443   :  { %2313 = vmatpush2.bf16.msra.mxu0 %v2178_v51  ;;  %v1634_v51 = vadd.f32 %v1633_v44, %v1632_v14  ;;  %v1627_v60 = vadd.f32 %v1626_v17, %v1625_v41 }
 0x444   :  { %2314 = vmatprep.subr.bf16.mxu0 %v2177_v16 }
 0x445   :  { %2356 = vmatpush2.bf16.msra.mxu1 %v2210_v52  ;;  %v1713_v52 = vrot.slane %v1712_v45, 4 }
 0x446   :  { %2357 = vmatprep.subr.bf16.mxu1 %v2209_v22 }
 0x447   :  { %2315 = vmatpush2.bf16.msra.mxu0 %v2176_v61 }
 0x448   :  { %2316 = vmatprep.subr.bf16.mxu0 %v2175_v1 }
 0x449   :  { %2358 = vmatpush2.bf16.msra.mxu1 %v2208_v62 }
 0x44a   :  { %2359 = vmatprep.subr.bf16.mxu1 %v2207_v2  ;;  %v1635_v2 = vrot.slane %v1634_v51, 2 }
 0x44b   :  { %2317 = vmatpush2.bf16.msra.mxu0 %v2174_v6  ;;  %v1714_v6 = vadd.f32 %v1713_v52, %v1712_v45 }
 0x44c   :  { %2372 = vmatprep.subr.bf16.mxu0 %v2237_v4 }
 0x44d   :  { %2360 = vmatpush2.bf16.msra.mxu1 %v2206_v7  ;;  %v1715_v38 = vrot.slane %v1714_v6, 2 }
 0x44e   :  { %v1398_v58 = vpop.f32.mrf.mxu0  ;;  %2415 = vmatprep.subr.bf16.mxu1 %v2269_v30  ;;  %v1628_v30 = vrot.slane %v1627_v60, 2 }
 0x450   :  { %v1441_v59 = vpop.f32.mrf.mxu1  ;;  %v1400_v13 = vpop.f32.mrf.mxu0  ;;  %v1629_v39 = vadd.f32 %v1628_v30, %v1627_v60 }
 0x451   :  { %v3024_v27 = vadd.f32 %v1441_v59, %v1398_v58 }
 0x452   :  { %v1443_v19 = vpop.f32.mrf.mxu1  ;;  %v1402_v24 = vpop.f32.mrf.mxu0 }
 0x453   :  { %v3018_v43 = vadd.f32 %v1443_v19, %v1400_v13  ;;  %v1691_v58 = vmul.f32 %v3024_v27, %v3024_v27 }
 0x454   :  { %v1445_v25 = vpop.f32.mrf.mxu1  ;;  %v1404_v31 = vpop.f32.mrf.mxu0 }
 0x455   :  { %v3020_v46 = vadd.f32 %v1445_v25, %v1402_v24  ;;  %v1692_v15 = vmul.f32 %v3018_v43, %v3018_v43 }
 0x456   :  { %v1447_v11 = vpop.f32.mrf.mxu1 }
 0x457   :  { %v3012_v37 = vadd.f32 %v1447_v11, %v1404_v31  ;;  %v1639_v53 = vadd.f32 %v3020_v46, %v3024_v27  ;;  %v1699_v54 = vmul.f32 %v3020_v46, %v3020_v46  ;;  %v1708_v31 = vrot.slane %v1707_v56, 2 }
 0x459   :  { %v1646_v47 = vadd.f32 %v3012_v37, %v3018_v43  ;;  %v1700_v49 = vmul.f32 %v3012_v37, %v3012_v37  ;;  %v1640_v7 = vrot.slane %v1639_v53, 4  ;;  %v1719_v13 = vadd.f32 %v1699_v54, %v1691_v58 }
 0x45a   :  { %v1709_v41 = vadd.f32 %v1708_v31, %v1707_v56  ;;  %v1630_v54 = vrot.slane %v1629_v39, 1 }
 0x45b   :  { %v1647_v21 = vrot.slane %v1646_v47, 4  ;;  %v1726_v59 = vadd.f32 %v1700_v49, %v1692_v15  ;;  %v1641_v40 = vadd.f32 %v1640_v7, %v1639_v53  ;;  %v1720_v14 = vrot.slane %v1719_v13, 4 }
 0x45d   :  { %v1648_v19 = vadd.f32 %v1647_v21, %v1646_v47  ;;  %v1727_v11 = vrot.slane %v1726_v59, 4  ;;  %v1642_v47 = vrot.slane %v1641_v40, 2  ;;  %v1721_v17 = vadd.f32 %v1720_v14, %v1719_v13 }
 0x45f   :  { %v1649_v10 = vrot.slane %v1648_v19, 2  ;;  %v1728_v42 = vadd.f32 %v1727_v11, %v1726_v59  ;;  %v1722_v60 = vrot.slane %v1721_v17, 2 }
 0x461   :  { %v1650_v48 = vadd.f32 %v1649_v10, %v1648_v19  ;;  %v1729_v15 = vrot.slane %v1728_v42, 2 }
 0x463   :  { %v1651_v56 = vrot.slane %v1650_v48, 1 }
 0x48e   :  { %v1484_v3 = vpop.f32.mrf.mxu0 }
 0x490   :  { %v1527_v5 = vpop.f32.mrf.mxu1  ;;  %v1486_v34 = vpop.f32.mrf.mxu0 }
 0x491   :  { %v3042_v61 = vadd.f32 %v1527_v5, %v1484_v3 }
 0x492   :  { %v1529_v36 = vpop.f32.mrf.mxu1  ;;  %v1488_v29 = vpop.f32.mrf.mxu0 }
 0x493   :  { %v3036_v16 = vadd.f32 %v1529_v36, %v1486_v34  ;;  %v1693_v3 = vmul.f32 %v3042_v61, %v3042_v61  ;;  %v1636_v36 = vadd.f32 %v1635_v2, %v1634_v51  ;;  %v1710_v51 = vrot.slane %v1709_v41, 1 }
 0x494   :  { %v1531_v26 = vpop.f32.mrf.mxu1  ;;  %v1490_v18 = vpop.f32.mrf.mxu0  ;;  %v1643_v2 = vadd.f32 %v1642_v47, %v1641_v40 }
 0x495   :  { %v3038_v22 = vadd.f32 %v1531_v26, %v1488_v29  ;;  %v1694_v24 = vmul.f32 %v3036_v16, %v3036_v16 }
 0x496   :  { %v1533_v28 = vpop.f32.mrf.mxu1 }
 0x497   :  { %v3028_v50 = vadd.f32 %v1533_v28, %v1490_v18  ;;  %v1653_v25 = vadd.f32 %v3038_v22, %v3042_v61  ;;  %v1701_v4 = vmul.f32 %v3038_v22, %v3038_v22  ;;  %v1637_v18 = vrot.slane %v1636_v36, 1 }
 0x498   :  { %v1716_v28 = vadd.f32 %v1715_v38, %v1714_v6  ;;  %v1711_v6 = vadd.f32 %v1710_v51, %v1709_v41 }
 0x499   :  { %v1660_v62 = vadd.f32 %v3028_v50, %v3036_v16  ;;  %v1702_v1 = vmul.f32 %v3028_v50, %v3028_v50  ;;  %v1654_v29 = vrot.slane %v1653_v25, 4  ;;  %v1733_v26 = vadd.f32 %v1701_v4, %v1693_v3 }
 0x49a   :  { %v1638_v58 = vadd.f32 %v1637_v18, %v1636_v36  ;;  %v1730_v4 = vadd.f32 %v1729_v15, %v1728_v42  ;;  %v1644_v3 = vrot.slane %v1643_v2, 1 }
 0x49b   :  { %v1661_v5 = vrot.slane %v1660_v62, 4  ;;  %v1740_v34 = vadd.f32 %v1702_v1, %v1694_v24  ;;  %v1655_v49 = vadd.f32 %v1654_v29, %v1653_v25  ;;  %v1734_v52 = vrot.slane %v1733_v26, 4 }
 0x49c   :  { %v1717_v1 = vrot.slane %v1716_v28, 1  ;;  %v1631_v24 = vadd.f32 %v1630_v54, %v1629_v39  ;;  %v3056_v31 = vmul.f32 0.0625, %v1638_v58  ;;  %v3060_v29 = vmul.f32 0.0625, %v1711_v6 }
 0x49d   :  { %v1662_v44 = vadd.f32 %v1661_v5, %v1660_v62  ;;  %v1741_v45 = vrot.slane %v1740_v34, 4  ;;  %v1656_v59 = vrot.slane %v1655_v49, 2  ;;  %v1735_v62 = vadd.f32 %v1734_v52, %v1733_v26 }
 0x49e   :  { %v1718_v11 = vadd.f32 %v1717_v1, %v1716_v28  ;;  %v1723_v5 = vadd.f32 %v1722_v60, %v1721_v17  ;;  %v3058_v10 = vmul.f32 0.0625, %v1631_v24  ;;  %v1731_v39 = vrot.slane %v1730_v4, 1 }
 0x49f   :  { %v1663_v53 = vrot.slane %v1662_v44, 2  ;;  %v1742_v21 = vadd.f32 %v1741_v45, %v1740_v34  ;;  %v1652_v34 = vadd.f32 %v1651_v56, %v1650_v48  ;;  %v1657_v36 = vadd.f32 %v1656_v59, %v1655_v49 }
 0x4a0   :  { %v1736_v38 = vrot.slane %v1735_v62, 2  ;;  %v3066_v28 = vmul.f32 0.0625, %v1718_v11  ;;  %v3070_v47 = vmul.f32 %v3056_v31, %v3056_v31  ;;  %v1645_v17 = vadd.f32 %v1644_v3, %v1643_v2 }
 0x4a1   :  { %v1664_v13 = vadd.f32 %v1663_v53, %v1662_v44  ;;  %v1743_v19 = vrot.slane %v1742_v21, 2  ;;  %v1724_v49 = vrot.slane %v1723_v5, 1  ;;  %v3074_v52 = vmul.f32 0.0625, %v1652_v34 }
 0x4a2   :  { %v1658_v54 = vrot.slane %v1657_v36, 1  ;;  %v1737_v51 = vadd.f32 %v1736_v38, %v1735_v62  ;;  %v1732_v2 = vadd.f32 %v1731_v39, %v1730_v4 }
 0x4a3   :  { %v1665_v41 = vrot.slane %v1664_v13, 1  ;;  %v1744_v42 = vadd.f32 %v1743_v19, %v1742_v21  ;;  %v3090_v19 = vmul.f32 0.0625, %v1645_v17 }
 0x4a4   :  { %v1738_v11 = vrot.slane %v1737_v51, 1  ;;  %v1764_v38 = vmul.f32 0.0625, %v1732_v2  ;;  %v1769_v2 = vmul.f32 %v3058_v10, %v3058_v10 }
 0x4a5   :  { %v1666_v60 = vadd.f32 %v1665_v41, %v1664_v13  ;;  %v1745_v56 = vrot.slane %v1744_v42, 1 }
 0x4a7   :  { %v1746_v39 = vadd.f32 %v1745_v56, %v1744_v42 }
 0x4a9   :  { %v1766_v42 = vmul.f32 0.0625, %v1746_v39 }
 0x4ce   :  { %v1570_v7 = vpop.f32.mrf.mxu0 }
 0x4d0   :  { %v1613_v25 = vpop.f32.mrf.mxu1  ;;  %v1572_v30 = vpop.f32.mrf.mxu0 }
 0x4d1   :  { %v3062_v26 = vadd.f32 %v1613_v25, %v1570_v7  ;;  %v1725_v25 = vadd.f32 %v1724_v49, %v1723_v5  ;;  %v1771_v5 = vmul.f32 %v3090_v19, %v3090_v19  ;;  %v1739_v49 = vadd.f32 %v1738_v11, %v1737_v51 }
 0x4d2   :  { %v1615_v40 = vpop.f32.mrf.mxu1  ;;  %v1574_v14 = vpop.f32.mrf.mxu0 }
 0x4d3   :  { %3248 = vst [vmem:[#allocation17_spill] sm:$0xff] %v3062_v26  ;;  %v3064_v44 = vadd.f32 %v1615_v40, %v1572_v30  ;;  %v1695_v53 = vmul.f32 %v3062_v26, %v3062_v26  ;;  %v1659_v30 = vadd.f32 %v1658_v54, %v1657_v36  ;;  %v1772_v40 = vmul.f32 %v3074_v52, %v3074_v52 }
 0x4d4   :  { %v1617_v45 = vpop.f32.mrf.mxu1  ;;  %v1576_v18 = vpop.f32.mrf.mxu0  ;;  %v1763_v17 = vmul.f32 0.0625, %v1725_v25  ;;  %v1765_v25 = vmul.f32 0.0625, %v1739_v49 }
 0x4d5   :  { %v3072_v48 = vadd.f32 %v1617_v45, %v1574_v14  ;;  %v1696_v59 = vmul.f32 %v3064_v44, %v3064_v44  ;;  %v3094_v14 = vmul.f32 0.0625, %v1666_v60  ;;  %v3098_v36 = vmul.f32 0.0625, %v1659_v30 }
 0x4d6   :  { %v1619_v15 = vpop.f32.mrf.mxu1  ;;  %v1780_v60 = vsub.f32 %v1764_v38, %v1772_v40  ;;  %v1779_v51 = vsub.f32 %v1763_v17, %v1771_v5 }
 0x4d7   :  { %v1667_v21 = vadd.f32 %v3072_v48, %v3062_v26  ;;  %v1703_v58 = vmul.f32 %v3072_v48, %v3072_v48  ;;  %v3082_v1 = vadd.f32 %v1619_v15, %v1576_v18  ;;  %v1774_v56 = vmul.f32 %v3094_v14, %v3094_v14 }
 0x4d8   :  { %v1773_v30 = vmul.f32 %v3098_v36, %v3098_v36  ;;  %v1788_v38 = vmax.f32 %v1780_v60, 0.0 }
 0x4d9   :  { %v1668_v7 = vrot.slane %v1667_v21, 4  ;;  %v1747_v62 = vadd.f32 %v1703_v58, %v1695_v53  ;;  %v1674_v24 = vadd.f32 %v3082_v1, %v3064_v44  ;;  %v1704_v6 = vmul.f32 %v3082_v1, %v3082_v1 }
 0x4da   :  { %v1782_v40 = vsub.f32 %v1766_v42, %v1774_v56 }
 0x4db   :  { %v1669_v3 = vadd.f32 %v1668_v7, %v1667_v21  ;;  %v1748_v4 = vrot.slane %v1747_v62, 4  ;;  %v1675_v13 = vrot.slane %v1674_v24, 4  ;;  %v1754_v34 = vadd.f32 %v1704_v6, %v1696_v59 }
 0x4dc   :  { %v1778_v6 = vsub.f32 %v3066_v28, %v3070_v47  ;;  %v1781_v28 = vsub.f32 %v1765_v25, %v1773_v30 }
 0x4dd   :  { %v1670_v41 = vrot.slane %v1669_v3, 2  ;;  %v1749_v45 = vadd.f32 %v1748_v4, %v1747_v62  ;;  %v1676_v18 = vadd.f32 %v1675_v13, %v1674_v24  ;;  %v1755_v15 = vrot.slane %v1754_v34, 4 }
 0x4df   :  { %v1671_v54 = vadd.f32 %v1670_v41, %v1669_v3  ;;  %v1750_v53 = vrot.slane %v1749_v45, 2  ;;  %v1677_v21 = vrot.slane %v1676_v18, 2  ;;  %v1756_v58 = vadd.f32 %v1755_v15, %v1754_v34 }
 0x4e0   :  { %v1777_v34 = vsub.f32 %v3060_v29, %v1769_v2  ;;  %v1786_v15 = vmax.f32 %v1778_v6, 0.0  ;;  %v1789_v2 = vmax.f32 %v1781_v28, 0.0  ;;  %v1880_v28 = vsub.s32 5, %v2851_v55 }
 0x4e1   :  { %v1672_v59 = vrot.slane %v1671_v54, 1  ;;  %v1751_v7 = vadd.f32 %v1750_v53, %v1749_v45  ;;  %v1678_v62 = vadd.f32 %v1677_v21, %v1676_v18  ;;  %v1757_v24 = vrot.slane %v1756_v58, 2 }
 0x4e2   :  { %v1787_v53 = vmax.f32 %v1779_v51, 0.0  ;;  %v1785_v21 = vmax.f32 %v1777_v34, 0.0 }
 0x4e3   :  { %v1673_v11 = vadd.f32 %v1672_v59, %v1671_v54  ;;  %v1752_v3 = vrot.slane %v1751_v7, 1  ;;  %v1679_v4 = vrot.slane %v1678_v62, 1  ;;  %v1758_v13 = vadd.f32 %v1757_v24, %v1756_v58 }
 0x4e4   :  { %v1804_v54 = vcombine.low %v1787_v53, %v1788_v38  ;;  %v1790_v59 = vmax.f32 %v1782_v40, 0.0  ;;  %v1803_v29 = vcombine.low %v1785_v21, %v1786_v15  ;;  %v1876_v53 = vsub.s32 4, %v2851_v55 }
 0x4e5   :  { %v1687_v39 = vmul.f32 0.0625, %v1673_v11  ;;  %v1753_v41 = vadd.f32 %v1752_v3, %v1751_v7  ;;  %v1680_v45 = vadd.f32 %v1679_v4, %v1678_v62  ;;  %v1759_v18 = vrot.slane %v1758_v13, 1  ;;  %v1624_v3 = vld [vmem:[#allocation12 + $0x21] sm:$0xff] }
 0x4e6   :  { %v1820_v42 = vrot.slane %v1804_v54, %v2854_v57  ;;  %v1805_v56 = vcombine.low %v1789_v2, %v1790_v59  ;;  %v1813_v6 = vrot.slane %v1803_v29, %v2854_v57  ;;  %v1794_v34 = vmul.f32 %v1624_v3, %v1624_v3 }
 0x4e7   :  { %v1767_v47 = vmul.f32 0.0625, %v1753_v41  ;;  %v1775_v17 = vmul.f32 %v1687_v39, %v1687_v39  ;;  %v1688_v5 = vmul.f32 0.0625, %v1680_v45  ;;  %v1760_v49 = vadd.f32 %v1759_v18, %v1758_v13 }
 0x4e8   :  { %v1835_v25 = vcombine.low %v1813_v6, %v1820_v42  ;;  %v1827_v30 = vrot.slane %v1805_v56, %v2854_v57 }
 0x4e9   :  { %v1783_v26 = vsub.f32 %v1767_v47, %v1775_v17  ;;  %v1768_v58 = vmul.f32 0.0625, %v1760_v49  ;;  %v1776_v24 = vmul.f32 %v1688_v5, %v1688_v5  ;;  %v1884_v47 = vsub.s32 6, %v2851_v55 }
 0x4ea   :  { %v1843_v13 = vrot.slane %v1835_v25, %v2854_v57  ;;  %v1888_v17 = vsub.s32 7, %v2851_v55 }
 0x4eb   :  { %v1784_v60 = vsub.f32 %v1768_v58, %v1776_v24  ;;  %v1791_v7 = vmax.f32 %v1783_v26, 0.0  ;;  %v1622_v26 = vld [vmem:[#allocation12 + $0xd] sm:$0xff] }
 0x4ec   :  { %v1793_v18 = vmul.f32 %v1624_v3, %v1622_v26  ;;  %v2235_v26 = vunpack.c.l.s8.bf16 %v2986_v20 }
 0x4ed   :  { %v1792_v62 = vmax.f32 %v1784_v60, 0.0 }
 0x4ef   :  { %v1806_v51 = vcombine.low %v1791_v7, %v1792_v62 }
 0x4f1   :  { %v1834_v11 = vrot.slane %v1806_v51, %v2854_v57 }
 0x4f3   :  { %v1836_v4 = vcombine.low %v1827_v30, %v1834_v11 }
 0x4f5   :  { %v1850_v38 = vrot.slane %v1836_v4, %v2854_v57 }
 0x4f7   :  { %v1851_v40 = vcombine.low %v1843_v13, %v1850_v38 }
 0x4f9   :  { %v1853_v41 = vmul.f32 %v1851_v40, %v1794_v34 }
 0x4fb   :  { %v1854_v45 = vadd.f32 0.8, %v1853_v41 }
 0x4fd   :  { %2589 = vrsqrt.f32 %v1854_v45 }
 0x50a   :  { %v2590_v15 = vpop.eup %2589 }
 0x50b   :  { %v1856_v49 = vmul.f32 %v2590_v15, %v1793_v18  ;;  %v1623_v18 = vld [vmem:[#allocation12 + $0x15] sm:$0xff] }
 0x50d   :  { %v1861_v21 = vrot.slane %v1856_v49, %v2859_v63  ;;  %v1865_v54 = vrot.slane %v1856_v49, %v2862_v0  ;;  %v1869_v59 = vrot.slane %v1856_v49, %v2924_v8  ;;  %v1873_v58 = vrot.slane %v1856_v49, %v2927_v9 }
 0x50e   :  { %v1877_v24 = vrot.slane %v1856_v49, %v1876_v53  ;;  %v1881_v29 = vrot.slane %v1856_v49, %v1880_v28  ;;  %v1885_v2 = vrot.slane %v1856_v49, %v1884_v47  ;;  %v1889_v60 = vrot.slane %v1856_v49, %v1888_v17 }
 0x50f   :  { %v1914_v42 = vmul.f32 %v1861_v21, %v3058_v10  ;;  %v1915_v56 = vmul.f32 %v1865_v54, %v3056_v31  ;;  %v1916_v7 = vmul.f32 %v1869_v59, %v3090_v19  ;;  %v1917_v62 = vmul.f32 %v1873_v58, %v3074_v52  ;;  %v3139_v52 = vld [vmem:[#allocation10 + $0x130] sm:$0xff] }
 0x510   :  { %v1918_v6 = vmul.f32 %v1877_v24, %v3098_v36  ;;  %v1919_v51 = vmul.f32 %v1881_v29, %v3094_v14  ;;  %v1920_v25 = vmul.f32 %v1885_v2, %v1687_v39  ;;  %v1921_v30 = vmul.f32 %v1889_v60, %v1688_v5  ;;  %v3141_v36 = vld [vmem:[#allocation10 + $0x1b0] sm:$0xff] }
 0x511   :  { %v1930_v11 = vcombine.low %v1914_v42, %v1915_v56  ;;  %v1931_v3 = vcombine.low %v1916_v7, %v1917_v62  ;;  %v3145_v5 = vmul.f32 %v1885_v2, %v3072_v48  ;;  %v2236_v41 = vunpack.c.h.s8.bf16 %v3139_v52 }
 0x512   :  { %v1932_v4 = vcombine.low %v1918_v6, %v1919_v51  ;;  %v1933_v13 = vcombine.low %v1920_v25, %v1921_v30  ;;  %v2268_v45 = vunpack.c.h.s8.bf16 %v3141_v36  ;;  %v1913_v15 = vmul.f32 %v1889_v60, %v3082_v1 }
 0x513   :  { %v1940_v34 = vrot.slane %v1930_v11, %v2854_v57  ;;  %v1947_v10 = vrot.slane %v1931_v3, %v2854_v57  ;;  %v2267_v49 = vunpack.c.l.s8.bf16 %v2988_v23  ;;  %v2234_v42 = vunpack.c.l.s8.bf16 %v3139_v52 }
 0x514   :  { %v1954_v31 = vrot.slane %v1932_v4, %v2854_v57  ;;  %v1961_v19 = vrot.slane %v1933_v13, %v2854_v57  ;;  %v2266_v56 = vunpack.c.l.s8.bf16 %v3141_v36  ;;  %v1899_v48 = vmul.f32 %v1865_v54, %v3002_v35 }
 0x515   :  { %v1962_v38 = vcombine.low %v1940_v34, %v1947_v10  ;;  %v1901_v62 = vmul.f32 %v1873_v58, %v3018_v43  ;;  %v1909_v6 = vmul.f32 %v1873_v58, %v3012_v37  ;;  %v1898_v51 = vmul.f32 %v1861_v21, %v2996_v33  ;;  %v3249_v33 = vld [vmem:[#allocation17_spill] sm:$0xff] }
 0x516   :  { %v1963_v14 = vcombine.low %v1954_v31, %v1961_v19  ;;  %v1906_v25 = vmul.f32 %v1861_v21, %v2992_v32  ;;  %v1900_v1 = vmul.f32 %v1869_v59, %v3024_v27  ;;  %v1908_v11 = vmul.f32 %v1869_v59, %v3020_v46 }
 0x517   :  { %v1970_v39 = vrot.slane %v1962_v38, %v2854_v57  ;;  %v1903_v3 = vmul.f32 %v1881_v29, %v3036_v16  ;;  %v1911_v4 = vmul.f32 %v1881_v29, %v3028_v50  ;;  %v1905_v35 = vmul.f32 %v1889_v60, %v3064_v44 }
 0x518   :  { %v1977_v40 = vrot.slane %v1963_v14, %v2854_v57  ;;  %v1907_v57 = vmul.f32 %v1865_v54, %v2998_v12  ;;  %v3167_v12 = vmul.f32 %v1877_v24, %v3042_v61  ;;  %v3170_v37 = vmul.f32 %v1877_v24, %v3038_v22 }
 0x519   :  { %v3173_v43 = vmul.f32 %v1885_v2, %v3249_v33 }
 0x51a   :  { %v1978_v7 = vcombine.low %v1970_v39, %v1977_v40 }
 0x51c   :  { %v1980_v30 = vsub.f32 %v1623_v18, %v1978_v7 }
 0x51e   :  { %v2013_v32 = vrot.slane %v1980_v30, %v1888_v17  ;;  %v1989_v27 = vrot.slane %v1980_v30, %v2862_v0  ;;  %v1997_v46 = vrot.slane %v1980_v30, %v2927_v9  ;;  %v1985_v16 = vrot.slane %v1980_v30, %v2859_v63 }
 0x51f   :  { %v1993_v50 = vrot.slane %v1980_v30, %v2924_v8  ;;  %v2005_v44 = vrot.slane %v1980_v30, %v1880_v28  ;;  %v2001_v61 = vrot.slane %v1980_v30, %v1876_v53  ;;  %v3185_v22 = vrot.slane %v1980_v30, %v1884_v47 }
 0x520   :  { %v2037_v21 = vadd.f32 %v2013_v32, %v1913_v15  ;;  %v2023_v17 = vadd.f32 %v1989_v27, %v1899_v48  ;;  %v2031_v54 = vadd.f32 %v1989_v27, %v1907_v57  ;;  %v2025_v59 = vadd.f32 %v1997_v46, %v1901_v62 }
 0x521   :  { %v2033_v58 = vadd.f32 %v1997_v46, %v1909_v6  ;;  %v2022_v9 = vadd.f32 %v1985_v16, %v1898_v51  ;;  %v2030_v24 = vadd.f32 %v1985_v16, %v1906_v25  ;;  %v2024_v29 = vadd.f32 %v1993_v50, %v1900_v1  ;;  %v2131_v1 = vld [vmem:[#allocation10 + $0x128] sm:$0xff] }
 0x522   :  { %vm2039_vm0 = vcmp.gt.f32.partialorder %v2023_v17, 0.0  ;;  %vm2047_vm1 = vcmp.gt.f32.partialorder %v2031_v54, 0.0  ;;  %v2055_v8 = vmul.f32 0.2, %v2023_v17  ;;  %v2063_v2 = vmul.f32 0.2, %v2031_v54 }
 0x523   :  { %vm2041_vm2 = vcmp.gt.f32.partialorder %v2025_v59, 0.0  ;;  %vm2049_vm3 = vcmp.gt.f32.partialorder %v2033_v58, 0.0  ;;  %v2057_v28 = vmul.f32 0.2, %v2025_v59  ;;  %v2065_v53 = vmul.f32 0.2, %v2033_v58 }
 0x524   :  { %v2071_v60 = vsel %vm2039_vm0, %v2023_v17, %v2055_v8  ;;  %v2079_v55 = vsel %vm2047_vm1, %v2031_v54, %v2063_v2  ;;  %vm2038_vm4 = vcmp.gt.f32.partialorder %v2022_v9, 0.0  ;;  %vm2046_vm5 = vcmp.gt.f32.partialorder %v2030_v24, 0.0  ;;  %v2130_v17 = vld [vmem:[#allocation10 + $0x120] sm:$0xff]  ;;  %v2128_v2 = vld [vmem:[#allocation10 + $0x110] sm:$0xff] }
 0x525   :  { %v2087_v47 = vpack.c.bf16 %v2079_v55, %v2071_v60  ;;  %v2073_v13 = vsel %vm2041_vm2, %v2025_v59, %v2057_v28  ;;  %v2081_v34 = vsel %vm2049_vm3, %v2033_v58, %v2065_v53  ;;  %v2054_v10 = vmul.f32 0.2, %v2022_v9  ;;  %v2129_v58 = vld [vmem:[#allocation10 + $0x118] sm:$0xff]  ;;  %v2144_v53 = vld [vmem:[#allocation10 + $0x190] sm:$0xff] }
 0x526   :  { %v2089_v31 = vpack.c.bf16 %v2081_v34, %v2073_v13  ;;  %v2062_v19 = vmul.f32 0.2, %v2030_v24  ;;  %v2032_v38 = vadd.f32 %v1993_v50, %v1908_v11  ;;  %vm2040_vm6 = vcmp.gt.f32.partialorder %v2024_v29, 0.0  ;;  %v2127_v13 = vld [vmem:[#allocation10 + $0x108] sm:$0xff] }
 0x527   :  { %2318 = vmatprep.mubr.bf16.mxu0 %v2087_v47  ;;  %v2070_v14 = vsel %vm2038_vm4, %v2022_v9, %v2054_v10  ;;  %v2056_v39 = vmul.f32 0.2, %v2024_v29  ;;  %v2027_v40 = vadd.f32 %v2005_v44, %v1903_v3  ;;  %v2035_v18 = vadd.f32 %v2005_v44, %v1911_v4 }
 0x528   :  { %2361 = vmatprep.mubr.bf16.mxu1 %v2089_v31  ;;  %v2078_v15 = vsel %vm2046_vm5, %v2030_v24, %v2062_v19  ;;  %vm2048_vm7 = vcmp.gt.f32.partialorder %v2032_v38, 0.0  ;;  %v2064_v7 = vmul.f32 0.2, %v2032_v38  ;;  %v2029_v48 = vadd.f32 %v2013_v32, %v1905_v35  ;;  %v2147_v35 = vld [vmem:[#allocation10 + $0x1a8] sm:$0xff]  ;;  %v2145_v24 = vld [vmem:[#allocation10 + $0x198] sm:$0xff] }
 0x529   :  { %v2086_v57 = vpack.c.bf16 %v2078_v15, %v2070_v14  ;;  %v2072_v62 = vsel %vm2040_vm6, %v2024_v29, %v2056_v39  ;;  %vm2043_vm8 = vcmp.gt.f32.partialorder %v2027_v40, 0.0  ;;  %vm2051_vm9 = vcmp.gt.f32.partialorder %v2035_v18, 0.0  ;;  %v2143_v31 = vld [vmem:[#allocation10 + $0x188] sm:$0xff] }
 0x52a   :  { %v2080_v6 = vsel %vm2048_vm7, %v2032_v38, %v2064_v7  ;;  %v2059_v51 = vmul.f32 0.2, %v2027_v40  ;;  %v2067_v25 = vmul.f32 0.2, %v2035_v18  ;;  %vm2045_vm10 = vcmp.gt.f32.partialorder %v2029_v48, 0.0  ;;  %v2126_v38 = vld [vmem:[#allocation10 + $0x100] sm:$0xff] }
 0x52b   :  { %2319 = vmatmul.mubr.bf16.vlgmr.msra.gmra.mxu0 %v2086_v57  ;;  %v2088_v30 = vpack.c.bf16 %v2080_v6, %v2072_v62  ;;  %vm2053_vm11 = vcmp.gt.f32.partialorder %v2037_v21, 0.0  ;;  %v2061_v11 = vmul.f32 0.2, %v2029_v48  ;;  %v2069_v3 = vmul.f32 0.2, %v2037_v21  ;;  %v2157_v6 = vld [vmem:[#allocation10 + $0x1f8] sm:$0xff] }
 0x52c   :  { %2373 = vmatpush1.bf16.msra.mxu0 %v2236_v41  ;;  %v2075_v4 = vsel %vm2043_vm8, %v2027_v40, %v2059_v51  ;;  %v2083_v33 = vsel %vm2051_vm9, %v2035_v18, %v2067_v25  ;;  %v2026_v32 = vadd.f32 %v2001_v61, %v3167_v12  ;;  %v2034_v27 = vadd.f32 %v2001_v61, %v3170_v37  ;;  %v2146_v37 = vld [vmem:[#allocation10 + $0x1a0] sm:$0xff]  ;;  %v2140_v25 = vld [vmem:[#allocation10 + $0x170] sm:$0xff] }
 0x52d   :  { %2362 = vmatmul.mubr.bf16.vlgmr.msra.gmra.mxu1 %v2088_v30  ;;  %v2091_v46 = vpack.c.bf16 %v2083_v33, %v2075_v4  ;;  %v2077_v16 = vsel %vm2045_vm10, %v2029_v48, %v2061_v11  ;;  %v2085_v50 = vsel %vm2053_vm11, %v2037_v21, %v2069_v3  ;;  %2374 = vmatprep.subr.bf16.mxu0 %v2235_v26  ;;  %v2233_v44 = vunpack.c.h.s8.bf16 %v2131_v1  ;;  %v2142_v40 = vld [vmem:[#allocation10 + $0x180] sm:$0xff]  ;;  %v2141_v48 = vld [vmem:[#allocation10 + $0x178] sm:$0xff]  ;;  %v2156_v11 = vld [vmem:[#allocation10 + $0x1f0] sm:$0xff] }
 0x52e   :  { %2416 = vmatpush1.bf16.msra.mxu1 %v2268_v45  ;;  %v2093_v41 = vpack.c.bf16 %v2085_v50, %v2077_v16  ;;  %vm2042_vm12 = vcmp.gt.f32.partialorder %v2026_v32, 0.0  ;;  %vm2050_vm13 = vcmp.gt.f32.partialorder %v2034_v27, 0.0  ;;  %v2058_v54 = vmul.f32 0.2, %v2026_v32  ;;  %v2138_v50 = vld [vmem:[#allocation10 + $0x160] sm:$0xff] }
 0x52f   :  { %2404 = vmatprep.mubr.bf16.mxu0 %v2091_v46  ;;  %2417 = vmatprep.subr.bf16.mxu1 %v2267_v49  ;;  %v2265_v12 = vunpack.c.h.s8.bf16 %v2147_v35  ;;  %v2066_v61 = vmul.f32 0.2, %v2034_v27  ;;  %v2028_v20 = vadd.f32 %v3185_v22, %v3173_v43  ;;  %v2036_v26 = vadd.f32 %v3185_v22, %v3145_v5  ;;  %v2155_v46 = vld [vmem:[#allocation10 + $0x1e8] sm:$0xff] }
 0x530   :  { %2447 = vmatprep.mubr.bf16.mxu1 %v2093_v41  ;;  %2375 = vmatpush1.bf16.msra.mxu0 %v2234_v42  ;;  %v2232_v45 = vunpack.c.h.s8.bf16 %v2130_v17  ;;  %v2231_v21 = vunpack.c.l.s8.bf16 %v2131_v1  ;;  %v3203_v59 = vsel %vm2042_vm12, %v2026_v32, %v2058_v54  ;;  %v2264_v43 = vunpack.c.h.s8.bf16 %v2146_v37  ;;  %v2154_v41 = vld [vmem:[#allocation10 + $0x1e0] sm:$0xff] }
 0x531   :  { %2376 = vmatprep.subr.bf16.mxu0 %v2233_v44  ;;  %v3205_v23 = vsel %vm2050_vm13, %v2034_v27, %v2066_v61  ;;  %vm2044_vm14 = vcmp.gt.f32.partialorder %v2028_v20, 0.0  ;;  %vm2052_vm15 = vcmp.gt.f32.partialorder %v2036_v26, 0.0  ;;  %v2060_v49 = vmul.f32 0.2, %v2028_v20  ;;  %v2137_v61 = vld [vmem:[#allocation10 + $0x158] sm:$0xff] }
 0x532   :  { %2418 = vmatpush1.bf16.msra.mxu1 %v2266_v56  ;;  %v2090_v5 = vpack.c.bf16 %v3205_v23, %v3203_v59  ;;  %v2068_v52 = vmul.f32 0.2, %v2036_v26  ;;  %v2263_v42 = vunpack.c.l.s8.bf16 %v2147_v35  ;;  %v2230_v9 = vunpack.c.l.s8.bf16 %v2130_v17  ;;  %v2139_v35 = vld [vmem:[#allocation10 + $0x168] sm:$0xff] }
 0x533   :  { %2419 = vmatprep.subr.bf16.mxu1 %v2265_v12  ;;  %v3211_v22 = vsel %vm2044_vm14, %v2028_v20, %v2060_v49  ;;  %v2229_v8 = vunpack.c.h.s8.bf16 %v2129_v58  ;;  %v2262_v56 = vunpack.c.l.s8.bf16 %v2146_v37  ;;  %v2261_v28 = vunpack.c.h.s8.bf16 %v2145_v24  ;;  %v2136_v49 = vld [vmem:[#allocation10 + $0x150] sm:$0xff] }
 0x534   :  { %2377 = vmatpush1.bf16.msra.mxu0 %v2232_v45  ;;  %v3213_v29 = vsel %vm2052_vm15, %v2036_v26, %v2068_v52  ;;  %v2228_v60 = vunpack.c.h.s8.bf16 %v2128_v2  ;;  %v2227_v55 = vunpack.c.l.s8.bf16 %v2129_v58  ;;  %v2260_v47 = vunpack.c.h.s8.bf16 %v2144_v53  ;;  %v2153_v45 = vld [vmem:[#allocation10 + $0x1d8] sm:$0xff]  ;;  %v2152_v52 = vld [vmem:[#allocation10 + $0x1d0] sm:$0xff] }
 0x535   :  { %2378 = vmatprep.subr.bf16.mxu0 %v2231_v21  ;;  %v2092_v36 = vpack.c.bf16 %v3213_v29, %v3211_v22  ;;  %v2259_v34 = vunpack.c.l.s8.bf16 %v2145_v24  ;;  %v2226_v10 = vunpack.c.l.s8.bf16 %v2128_v2  ;;  %v2225_v19 = vunpack.c.h.s8.bf16 %v2127_v13 }
 0x536   :  { %2420 = vmatpush1.bf16.msra.mxu1 %v2264_v43  ;;  %v2258_v14 = vunpack.c.l.s8.bf16 %v2144_v53  ;;  %v2257_v39 = vunpack.c.h.s8.bf16 %v2143_v31  ;;  %v2224_v18 = vunpack.c.h.s8.bf16 %v2126_v38  ;;  %v2223_v15 = vunpack.c.l.s8.bf16 %v2127_v13  ;;  %v2150_v13 = vld [vmem:[#allocation10 + $0x1c0] sm:$0xff] }
 0x537   :  { %2421 = vmatprep.subr.bf16.mxu1 %v2263_v42  ;;  %v2256_v7 = vunpack.c.h.s8.bf16 %v2142_v40  ;;  %v2255_v57 = vunpack.c.l.s8.bf16 %v2143_v31  ;;  %v2222_v62 = vunpack.c.l.s8.bf16 %v2126_v38  ;;  %v2253_v51 = vunpack.c.h.s8.bf16 %v2141_v48 }
 0x538   :  { %2379 = vmatpush1.bf16.msra.mxu0 %v2230_v9  ;;  %v2254_v1 = vunpack.c.l.s8.bf16 %v2142_v40  ;;  %v2285_v30 = vunpack.c.h.s8.bf16 %v2157_v6  ;;  %v2252_v3 = vunpack.c.h.s8.bf16 %v2140_v25  ;;  %v2251_v4 = vunpack.c.l.s8.bf16 %v2141_v48 }
 0x539   :  { %2380 = vmatprep.subr.bf16.mxu0 %v2229_v8  ;;  %v2284_v33 = vunpack.c.h.s8.bf16 %v2156_v11  ;;  %v2283_v32 = vunpack.c.l.s8.bf16 %v2157_v6  ;;  %v2250_v27 = vunpack.c.l.s8.bf16 %v2140_v25  ;;  %v2249_v16 = vunpack.c.h.s8.bf16 %v2139_v35  ;;  %v2135_v8 = vld [vmem:[#allocation10 + $0x148] sm:$0xff] }
 0x53a   :  { %2422 = vmatpush1.bf16.msra.mxu1 %v2262_v56  ;;  %v2282_v44 = vunpack.c.l.s8.bf16 %v2156_v11  ;;  %v2281_v17 = vunpack.c.h.s8.bf16 %v2155_v46  ;;  %v2248_v54 = vunpack.c.h.s8.bf16 %v2138_v50  ;;  %v2247_v12 = vunpack.c.l.s8.bf16 %v2139_v35 }
 0x53b   :  { %2423 = vmatprep.subr.bf16.mxu1 %v2261_v28  ;;  %v2280_v37 = vunpack.c.h.s8.bf16 %v2154_v41  ;;  %v2279_v20 = vunpack.c.l.s8.bf16 %v2155_v46  ;;  %v2246_v26 = vunpack.c.l.s8.bf16 %v2138_v50  ;;  %v2245_v21 = vunpack.c.h.s8.bf16 %v2137_v61  ;;  %v2151_v28 = vld [vmem:[#allocation10 + $0x1c8] sm:$0xff] }
 0x53c   :  { %2381 = vmatpush1.bf16.msra.mxu0 %v2228_v60  ;;  %v2278_v43 = vunpack.c.l.s8.bf16 %v2154_v41  ;;  %v2277_v58 = vunpack.c.h.s8.bf16 %v2153_v45  ;;  %v2244_v42 = vunpack.c.h.s8.bf16 %v2136_v49  ;;  %v2243_v9 = vunpack.c.l.s8.bf16 %v2137_v61  ;;  %v2134_v60 = vld [vmem:[#allocation10 + $0x140] sm:$0xff] }
 0x53d   :  { %2382 = vmatprep.subr.bf16.mxu0 %v2227_v55  ;;  %v2276_v24 = vunpack.c.h.s8.bf16 %v2152_v52  ;;  %v2275_v2 = vunpack.c.l.s8.bf16 %v2153_v45  ;;  %v2242_v56 = vunpack.c.l.s8.bf16 %v2136_v49  ;;  %v2241_v53 = vunpack.c.h.s8.bf16 %v2135_v8 }
 0x53e   :  { %2424 = vmatpush1.bf16.msra.mxu1 %v2260_v47  ;;  %v2274_v55 = vunpack.c.l.s8.bf16 %v2152_v52  ;;  %v2273_v47 = vunpack.c.h.s8.bf16 %v2151_v28  ;;  %v2272_v31 = vunpack.c.h.s8.bf16 %v2150_v13  ;;  %v2238_v38 = vunpack.c.l.s8.bf16 %v2134_v60 }
 0x53f   :  { %2425 = vmatprep.subr.bf16.mxu1 %v2259_v34  ;;  %v2240_v34 = vunpack.c.h.s8.bf16 %v2134_v60 }
 0x540   :  { %2383 = vmatpush1.bf16.msra.mxu0 %v2226_v10  ;;  %v2239_v10 = vunpack.c.l.s8.bf16 %v2135_v8 }
 0x541   :  { %2384 = vmatprep.subr.bf16.mxu0 %v2225_v19  ;;  %v2271_v19 = vunpack.c.l.s8.bf16 %v2151_v28 }
 0x542   :  { %2426 = vmatpush1.bf16.msra.mxu1 %v2258_v14  ;;  %v2270_v14 = vunpack.c.l.s8.bf16 %v2150_v13 }
 0x543   :  { %2427 = vmatprep.subr.bf16.mxu1 %v2257_v39 }
 0x544   :  { %2385 = vmatpush1.bf16.msra.mxu0 %v2224_v18 }
 0x545   :  { %2386 = vmatprep.subr.bf16.mxu0 %v2223_v15 }
 0x546   :  { %2428 = vmatpush1.bf16.msra.mxu1 %v2256_v7 }
 0x547   :  { %2429 = vmatprep.subr.bf16.mxu1 %v2255_v57 }
 0x548   :  { %2387 = vmatpush1.bf16.msra.mxu0 %v2222_v62  ;;  %v2458_v62 = vld [vmem:[#allocation12 + $0x29] sm:$0x3] }
 0x549   :  { %2388 = vmatprep.subr.bf16.mxu0 %v2253_v51  ;;  %v2474_v51 = vld [vmem:[#allocation12 + $0x2b] sm:$0x3]  ;;  %v2463_v59 = vrot.slane %v2458_v62, %v2859_v63 }
 0x54a   :  { %2430 = vmatpush1.bf16.msra.mxu1 %v2254_v1  ;;  %v2483_v35 = vrot.slane %v2474_v51, %v2862_v0 }
 0x54b   :  { %2431 = vmatprep.subr.bf16.mxu1 %v2285_v30 }
 0x54c   :  { %2389 = vmatpush2.bf16.msra.mxu0 %v2252_v3 }
 0x54d   :  { %2390 = vmatprep.subr.bf16.mxu0 %v2251_v4  ;;  %v2467_v4 = vrot.slane %v2458_v62, %v2862_v0 }
 0x54e   :  { %2432 = vmatpush2.bf16.msra.mxu1 %v2284_v33 }
 0x54f   :  { %2433 = vmatprep.subr.bf16.mxu1 %v2283_v32 }
 0x550   :  { %2391 = vmatpush2.bf16.msra.mxu0 %v2250_v27 }
 0x551   :  { %2392 = vmatprep.subr.bf16.mxu0 %v2249_v16 }
 0x552   :  { %2434 = vmatpush2.bf16.msra.mxu1 %v2282_v44 }
 0x553   :  { %2435 = vmatprep.subr.bf16.mxu1 %v2281_v17 }
 0x554   :  { %2393 = vmatpush2.bf16.msra.mxu0 %v2248_v54 }
 0x555   :  { %2394 = vmatprep.subr.bf16.mxu0 %v2247_v12 }
 0x556   :  { %2436 = vmatpush2.bf16.msra.mxu1 %v2280_v37 }
 0x557   :  { %2437 = vmatprep.subr.bf16.mxu1 %v2279_v20 }
 0x558   :  { %2395 = vmatpush2.bf16.msra.mxu0 %v2246_v26 }
 0x559   :  { %2396 = vmatprep.subr.bf16.mxu0 %v2245_v21 }
 0x55a   :  { %2438 = vmatpush2.bf16.msra.mxu1 %v2278_v43 }
 0x55b   :  { %2439 = vmatprep.subr.bf16.mxu1 %v2277_v58 }
 0x55c   :  { %2397 = vmatpush2.bf16.msra.mxu0 %v2244_v42 }
 0x55d   :  { %2398 = vmatprep.subr.bf16.mxu0 %v2243_v9 }
 0x55e   :  { %2440 = vmatpush2.bf16.msra.mxu1 %v2276_v24 }
 0x55f   :  { %2441 = vmatprep.subr.bf16.mxu1 %v2275_v2 }
 0x560   :  { %2399 = vmatpush2.bf16.msra.mxu0 %v2242_v56 }
 0x561   :  { %2400 = vmatprep.subr.bf16.mxu0 %v2241_v53 }
 0x562   :  { %2442 = vmatpush2.bf16.msra.mxu1 %v2274_v55 }
 0x563   :  { %2443 = vmatprep.subr.bf16.mxu1 %v2273_v47 }
 0x564   :  { %2401 = vmatpush2.bf16.msra.mxu0 %v2240_v34 }
 0x565   :  { %2402 = vmatprep.subr.bf16.mxu0 %v2239_v10 }
 0x566   :  { %2444 = vmatpush2.bf16.msra.mxu1 %v2272_v31 }
 0x567   :  { %2445 = vmatprep.subr.bf16.mxu1 %v2271_v19 }
 0x568   :  { %2403 = vmatpush2.bf16.msra.mxu0 %v2238_v38 }
 0x56a   :  { %2446 = vmatpush2.bf16.msra.mxu1 %v2270_v14 }
 0x56b   :  { %2405 = vmatmul.mubr.bf16.vlgmr.msra.gmra.mxu0 %v2090_v5  ;;  %v2479_v5 = vrot.slane %v2474_v51, %v2859_v63 }
 0x56d   :  { %2448 = vmatmul.mubr.bf16.vlgmr.msra.gmra.mxu1 %v2092_v36 }
 0x5eb   :  { %v2320_v39 = vpop.f32.mrf.mxu0 }
 0x5ed   :  { %v2363_v40 = vpop.f32.mrf.mxu1  ;;  %v2322_v18 = vpop.f32.mrf.mxu0 }
 0x5ee   :  { %v2364_v6 = vadd.f32 %v2363_v40, %v2320_v39 }
 0x5ef   :  { %v2365_v15 = vpop.f32.mrf.mxu1  ;;  %v2324_v7 = vpop.f32.mrf.mxu0 }
 0x5f0   :  { %v2366_v30 = vadd.f32 %v2365_v15, %v2322_v18 }
 0x5f1   :  { %v2367_v48 = vpop.f32.mrf.mxu1  ;;  %v2326_v57 = vpop.f32.mrf.mxu0 }
 0x5f2   :  { %v2368_v29 = vadd.f32 %v2367_v48, %v2324_v7 }
 0x5f3   :  { %v2369_v25 = vpop.f32.mrf.mxu1 }
 0x5f4   :  { %v2370_v27 = vadd.f32 %v2369_v25, %v2326_v57 }
 0x62b   :  { %v2406_v1 = vpop.f32.mrf.mxu0 }
 0x62c   :  { %v2407_v11 = vadd.f32 %v2406_v1, %v2364_v6 }
 0x62d   :  { %v2449_v23 = vpop.f32.mrf.mxu1  ;;  %v2408_v22 = vpop.f32.mrf.mxu0 }
 0x62e   :  { %v2450_v36 = vadd.f32 %v2449_v23, %v2407_v11  ;;  %v2409_v3 = vadd.f32 %v2408_v22, %v2366_v30 }
 0x62f   :  { %v2451_v33 = vpop.f32.mrf.mxu1  ;;  %v2410_v32 = vpop.f32.mrf.mxu0 }
 0x630   :  { %v2470_v46 = vmul.f32 %v2463_v59, %v2450_v36  ;;  %v2452_v16 = vadd.f32 %v2451_v33, %v2409_v3  ;;  %v2411_v50 = vadd.f32 %v2410_v32, %v2368_v29 }
 0x631   :  { %v2453_v44 = vpop.f32.mrf.mxu1  ;;  %v2412_v17 = vpop.f32.mrf.mxu0 }
 0x632   :  { %v2486_v41 = vadd.f32 %v2479_v5, %v2470_v46  ;;  %v2471_v54 = vmul.f32 %v2467_v4, %v2452_v16  ;;  %v2454_v12 = vadd.f32 %v2453_v44, %v2411_v50  ;;  %v2413_v63 = vadd.f32 %v2412_v17, %v2370_v27 }
 0x633   :  { %v2455_v37 = vpop.f32.mrf.mxu1 }
 0x634   :  { %2591 = vtanh.f32 %v2486_v41  ;;  %v2487_v61 = vadd.f32 %v2483_v35, %v2471_v54  ;;  %v2472_v20 = vmul.f32 %v2463_v59, %v2454_v12  ;;  %v2456_v26 = vadd.f32 %v2455_v37, %v2413_v63 }
 0x636   :  { %2593 = vtanh.f32 %v2487_v61  ;;  %v2488_v45 = vadd.f32 %v2479_v5, %v2472_v20  ;;  %v2473_v21 = vmul.f32 %v2467_v4, %v2456_v26 }
 0x638   :  { %2595 = vtanh.f32 %v2488_v45  ;;  %v2489_v0 = vadd.f32 %v2483_v35, %v2473_v21 }
 0x63a   :  { %2597 = vtanh.f32 %v2489_v0 }
 0x641   :  { %v2592_v49 = vpop.eup %2591 }
 0x642   :  { %2494 = vst [vmem:[%s3246_s7] sm:$0xff] %v2592_v49 }
 0x643   :  { %v2594_v43 = vpop.eup %2593 }
 0x644   :  { %2495 = vst [vmem:[%s3246_s7 + $0x8] sm:$0xff] %v2594_v43 }
 0x645   :  { %v2596_v58 = vpop.eup %2595 }
 0x646   :  { %2496 = vst [vmem:[%s3246_s7 + $0x10] sm:$0xff] %v2596_v58 }
 0x647   :  { %v2598_v52 = vpop.eup %2597 }
 0x648   :  { %2497 = vst [vmem:[%s3246_s7 + $0x18] sm:$0xff] %v2598_v52 }
 0x649   :  { %2502 = vsyncpa [#allocation3], 1 }
 0x64a   :  { %2503 = vsyncpa [#allocation5], 1 }
 0x64b   :  { %2504 = vsyncpa [#allocation8], 1 }
 0x64c   :  { %2505 = vsyncpa [#allocation11], 1 }

</bundles_post_ra>
